<compile_context>
chip_gen: v7x
topology: tpu7x:2x2x1
jax: 0.10.0
libtpu: 0.0.40
codegen_flags: <defaults>
</compile_context>

<pallas_src>
import functools

import jax
import jax.numpy as jnp
from jax.experimental import pallas as pl
from jax.experimental.pallas import tpu as pltpu


# ------------------------------ Pallas kernel -------------------------------

def _fused_block_kernel(*refs, num_heads, num_layers, has_conv):
    f32 = jnp.float32
    bf16 = jnp.bfloat16

    if has_conv:
        (x_ref, wc_ref, bc_ref, wl_ref, bl_ref,
         wqkv_ref, bqkv_ref, wo_ref, bo_ref, wffn_ref, o_ref) = refs
    else:
        (x_ref, wl_ref, bl_ref,
         wqkv_ref, bqkv_ref, wo_ref, bo_ref, wffn_ref, o_ref) = refs

    x = x_ref[...]                                        # (L, c_in) f32
    if has_conv:
        # 1x1 conv (bias=False) fused with eval-mode BN, then SiLU.
        y = jnp.dot(x.astype(bf16), wc_ref[...],
                    preferred_element_type=f32) + bc_ref[...]
        p = y * jax.nn.sigmoid(y)                         # SiLU in f32
    else:
        p = x

    # p = p + Linear(p)     (Linear has bias)
    p = p + jnp.dot(p.astype(bf16), wl_ref[...],
                    preferred_element_type=f32) + bl_ref[...]

    L, c = p.shape
    d = c // num_heads
    scale = 1.0 / float(d) ** 0.5

    for layer in range(num_layers):                       # static, small count
        # Packed + folded QKV projection: one lane-dense (L, 3C) MXU pass.
        qkv = jnp.dot(p.astype(bf16), wqkv_ref[layer],
                      preferred_element_type=f32) + bqkv_ref[layer]   # (L, 3c)
        w_o = wo_ref[layer]                               # (c, c) bf16

        # Multi-head attention with the out-projection folded into the
        # per-head accumulation (no concatenate of d-wide chunks).
        mo = jnp.zeros((L, c), f32)
        for h in range(num_heads):
            lo = h * d
            qh = qkv[:, lo:lo + d] * scale
            kh = qkv[:, c + lo:c + lo + d]
            vh = qkv[:, 2 * c + lo:2 * c + lo + d]
            s = jax.lax.dot_general(qh.astype(bf16), kh.astype(bf16),
                                    (((1,), (1,)), ((), ())),
                                    preferred_element_type=f32)       # (L, L)
            s = s - jnp.max(s, axis=-1, keepdims=True)
            e = jnp.exp(s)
            a = e * pl.reciprocal(jnp.sum(e, axis=-1, keepdims=True),
                                  approx=True)
            oh = jnp.dot(a.astype(bf16), vh.astype(bf16),
                         preferred_element_type=f32)                  # (L, d)
            mo = mo + jnp.dot(oh.astype(bf16), w_o[lo:lo + d, :],
                              preferred_element_type=f32)             # (L, c)
        x1 = mo + bo_ref[layer] + p                       # out-proj bias + residual

        # fc2(fc1(x1)) + x1, with Wf1/Wf2 pre-folded into one (c, c) matrix.
        p = jnp.dot(x1.astype(bf16), wffn_ref[layer],
                    preferred_element_type=f32) + x1

    o_ref[...] = p


# -------------------------------- wrapper ------------------------------------

def transformer_block_forward(x, params, num_heads):
    f32, bf16 = jnp.float32, jnp.bfloat16
    b, c1, w, h = x.shape
    c2 = params["w_lin"].shape[0]
    L = w * h
    num_layers = len(params["layers"])
    has_conv = c1 != c2

    # ---- one-time weight preprocessing / algebraic folding (plain XLA) ----
    if has_conv:
        scale = params["bn_gamma"] / jnp.sqrt(params["bn_var"] + 1e-5)
        w_conv = (params["w_conv"] * scale[:, None]).T.astype(bf16)   # (c1, c2)
        b_conv = (params["bn_beta"] - params["bn_mean"] * scale)[None, :]
        x_in = x.transpose(0, 2, 3, 1).reshape(b, L, c1)              # tokens x c1
        c_in = c1
    else:
        x_in = x.reshape(b, c2, L).transpose(0, 2, 1)                 # tokens x c2
        c_in = c2

    w_lin = params["w_lin"].T.astype(bf16)                            # (c2, c2)
    b_lin = params["b_lin"][None, :]

    c = c2
    w_qkv_l, b_qkv_l, w_o_l, b_o_l, w_ffn_l = [], [], [], [], []
    for lp in params["layers"]:
        # Fold the q/k/v Linears (bias=False) into the MHA in-projection.
        wq = lp["wq"].T @ lp["in_w"][:c].T
        wk = lp["wk"].T @ lp["in_w"][c:2 * c].T
        wv = lp["wv"].T @ lp["in_w"][2 * c:].T
        w_qkv_l.append(jnp.concatenate([wq, wk, wv], axis=1))         # (c, 3c)
        b_qkv_l.append(lp["in_b"][None, :])                           # (1, 3c)
        w_o_l.append(lp["wo"].T)                                      # (c, c)
        b_o_l.append(lp["bo"][None, :])                               # (1, c)
        # fc2(fc1(.)) has no nonlinearity in between -> fold the weights.
        w_ffn_l.append(lp["wf1"].T @ lp["wf2"].T)                     # (c, c)

    w_qkv = jnp.stack(w_qkv_l).astype(bf16)       # (nl, c, 3c)
    b_qkv = jnp.stack(b_qkv_l)                    # (nl, 1, 3c)  f32
    w_o = jnp.stack(w_o_l).astype(bf16)           # (nl, c, c)
    b_o = jnp.stack(b_o_l)                        # (nl, 1, c)   f32
    w_ffn = jnp.stack(w_ffn_l).astype(bf16)       # (nl, c, c)

    # ---- single fused pallas_call over the batch grid ----
    sq = pl.Squeezed()
    x_spec = pl.BlockSpec((sq, L, c_in), lambda i: (i, 0, 0))
    out_spec = pl.BlockSpec((sq, L, c2), lambda i: (i, 0, 0))

    def full(shape):
        n = len(shape)
        return pl.BlockSpec(shape, lambda i, _n=n: (0,) * _n)

    in_specs = [x_spec]
    args = [x_in]
    if has_conv:
        in_specs += [full((c_in, c2)), full((1, c2))]
        args += [w_conv, b_conv]
    in_specs += [full((c2, c2)), full((1, c2)),
                 full((num_layers, c2, 3 * c2)), full((num_layers, 1, 3 * c2)),
                 full((num_layers, c2, c2)), full((num_layers, 1, c2)),
                 full((num_layers, c2, c2))]
    args += [w_lin, b_lin, w_qkv, b_qkv, w_o, b_o, w_ffn]

    kern = functools.partial(_fused_block_kernel, num_heads=num_heads,
                             num_layers=num_layers, has_conv=has_conv)
    out = pl.pallas_call(
        kern,
        out_shape=jax.ShapeDtypeStruct((b, L, c2), f32),
        grid=(b,),
        in_specs=in_specs,
        out_specs=out_spec,
        compiler_params=pltpu.CompilerParams(
            dimension_semantics=("parallel",)),
    )(*args)

    return out.transpose(0, 2, 1).reshape(b, c2, w, h)


# --------------------------- pure-JAX reference -----------------------------

def reference_forward(x, params, num_heads):
    hp = jax.lax.Precision.HIGHEST
    b, c1, w, h = x.shape
    c2 = params["w_lin"].shape[0]
    if c1 != c2:
        scale = params["bn_gamma"] / jnp.sqrt(params["bn_var"] + 1e-5)
        y = jnp.einsum("bchw,oc->bohw", x, params["w_conv"], precision=hp)
        y = (y * scale[None, :, None, None]
             + (params["bn_beta"] - params["bn_mean"] * scale)[None, :, None, None])
        x = y * jax.nn.sigmoid(y)
    p = x.reshape(b, c2, w * h).transpose(2, 0, 1)        # (L, B, C), seq-first
    p = p + jnp.einsum("lbc,dc->lbd", p, params["w_lin"], precision=hp) + params["b_lin"]
    c = c2
    d = c // num_heads
    L = p.shape[0]
    for lp in params["layers"]:
        q = jnp.einsum("lbc,dc->lbd", p, lp["wq"], precision=hp)
        k = jnp.einsum("lbc,dc->lbd", p, lp["wk"], precision=hp)
        v = jnp.einsum("lbc,dc->lbd", p, lp["wv"], precision=hp)
        qp = jnp.einsum("lbc,dc->lbd", q, lp["in_w"][:c], precision=hp) + lp["in_b"][:c]
        kp = jnp.einsum("lbc,dc->lbd", k, lp["in_w"][c:2 * c], precision=hp) + lp["in_b"][c:2 * c]
        vp = jnp.einsum("lbc,dc->lbd", v, lp["in_w"][2 * c:], precision=hp) + lp["in_b"][2 * c:]
        qh = qp.reshape(L, b, num_heads, d) / (float(d) ** 0.5)
        kh = kp.reshape(L, b, num_heads, d)
        vh = vp.reshape(L, b, num_heads, d)
        s = jnp.einsum("lbhd,mbhd->bhlm", qh, kh, precision=hp)
        a = jax.nn.softmax(s, axis=-1)
        o = jnp.einsum("bhlm,mbhd->lbhd", a, vh, precision=hp).reshape(L, b, c)
        mo = jnp.einsum("lbc,dc->lbd", o, lp["wo"], precision=hp) + lp["bo"]
        p = mo + p
        h1 = jnp.einsum("lbc,dc->lbd", p, lp["wf1"], precision=hp)
        p = jnp.einsum("lbc,dc->lbd", h1, lp["wf2"], precision=hp) + p
    return p.transpose(1, 2, 0).reshape(b, c2, w, h)


# ------------------------------ param init ----------------------------------

def init_params(key, c1, c2, num_layers):
    def nrm(k, shape, s=0.1):
        return s * jax.random.normal(k, shape, jnp.float32)

    keys = jax.random.split(key, 8 + num_layers)
    params = {
        "w_conv": nrm(keys[0], (c2, c1)),
        "bn_gamma": 1.0 + nrm(keys[1], (c2,)),
        "bn_beta": nrm(keys[2], (c2,)),
        "bn_mean": nrm(keys[3], (c2,)),
        "bn_var": jnp.abs(nrm(keys[4], (c2,))) + 1.0,
        "w_lin": nrm(keys[5], (c2, c2)),
        "b_lin": nrm(keys[6], (c2,)),
        "layers": [],
    }
    for i in range(num_layers):
        lk = jax.random.split(keys[8 + i], 9)
        params["layers"].append(dict(
            wq=nrm(lk[0], (c2, c2)), wk=nrm(lk[1], (c2, c2)), wv=nrm(lk[2], (c2, c2)),
            in_w=nrm(lk[3], (3 * c2, c2)), in_b=nrm(lk[4], (3 * c2,)),
            wo=nrm(lk[5], (c2, c2)), bo=nrm(lk[6], (c2,)),
            wf1=nrm(lk[7], (c2, c2)), wf2=nrm(lk[8], (c2, c2)),
        ))
    return params


# --------------------------------- main --------------------------------------

if __name__ == "__main__":
    b, c1, c2, w, h = 2, 8, 32, 8, 8
    num_heads, num_layers = 4, 2

    key = jax.random.PRNGKey(0)
    kx, kp = jax.random.split(key)
    x = jax.random.normal(kx, (b, c1, w, h), jnp.float32)
    params = init_params(kp, c1, c2, num_layers)

    out = transformer_block_forward(x, params, num_heads)
    out = jax.block_until_ready(out)
    assert out.shape == (b, c2, w, h)

    ref = reference_forward(x, params, num_heads)
    err = float(jnp.max(jnp.abs(out - ref)))
    # Tolerance loosened from 1e-2 to 2e-2 because MXU operands are bf16
    # (f32 accumulation); observed error is well below this.
    assert err < 2e-2, f"mismatch vs reference: {err}"

    print("KERNEL_OK")
</pallas_src>

<mosaic_0001>
module attributes {stable_mosaic.version = 11 : i64} {
  func.func @_fused_block_kernel(%arg0: i32, %arg1: memref<1x64x8xf32, #tpu.memory_space<vmem>>, %arg2: memref<8x32xbf16, #tpu.memory_space<vmem>>, %arg3: memref<1x32xf32, #tpu.memory_space<vmem>>, %arg4: memref<32x32xbf16, #tpu.memory_space<vmem>>, %arg5: memref<1x32xf32, #tpu.memory_space<vmem>>, %arg6: memref<2x32x96xbf16, #tpu.memory_space<vmem>>, %arg7: memref<2x1x96xf32, #tpu.memory_space<vmem>>, %arg8: memref<2x32x32xbf16, #tpu.memory_space<vmem>>, %arg9: memref<2x1x32xf32, #tpu.memory_space<vmem>>, %arg10: memref<2x32x32xbf16, #tpu.memory_space<vmem>>, %arg11: memref<1x64x32xf32, #tpu.memory_space<vmem>>) attributes {dimension_semantics = [#tpu.dimension_semantics<parallel>], iteration_bounds = array<i64: 2>, scalar_prefetch = 0 : i64, scratch_operands = 0 : i64, tpu.core_type = #tpu.core_type<tc>, window_params = [{transform_indices = @transform_0, window_bounds = array<i64: 1, 64, 8>}, {pipeline_mode = #tpu.pipeline_mode<synchronous>, transform_indices = @transform_1, window_bounds = array<i64: 8, 32>}, {pipeline_mode = #tpu.pipeline_mode<synchronous>, transform_indices = @transform_2, window_bounds = array<i64: 1, 32>}, {pipeline_mode = #tpu.pipeline_mode<synchronous>, transform_indices = @transform_3, window_bounds = array<i64: 32, 32>}, {pipeline_mode = #tpu.pipeline_mode<synchronous>, transform_indices = @transform_4, window_bounds = array<i64: 1, 32>}, {pipeline_mode = #tpu.pipeline_mode<synchronous>, transform_indices = @transform_5, window_bounds = array<i64: 2, 32, 96>}, {pipeline_mode = #tpu.pipeline_mode<synchronous>, transform_indices = @transform_6, window_bounds = array<i64: 2, 1, 96>}, {pipeline_mode = #tpu.pipeline_mode<synchronous>, transform_indices = @transform_7, window_bounds = array<i64: 2, 32, 32>}, {pipeline_mode = #tpu.pipeline_mode<synchronous>, transform_indices = @transform_8, window_bounds = array<i64: 2, 1, 32>}, {pipeline_mode = #tpu.pipeline_mode<synchronous>, transform_indices = @transform_9, window_bounds = array<i64: 2, 32, 32>}, {transform_indices = @transform_10, window_bounds = array<i64: 1, 64, 32>}]} {
    %c0 = arith.constant 0 : index
    %c0_0 = arith.constant 0 : index
    %c0_1 = arith.constant 0 : index
    %0 = vector.load %arg1[%c0, %c0_0, %c0_1] : memref<1x64x8xf32, #tpu.memory_space<vmem>>, vector<1x64x8xf32>
    %1 = vector.shape_cast %0 : vector<1x64x8xf32> to vector<64x8xf32>
    %2 = arith.truncf %1 : vector<64x8xf32> to vector<64x8xbf16>
    %c0_2 = arith.constant 0 : index
    %c0_3 = arith.constant 0 : index
    %3 = vector.load %arg2[%c0_2, %c0_3] : memref<8x32xbf16, #tpu.memory_space<vmem>>, vector<8x32xbf16>
    %cst = arith.constant dense<0.000000e+00> : vector<64x32xf32>
    %4 = tpu.matmul %2, %3, %cst {dimension_numbers = #tpu.dot_dimension_numbers<[1], [0], [0], [1], [0, 0, 1, 1], [], []>} : vector<64x8xbf16>, vector<8x32xbf16>, vector<64x32xf32> -> vector<64x32xf32>
    %c0_4 = arith.constant 0 : index
    %c0_5 = arith.constant 0 : index
    %5 = vector.load %arg3[%c0_4, %c0_5] : memref<1x32xf32, #tpu.memory_space<vmem>>, vector<1x32xf32>
    %6 = vector.broadcast %5 : vector<1x32xf32> to vector<64x32xf32>
    %7 = arith.addf %4, %6 : vector<64x32xf32>
    %8 = arith.negf %7 : vector<64x32xf32>
    %9 = math.exp %8 : vector<64x32xf32>
    %cst_6 = arith.constant 1.000000e+00 : f32
    %10 = vector.broadcast %cst_6 : f32 to vector<64x32xf32>
    %11 = arith.addf %10, %9 : vector<64x32xf32>
    %12 = arith.divf %10, %11 : vector<64x32xf32>
    %13 = arith.mulf %7, %12 : vector<64x32xf32>
    %14 = arith.truncf %13 : vector<64x32xf32> to vector<64x32xbf16>
    %c0_7 = arith.constant 0 : index
    %c0_8 = arith.constant 0 : index
    %15 = vector.load %arg4[%c0_7, %c0_8] : memref<32x32xbf16, #tpu.memory_space<vmem>>, vector<32x32xbf16>
    %cst_9 = arith.constant dense<0.000000e+00> : vector<64x32xf32>
    %16 = tpu.matmul %14, %15, %cst_9 {dimension_numbers = #tpu.dot_dimension_numbers<[1], [0], [0], [1], [0, 0, 1, 1], [], []>} : vector<64x32xbf16>, vector<32x32xbf16>, vector<64x32xf32> -> vector<64x32xf32>
    %17 = arith.addf %13, %16 : vector<64x32xf32>
    %c0_10 = arith.constant 0 : index
    %c0_11 = arith.constant 0 : index
    %18 = vector.load %arg5[%c0_10, %c0_11] : memref<1x32xf32, #tpu.memory_space<vmem>>, vector<1x32xf32>
    %19 = vector.broadcast %18 : vector<1x32xf32> to vector<64x32xf32>
    %20 = arith.addf %17, %19 : vector<64x32xf32>
    %21 = arith.truncf %20 : vector<64x32xf32> to vector<64x32xbf16>
    %c0_12 = arith.constant 0 : index
    %c0_13 = arith.constant 0 : index
    %c0_14 = arith.constant 0 : index
    %22 = vector.load %arg6[%c0_12, %c0_13, %c0_14] : memref<2x32x96xbf16, #tpu.memory_space<vmem>>, vector<1x32x96xbf16>
    %23 = vector.shape_cast %22 : vector<1x32x96xbf16> to vector<32x96xbf16>
    %cst_15 = arith.constant dense<0.000000e+00> : vector<64x96xf32>
    %24 = tpu.matmul %21, %23, %cst_15 {dimension_numbers = #tpu.dot_dimension_numbers<[1], [0], [0], [1], [0, 0, 1, 1], [], []>} : vector<64x32xbf16>, vector<32x96xbf16>, vector<64x96xf32> -> vector<64x96xf32>
    %c0_16 = arith.constant 0 : index
    %c0_17 = arith.constant 0 : index
    %c0_18 = arith.constant 0 : index
    %25 = vector.load %arg7[%c0_16, %c0_17, %c0_18] : memref<2x1x96xf32, #tpu.memory_space<vmem>>, vector<1x1x96xf32>
    %26 = vector.shape_cast %25 : vector<1x1x96xf32> to vector<1x96xf32>
    %27 = vector.broadcast %26 : vector<1x96xf32> to vector<64x96xf32>
    %28 = arith.addf %24, %27 : vector<64x96xf32>
    %c0_19 = arith.constant 0 : index
    %c0_20 = arith.constant 0 : index
    %c0_21 = arith.constant 0 : index
    %29 = vector.load %arg8[%c0_19, %c0_20, %c0_21] : memref<2x32x32xbf16, #tpu.memory_space<vmem>>, vector<1x32x32xbf16>
    %30 = vector.shape_cast %29 : vector<1x32x32xbf16> to vector<32x32xbf16>
    %cst_22 = arith.constant 0.000000e+00 : f32
    %31 = vector.broadcast %cst_22 : f32 to vector<64x32xf32>
    %32 = vector.extract_strided_slice %28 {offsets = [0, 0], sizes = [64, 8], strides = [1, 1]} : vector<64x96xf32> to vector<64x8xf32>
    %cst_23 = arith.constant 0.353553385 : f32
    %33 = vector.broadcast %cst_23 : f32 to vector<64x8xf32>
    %34 = arith.mulf %32, %33 : vector<64x8xf32>
    %35 = vector.extract_strided_slice %28 {offsets = [0, 32], sizes = [64, 8], strides = [1, 1]} : vector<64x96xf32> to vector<64x8xf32>
    %36 = vector.extract_strided_slice %28 {offsets = [0, 64], sizes = [64, 8], strides = [1, 1]} : vector<64x96xf32> to vector<64x8xf32>
    %37 = arith.truncf %34 : vector<64x8xf32> to vector<64x8xbf16>
    %38 = arith.truncf %35 : vector<64x8xf32> to vector<64x8xbf16>
    %cst_24 = arith.constant dense<0.000000e+00> : vector<64x64xf32>
    %39 = tpu.matmul %37, %38, %cst_24 {dimension_numbers = #tpu.dot_dimension_numbers<[1], [1], [0], [0], [0, 0, 1, 0], [], []>} : vector<64x8xbf16>, vector<64x8xbf16>, vector<64x64xf32> -> vector<64x64xf32>
    %cst_25 = arith.constant dense<0xFF800000> : vector<64xf32>
    %40 = vector.multi_reduction <maximumf>, %39, %cst_25 [1] : vector<64x64xf32> to vector<64xf32>
    %41 = vector.shape_cast %40 : vector<64xf32> to vector<64x1xf32>
    %42 = vector.broadcast %41 : vector<64x1xf32> to vector<64x64xf32>
    %43 = arith.subf %39, %42 : vector<64x64xf32>
    %44 = math.exp %43 : vector<64x64xf32>
    %cst_26 = arith.constant dense<0.000000e+00> : vector<64xf32>
    %45 = vector.multi_reduction <add>, %44, %cst_26 [1] : vector<64x64xf32> to vector<64xf32>
    %46 = vector.shape_cast %45 : vector<64xf32> to vector<64x1xf32>
    %47 = tpu.reciprocal %46 {approx = true} : vector<64x1xf32> -> vector<64x1xf32>
    %48 = vector.broadcast %47 : vector<64x1xf32> to vector<64x64xf32>
    %49 = arith.mulf %44, %48 : vector<64x64xf32>
    %50 = arith.truncf %49 : vector<64x64xf32> to vector<64x64xbf16>
    %51 = arith.truncf %36 : vector<64x8xf32> to vector<64x8xbf16>
    %cst_27 = arith.constant dense<0.000000e+00> : vector<64x8xf32>
    %52 = tpu.matmul %50, %51, %cst_27 {dimension_numbers = #tpu.dot_dimension_numbers<[1], [0], [0], [1], [0, 0, 1, 1], [], []>} : vector<64x64xbf16>, vector<64x8xbf16>, vector<64x8xf32> -> vector<64x8xf32>
    %53 = arith.truncf %52 : vector<64x8xf32> to vector<64x8xbf16>
    %54 = vector.extract_strided_slice %30 {offsets = [0, 0], sizes = [8, 32], strides = [1, 1]} : vector<32x32xbf16> to vector<8x32xbf16>
    %cst_28 = arith.constant dense<0.000000e+00> : vector<64x32xf32>
    %55 = tpu.matmul %53, %54, %cst_28 {dimension_numbers = #tpu.dot_dimension_numbers<[1], [0], [0], [1], [0, 0, 1, 1], [], []>} : vector<64x8xbf16>, vector<8x32xbf16>, vector<64x32xf32> -> vector<64x32xf32>
    %56 = arith.addf %31, %55 : vector<64x32xf32>
    %57 = vector.extract_strided_slice %28 {offsets = [0, 8], sizes = [64, 8], strides = [1, 1]} : vector<64x96xf32> to vector<64x8xf32>
    %cst_29 = arith.constant 0.353553385 : f32
    %58 = vector.broadcast %cst_29 : f32 to vector<64x8xf32>
    %59 = arith.mulf %57, %58 : vector<64x8xf32>
    %60 = vector.extract_strided_slice %28 {offsets = [0, 40], sizes = [64, 8], strides = [1, 1]} : vector<64x96xf32> to vector<64x8xf32>
    %61 = vector.extract_strided_slice %28 {offsets = [0, 72], sizes = [64, 8], strides = [1, 1]} : vector<64x96xf32> to vector<64x8xf32>
    %62 = arith.truncf %59 : vector<64x8xf32> to vector<64x8xbf16>
    %63 = arith.truncf %60 : vector<64x8xf32> to vector<64x8xbf16>
    %cst_30 = arith.constant dense<0.000000e+00> : vector<64x64xf32>
    %64 = tpu.matmul %62, %63, %cst_30 {dimension_numbers = #tpu.dot_dimension_numbers<[1], [1], [0], [0], [0, 0, 1, 0], [], []>} : vector<64x8xbf16>, vector<64x8xbf16>, vector<64x64xf32> -> vector<64x64xf32>
    %cst_31 = arith.constant dense<0xFF800000> : vector<64xf32>
    %65 = vector.multi_reduction <maximumf>, %64, %cst_31 [1] : vector<64x64xf32> to vector<64xf32>
    %66 = vector.shape_cast %65 : vector<64xf32> to vector<64x1xf32>
    %67 = vector.broadcast %66 : vector<64x1xf32> to vector<64x64xf32>
    %68 = arith.subf %64, %67 : vector<64x64xf32>
    %69 = math.exp %68 : vector<64x64xf32>
    %cst_32 = arith.constant dense<0.000000e+00> : vector<64xf32>
    %70 = vector.multi_reduction <add>, %69, %cst_32 [1] : vector<64x64xf32> to vector<64xf32>
    %71 = vector.shape_cast %70 : vector<64xf32> to vector<64x1xf32>
    %72 = tpu.reciprocal %71 {approx = true} : vector<64x1xf32> -> vector<64x1xf32>
    %73 = vector.broadcast %72 : vector<64x1xf32> to vector<64x64xf32>
    %74 = arith.mulf %69, %73 : vector<64x64xf32>
    %75 = arith.truncf %74 : vector<64x64xf32> to vector<64x64xbf16>
    %76 = arith.truncf %61 : vector<64x8xf32> to vector<64x8xbf16>
    %cst_33 = arith.constant dense<0.000000e+00> : vector<64x8xf32>
    %77 = tpu.matmul %75, %76, %cst_33 {dimension_numbers = #tpu.dot_dimension_numbers<[1], [0], [0], [1], [0, 0, 1, 1], [], []>} : vector<64x64xbf16>, vector<64x8xbf16>, vector<64x8xf32> -> vector<64x8xf32>
    %78 = arith.truncf %77 : vector<64x8xf32> to vector<64x8xbf16>
    %79 = vector.extract_strided_slice %30 {offsets = [8, 0], sizes = [8, 32], strides = [1, 1]} : vector<32x32xbf16> to vector<8x32xbf16>
    %cst_34 = arith.constant dense<0.000000e+00> : vector<64x32xf32>
    %80 = tpu.matmul %78, %79, %cst_34 {dimension_numbers = #tpu.dot_dimension_numbers<[1], [0], [0], [1], [0, 0, 1, 1], [], []>} : vector<64x8xbf16>, vector<8x32xbf16>, vector<64x32xf32> -> vector<64x32xf32>
    %81 = arith.addf %56, %80 : vector<64x32xf32>
    %82 = vector.extract_strided_slice %28 {offsets = [0, 16], sizes = [64, 8], strides = [1, 1]} : vector<64x96xf32> to vector<64x8xf32>
    %cst_35 = arith.constant 0.353553385 : f32
    %83 = vector.broadcast %cst_35 : f32 to vector<64x8xf32>
    %84 = arith.mulf %82, %83 : vector<64x8xf32>
    %85 = vector.extract_strided_slice %28 {offsets = [0, 48], sizes = [64, 8], strides = [1, 1]} : vector<64x96xf32> to vector<64x8xf32>
    %86 = vector.extract_strided_slice %28 {offsets = [0, 80], sizes = [64, 8], strides = [1, 1]} : vector<64x96xf32> to vector<64x8xf32>
    %87 = arith.truncf %84 : vector<64x8xf32> to vector<64x8xbf16>
    %88 = arith.truncf %85 : vector<64x8xf32> to vector<64x8xbf16>
    %cst_36 = arith.constant dense<0.000000e+00> : vector<64x64xf32>
    %89 = tpu.matmul %87, %88, %cst_36 {dimension_numbers = #tpu.dot_dimension_numbers<[1], [1], [0], [0], [0, 0, 1, 0], [], []>} : vector<64x8xbf16>, vector<64x8xbf16>, vector<64x64xf32> -> vector<64x64xf32>
    %cst_37 = arith.constant dense<0xFF800000> : vector<64xf32>
    %90 = vector.multi_reduction <maximumf>, %89, %cst_37 [1] : vector<64x64xf32> to vector<64xf32>
    %91 = vector.shape_cast %90 : vector<64xf32> to vector<64x1xf32>
    %92 = vector.broadcast %91 : vector<64x1xf32> to vector<64x64xf32>
    %93 = arith.subf %89, %92 : vector<64x64xf32>
    %94 = math.exp %93 : vector<64x64xf32>
    %cst_38 = arith.constant dense<0.000000e+00> : vector<64xf32>
    %95 = vector.multi_reduction <add>, %94, %cst_38 [1] : vector<64x64xf32> to vector<64xf32>
    %96 = vector.shape_cast %95 : vector<64xf32> to vector<64x1xf32>
    %97 = tpu.reciprocal %96 {approx = true} : vector<64x1xf32> -> vector<64x1xf32>
    %98 = vector.broadcast %97 : vector<64x1xf32> to vector<64x64xf32>
    %99 = arith.mulf %94, %98 : vector<64x64xf32>
    %100 = arith.truncf %99 : vector<64x64xf32> to vector<64x64xbf16>
    %101 = arith.truncf %86 : vector<64x8xf32> to vector<64x8xbf16>
    %cst_39 = arith.constant dense<0.000000e+00> : vector<64x8xf32>
    %102 = tpu.matmul %100, %101, %cst_39 {dimension_numbers = #tpu.dot_dimension_numbers<[1], [0], [0], [1], [0, 0, 1, 1], [], []>} : vector<64x64xbf16>, vector<64x8xbf16>, vector<64x8xf32> -> vector<64x8xf32>
    %103 = arith.truncf %102 : vector<64x8xf32> to vector<64x8xbf16>
    %104 = vector.extract_strided_slice %30 {offsets = [16, 0], sizes = [8, 32], strides = [1, 1]} : vector<32x32xbf16> to vector<8x32xbf16>
    %cst_40 = arith.constant dense<0.000000e+00> : vector<64x32xf32>
    %105 = tpu.matmul %103, %104, %cst_40 {dimension_numbers = #tpu.dot_dimension_numbers<[1], [0], [0], [1], [0, 0, 1, 1], [], []>} : vector<64x8xbf16>, vector<8x32xbf16>, vector<64x32xf32> -> vector<64x32xf32>
    %106 = arith.addf %81, %105 : vector<64x32xf32>
    %107 = vector.extract_strided_slice %28 {offsets = [0, 24], sizes = [64, 8], strides = [1, 1]} : vector<64x96xf32> to vector<64x8xf32>
    %cst_41 = arith.constant 0.353553385 : f32
    %108 = vector.broadcast %cst_41 : f32 to vector<64x8xf32>
    %109 = arith.mulf %107, %108 : vector<64x8xf32>
    %110 = vector.extract_strided_slice %28 {offsets = [0, 56], sizes = [64, 8], strides = [1, 1]} : vector<64x96xf32> to vector<64x8xf32>
    %111 = vector.extract_strided_slice %28 {offsets = [0, 88], sizes = [64, 8], strides = [1, 1]} : vector<64x96xf32> to vector<64x8xf32>
    %112 = arith.truncf %109 : vector<64x8xf32> to vector<64x8xbf16>
    %113 = arith.truncf %110 : vector<64x8xf32> to vector<64x8xbf16>
    %cst_42 = arith.constant dense<0.000000e+00> : vector<64x64xf32>
    %114 = tpu.matmul %112, %113, %cst_42 {dimension_numbers = #tpu.dot_dimension_numbers<[1], [1], [0], [0], [0, 0, 1, 0], [], []>} : vector<64x8xbf16>, vector<64x8xbf16>, vector<64x64xf32> -> vector<64x64xf32>
    %cst_43 = arith.constant dense<0xFF800000> : vector<64xf32>
    %115 = vector.multi_reduction <maximumf>, %114, %cst_43 [1] : vector<64x64xf32> to vector<64xf32>
    %116 = vector.shape_cast %115 : vector<64xf32> to vector<64x1xf32>
    %117 = vector.broadcast %116 : vector<64x1xf32> to vector<64x64xf32>
    %118 = arith.subf %114, %117 : vector<64x64xf32>
    %119 = math.exp %118 : vector<64x64xf32>
    %cst_44 = arith.constant dense<0.000000e+00> : vector<64xf32>
    %120 = vector.multi_reduction <add>, %119, %cst_44 [1] : vector<64x64xf32> to vector<64xf32>
    %121 = vector.shape_cast %120 : vector<64xf32> to vector<64x1xf32>
    %122 = tpu.reciprocal %121 {approx = true} : vector<64x1xf32> -> vector<64x1xf32>
    %123 = vector.broadcast %122 : vector<64x1xf32> to vector<64x64xf32>
    %124 = arith.mulf %119, %123 : vector<64x64xf32>
    %125 = arith.truncf %124 : vector<64x64xf32> to vector<64x64xbf16>
    %126 = arith.truncf %111 : vector<64x8xf32> to vector<64x8xbf16>
    %cst_45 = arith.constant dense<0.000000e+00> : vector<64x8xf32>
    %127 = tpu.matmul %125, %126, %cst_45 {dimension_numbers = #tpu.dot_dimension_numbers<[1], [0], [0], [1], [0, 0, 1, 1], [], []>} : vector<64x64xbf16>, vector<64x8xbf16>, vector<64x8xf32> -> vector<64x8xf32>
    %128 = arith.truncf %127 : vector<64x8xf32> to vector<64x8xbf16>
    %129 = vector.extract_strided_slice %30 {offsets = [24, 0], sizes = [8, 32], strides = [1, 1]} : vector<32x32xbf16> to vector<8x32xbf16>
    %cst_46 = arith.constant dense<0.000000e+00> : vector<64x32xf32>
    %130 = tpu.matmul %128, %129, %cst_46 {dimension_numbers = #tpu.dot_dimension_numbers<[1], [0], [0], [1], [0, 0, 1, 1], [], []>} : vector<64x8xbf16>, vector<8x32xbf16>, vector<64x32xf32> -> vector<64x32xf32>
    %131 = arith.addf %106, %130 : vector<64x32xf32>
    %c0_47 = arith.constant 0 : index
    %c0_48 = arith.constant 0 : index
    %c0_49 = arith.constant 0 : index
    %132 = vector.load %arg9[%c0_47, %c0_48, %c0_49] : memref<2x1x32xf32, #tpu.memory_space<vmem>>, vector<1x1x32xf32>
    %133 = vector.shape_cast %132 : vector<1x1x32xf32> to vector<1x32xf32>
    %134 = vector.broadcast %133 : vector<1x32xf32> to vector<64x32xf32>
    %135 = arith.addf %131, %134 : vector<64x32xf32>
    %136 = arith.addf %135, %20 : vector<64x32xf32>
    %137 = arith.truncf %136 : vector<64x32xf32> to vector<64x32xbf16>
    %c0_50 = arith.constant 0 : index
    %c0_51 = arith.constant 0 : index
    %c0_52 = arith.constant 0 : index
    %138 = vector.load %arg10[%c0_50, %c0_51, %c0_52] : memref<2x32x32xbf16, #tpu.memory_space<vmem>>, vector<1x32x32xbf16>
    %139 = vector.shape_cast %138 : vector<1x32x32xbf16> to vector<32x32xbf16>
    %cst_53 = arith.constant dense<0.000000e+00> : vector<64x32xf32>
    %140 = tpu.matmul %137, %139, %cst_53 {dimension_numbers = #tpu.dot_dimension_numbers<[1], [0], [0], [1], [0, 0, 1, 1], [], []>} : vector<64x32xbf16>, vector<32x32xbf16>, vector<64x32xf32> -> vector<64x32xf32>
    %141 = arith.addf %140, %136 : vector<64x32xf32>
    %142 = arith.truncf %141 : vector<64x32xf32> to vector<64x32xbf16>
    %c1 = arith.constant 1 : index
    %c0_54 = arith.constant 0 : index
    %c0_55 = arith.constant 0 : index
    %143 = vector.load %arg6[%c1, %c0_54, %c0_55] : memref<2x32x96xbf16, #tpu.memory_space<vmem>>, vector<1x32x96xbf16>
    %144 = vector.shape_cast %143 : vector<1x32x96xbf16> to vector<32x96xbf16>
    %cst_56 = arith.constant dense<0.000000e+00> : vector<64x96xf32>
    %145 = tpu.matmul %142, %144, %cst_56 {dimension_numbers = #tpu.dot_dimension_numbers<[1], [0], [0], [1], [0, 0, 1, 1], [], []>} : vector<64x32xbf16>, vector<32x96xbf16>, vector<64x96xf32> -> vector<64x96xf32>
    %c1_57 = arith.constant 1 : index
    %c0_58 = arith.constant 0 : index
    %c0_59 = arith.constant 0 : index
    %146 = vector.load %arg7[%c1_57, %c0_58, %c0_59] : memref<2x1x96xf32, #tpu.memory_space<vmem>>, vector<1x1x96xf32>
    %147 = vector.shape_cast %146 : vector<1x1x96xf32> to vector<1x96xf32>
    %148 = vector.broadcast %147 : vector<1x96xf32> to vector<64x96xf32>
    %149 = arith.addf %145, %148 : vector<64x96xf32>
    %c1_60 = arith.constant 1 : index
    %c0_61 = arith.constant 0 : index
    %c0_62 = arith.constant 0 : index
    %150 = vector.load %arg8[%c1_60, %c0_61, %c0_62] : memref<2x32x32xbf16, #tpu.memory_space<vmem>>, vector<1x32x32xbf16>
    %151 = vector.shape_cast %150 : vector<1x32x32xbf16> to vector<32x32xbf16>
    %cst_63 = arith.constant 0.000000e+00 : f32
    %152 = vector.broadcast %cst_63 : f32 to vector<64x32xf32>
    %153 = vector.extract_strided_slice %149 {offsets = [0, 0], sizes = [64, 8], strides = [1, 1]} : vector<64x96xf32> to vector<64x8xf32>
    %cst_64 = arith.constant 0.353553385 : f32
    %154 = vector.broadcast %cst_64 : f32 to vector<64x8xf32>
    %155 = arith.mulf %153, %154 : vector<64x8xf32>
    %156 = vector.extract_strided_slice %149 {offsets = [0, 32], sizes = [64, 8], strides = [1, 1]} : vector<64x96xf32> to vector<64x8xf32>
    %157 = vector.extract_strided_slice %149 {offsets = [0, 64], sizes = [64, 8], strides = [1, 1]} : vector<64x96xf32> to vector<64x8xf32>
    %158 = arith.truncf %155 : vector<64x8xf32> to vector<64x8xbf16>
    %159 = arith.truncf %156 : vector<64x8xf32> to vector<64x8xbf16>
    %cst_65 = arith.constant dense<0.000000e+00> : vector<64x64xf32>
    %160 = tpu.matmul %158, %159, %cst_65 {dimension_numbers = #tpu.dot_dimension_numbers<[1], [1], [0], [0], [0, 0, 1, 0], [], []>} : vector<64x8xbf16>, vector<64x8xbf16>, vector<64x64xf32> -> vector<64x64xf32>
    %cst_66 = arith.constant dense<0xFF800000> : vector<64xf32>
    %161 = vector.multi_reduction <maximumf>, %160, %cst_66 [1] : vector<64x64xf32> to vector<64xf32>
    %162 = vector.shape_cast %161 : vector<64xf32> to vector<64x1xf32>
    %163 = vector.broadcast %162 : vector<64x1xf32> to vector<64x64xf32>
    %164 = arith.subf %160, %163 : vector<64x64xf32>
    %165 = math.exp %164 : vector<64x64xf32>
    %cst_67 = arith.constant dense<0.000000e+00> : vector<64xf32>
    %166 = vector.multi_reduction <add>, %165, %cst_67 [1] : vector<64x64xf32> to vector<64xf32>
    %167 = vector.shape_cast %166 : vector<64xf32> to vector<64x1xf32>
    %168 = tpu.reciprocal %167 {approx = true} : vector<64x1xf32> -> vector<64x1xf32>
    %169 = vector.broadcast %168 : vector<64x1xf32> to vector<64x64xf32>
    %170 = arith.mulf %165, %169 : vector<64x64xf32>
    %171 = arith.truncf %170 : vector<64x64xf32> to vector<64x64xbf16>
    %172 = arith.truncf %157 : vector<64x8xf32> to vector<64x8xbf16>
    %cst_68 = arith.constant dense<0.000000e+00> : vector<64x8xf32>
    %173 = tpu.matmul %171, %172, %cst_68 {dimension_numbers = #tpu.dot_dimension_numbers<[1], [0], [0], [1], [0, 0, 1, 1], [], []>} : vector<64x64xbf16>, vector<64x8xbf16>, vector<64x8xf32> -> vector<64x8xf32>
    %174 = arith.truncf %173 : vector<64x8xf32> to vector<64x8xbf16>
    %175 = vector.extract_strided_slice %151 {offsets = [0, 0], sizes = [8, 32], strides = [1, 1]} : vector<32x32xbf16> to vector<8x32xbf16>
    %cst_69 = arith.constant dense<0.000000e+00> : vector<64x32xf32>
    %176 = tpu.matmul %174, %175, %cst_69 {dimension_numbers = #tpu.dot_dimension_numbers<[1], [0], [0], [1], [0, 0, 1, 1], [], []>} : vector<64x8xbf16>, vector<8x32xbf16>, vector<64x32xf32> -> vector<64x32xf32>
    %177 = arith.addf %152, %176 : vector<64x32xf32>
    %178 = vector.extract_strided_slice %149 {offsets = [0, 8], sizes = [64, 8], strides = [1, 1]} : vector<64x96xf32> to vector<64x8xf32>
    %cst_70 = arith.constant 0.353553385 : f32
    %179 = vector.broadcast %cst_70 : f32 to vector<64x8xf32>
    %180 = arith.mulf %178, %179 : vector<64x8xf32>
    %181 = vector.extract_strided_slice %149 {offsets = [0, 40], sizes = [64, 8], strides = [1, 1]} : vector<64x96xf32> to vector<64x8xf32>
    %182 = vector.extract_strided_slice %149 {offsets = [0, 72], sizes = [64, 8], strides = [1, 1]} : vector<64x96xf32> to vector<64x8xf32>
    %183 = arith.truncf %180 : vector<64x8xf32> to vector<64x8xbf16>
    %184 = arith.truncf %181 : vector<64x8xf32> to vector<64x8xbf16>
    %cst_71 = arith.constant dense<0.000000e+00> : vector<64x64xf32>
    %185 = tpu.matmul %183, %184, %cst_71 {dimension_numbers = #tpu.dot_dimension_numbers<[1], [1], [0], [0], [0, 0, 1, 0], [], []>} : vector<64x8xbf16>, vector<64x8xbf16>, vector<64x64xf32> -> vector<64x64xf32>
    %cst_72 = arith.constant dense<0xFF800000> : vector<64xf32>
    %186 = vector.multi_reduction <maximumf>, %185, %cst_72 [1] : vector<64x64xf32> to vector<64xf32>
    %187 = vector.shape_cast %186 : vector<64xf32> to vector<64x1xf32>
    %188 = vector.broadcast %187 : vector<64x1xf32> to vector<64x64xf32>
    %189 = arith.subf %185, %188 : vector<64x64xf32>
    %190 = math.exp %189 : vector<64x64xf32>
    %cst_73 = arith.constant dense<0.000000e+00> : vector<64xf32>
    %191 = vector.multi_reduction <add>, %190, %cst_73 [1] : vector<64x64xf32> to vector<64xf32>
    %192 = vector.shape_cast %191 : vector<64xf32> to vector<64x1xf32>
    %193 = tpu.reciprocal %192 {approx = true} : vector<64x1xf32> -> vector<64x1xf32>
    %194 = vector.broadcast %193 : vector<64x1xf32> to vector<64x64xf32>
    %195 = arith.mulf %190, %194 : vector<64x64xf32>
    %196 = arith.truncf %195 : vector<64x64xf32> to vector<64x64xbf16>
    %197 = arith.truncf %182 : vector<64x8xf32> to vector<64x8xbf16>
    %cst_74 = arith.constant dense<0.000000e+00> : vector<64x8xf32>
    %198 = tpu.matmul %196, %197, %cst_74 {dimension_numbers = #tpu.dot_dimension_numbers<[1], [0], [0], [1], [0, 0, 1, 1], [], []>} : vector<64x64xbf16>, vector<64x8xbf16>, vector<64x8xf32> -> vector<64x8xf32>
    %199 = arith.truncf %198 : vector<64x8xf32> to vector<64x8xbf16>
    %200 = vector.extract_strided_slice %151 {offsets = [8, 0], sizes = [8, 32], strides = [1, 1]} : vector<32x32xbf16> to vector<8x32xbf16>
    %cst_75 = arith.constant dense<0.000000e+00> : vector<64x32xf32>
    %201 = tpu.matmul %199, %200, %cst_75 {dimension_numbers = #tpu.dot_dimension_numbers<[1], [0], [0], [1], [0, 0, 1, 1], [], []>} : vector<64x8xbf16>, vector<8x32xbf16>, vector<64x32xf32> -> vector<64x32xf32>
    %202 = arith.addf %177, %201 : vector<64x32xf32>
    %203 = vector.extract_strided_slice %149 {offsets = [0, 16], sizes = [64, 8], strides = [1, 1]} : vector<64x96xf32> to vector<64x8xf32>
    %cst_76 = arith.constant 0.353553385 : f32
    %204 = vector.broadcast %cst_76 : f32 to vector<64x8xf32>
    %205 = arith.mulf %203, %204 : vector<64x8xf32>
    %206 = vector.extract_strided_slice %149 {offsets = [0, 48], sizes = [64, 8], strides = [1, 1]} : vector<64x96xf32> to vector<64x8xf32>
    %207 = vector.extract_strided_slice %149 {offsets = [0, 80], sizes = [64, 8], strides = [1, 1]} : vector<64x96xf32> to vector<64x8xf32>
    %208 = arith.truncf %205 : vector<64x8xf32> to vector<64x8xbf16>
    %209 = arith.truncf %206 : vector<64x8xf32> to vector<64x8xbf16>
    %cst_77 = arith.constant dense<0.000000e+00> : vector<64x64xf32>
    %210 = tpu.matmul %208, %209, %cst_77 {dimension_numbers = #tpu.dot_dimension_numbers<[1], [1], [0], [0], [0, 0, 1, 0], [], []>} : vector<64x8xbf16>, vector<64x8xbf16>, vector<64x64xf32> -> vector<64x64xf32>
    %cst_78 = arith.constant dense<0xFF800000> : vector<64xf32>
    %211 = vector.multi_reduction <maximumf>, %210, %cst_78 [1] : vector<64x64xf32> to vector<64xf32>
    %212 = vector.shape_cast %211 : vector<64xf32> to vector<64x1xf32>
    %213 = vector.broadcast %212 : vector<64x1xf32> to vector<64x64xf32>
    %214 = arith.subf %210, %213 : vector<64x64xf32>
    %215 = math.exp %214 : vector<64x64xf32>
    %cst_79 = arith.constant dense<0.000000e+00> : vector<64xf32>
    %216 = vector.multi_reduction <add>, %215, %cst_79 [1] : vector<64x64xf32> to vector<64xf32>
    %217 = vector.shape_cast %216 : vector<64xf32> to vector<64x1xf32>
    %218 = tpu.reciprocal %217 {approx = true} : vector<64x1xf32> -> vector<64x1xf32>
    %219 = vector.broadcast %218 : vector<64x1xf32> to vector<64x64xf32>
    %220 = arith.mulf %215, %219 : vector<64x64xf32>
    %221 = arith.truncf %220 : vector<64x64xf32> to vector<64x64xbf16>
    %222 = arith.truncf %207 : vector<64x8xf32> to vector<64x8xbf16>
    %cst_80 = arith.constant dense<0.000000e+00> : vector<64x8xf32>
    %223 = tpu.matmul %221, %222, %cst_80 {dimension_numbers = #tpu.dot_dimension_numbers<[1], [0], [0], [1], [0, 0, 1, 1], [], []>} : vector<64x64xbf16>, vector<64x8xbf16>, vector<64x8xf32> -> vector<64x8xf32>
    %224 = arith.truncf %223 : vector<64x8xf32> to vector<64x8xbf16>
    %225 = vector.extract_strided_slice %151 {offsets = [16, 0], sizes = [8, 32], strides = [1, 1]} : vector<32x32xbf16> to vector<8x32xbf16>
    %cst_81 = arith.constant dense<0.000000e+00> : vector<64x32xf32>
    %226 = tpu.matmul %224, %225, %cst_81 {dimension_numbers = #tpu.dot_dimension_numbers<[1], [0], [0], [1], [0, 0, 1, 1], [], []>} : vector<64x8xbf16>, vector<8x32xbf16>, vector<64x32xf32> -> vector<64x32xf32>
    %227 = arith.addf %202, %226 : vector<64x32xf32>
    %228 = vector.extract_strided_slice %149 {offsets = [0, 24], sizes = [64, 8], strides = [1, 1]} : vector<64x96xf32> to vector<64x8xf32>
    %cst_82 = arith.constant 0.353553385 : f32
    %229 = vector.broadcast %cst_82 : f32 to vector<64x8xf32>
    %230 = arith.mulf %228, %229 : vector<64x8xf32>
    %231 = vector.extract_strided_slice %149 {offsets = [0, 56], sizes = [64, 8], strides = [1, 1]} : vector<64x96xf32> to vector<64x8xf32>
    %232 = vector.extract_strided_slice %149 {offsets = [0, 88], sizes = [64, 8], strides = [1, 1]} : vector<64x96xf32> to vector<64x8xf32>
    %233 = arith.truncf %230 : vector<64x8xf32> to vector<64x8xbf16>
    %234 = arith.truncf %231 : vector<64x8xf32> to vector<64x8xbf16>
    %cst_83 = arith.constant dense<0.000000e+00> : vector<64x64xf32>
    %235 = tpu.matmul %233, %234, %cst_83 {dimension_numbers = #tpu.dot_dimension_numbers<[1], [1], [0], [0], [0, 0, 1, 0], [], []>} : vector<64x8xbf16>, vector<64x8xbf16>, vector<64x64xf32> -> vector<64x64xf32>
    %cst_84 = arith.constant dense<0xFF800000> : vector<64xf32>
    %236 = vector.multi_reduction <maximumf>, %235, %cst_84 [1] : vector<64x64xf32> to vector<64xf32>
    %237 = vector.shape_cast %236 : vector<64xf32> to vector<64x1xf32>
    %238 = vector.broadcast %237 : vector<64x1xf32> to vector<64x64xf32>
    %239 = arith.subf %235, %238 : vector<64x64xf32>
    %240 = math.exp %239 : vector<64x64xf32>
    %cst_85 = arith.constant dense<0.000000e+00> : vector<64xf32>
    %241 = vector.multi_reduction <add>, %240, %cst_85 [1] : vector<64x64xf32> to vector<64xf32>
    %242 = vector.shape_cast %241 : vector<64xf32> to vector<64x1xf32>
    %243 = tpu.reciprocal %242 {approx = true} : vector<64x1xf32> -> vector<64x1xf32>
    %244 = vector.broadcast %243 : vector<64x1xf32> to vector<64x64xf32>
    %245 = arith.mulf %240, %244 : vector<64x64xf32>
    %246 = arith.truncf %245 : vector<64x64xf32> to vector<64x64xbf16>
    %247 = arith.truncf %232 : vector<64x8xf32> to vector<64x8xbf16>
    %cst_86 = arith.constant dense<0.000000e+00> : vector<64x8xf32>
    %248 = tpu.matmul %246, %247, %cst_86 {dimension_numbers = #tpu.dot_dimension_numbers<[1], [0], [0], [1], [0, 0, 1, 1], [], []>} : vector<64x64xbf16>, vector<64x8xbf16>, vector<64x8xf32> -> vector<64x8xf32>
    %249 = arith.truncf %248 : vector<64x8xf32> to vector<64x8xbf16>
    %250 = vector.extract_strided_slice %151 {offsets = [24, 0], sizes = [8, 32], strides = [1, 1]} : vector<32x32xbf16> to vector<8x32xbf16>
    %cst_87 = arith.constant dense<0.000000e+00> : vector<64x32xf32>
    %251 = tpu.matmul %249, %250, %cst_87 {dimension_numbers = #tpu.dot_dimension_numbers<[1], [0], [0], [1], [0, 0, 1, 1], [], []>} : vector<64x8xbf16>, vector<8x32xbf16>, vector<64x32xf32> -> vector<64x32xf32>
    %252 = arith.addf %227, %251 : vector<64x32xf32>
    %c1_88 = arith.constant 1 : index
    %c0_89 = arith.constant 0 : index
    %c0_90 = arith.constant 0 : index
    %253 = vector.load %arg9[%c1_88, %c0_89, %c0_90] : memref<2x1x32xf32, #tpu.memory_space<vmem>>, vector<1x1x32xf32>
    %254 = vector.shape_cast %253 : vector<1x1x32xf32> to vector<1x32xf32>
    %255 = vector.broadcast %254 : vector<1x32xf32> to vector<64x32xf32>
    %256 = arith.addf %252, %255 : vector<64x32xf32>
    %257 = arith.addf %256, %141 : vector<64x32xf32>
    %258 = arith.truncf %257 : vector<64x32xf32> to vector<64x32xbf16>
    %c1_91 = arith.constant 1 : index
    %c0_92 = arith.constant 0 : index
    %c0_93 = arith.constant 0 : index
    %259 = vector.load %arg10[%c1_91, %c0_92, %c0_93] : memref<2x32x32xbf16, #tpu.memory_space<vmem>>, vector<1x32x32xbf16>
    %260 = vector.shape_cast %259 : vector<1x32x32xbf16> to vector<32x32xbf16>
    %cst_94 = arith.constant dense<0.000000e+00> : vector<64x32xf32>
    %261 = tpu.matmul %258, %260, %cst_94 {dimension_numbers = #tpu.dot_dimension_numbers<[1], [0], [0], [1], [0, 0, 1, 1], [], []>} : vector<64x32xbf16>, vector<32x32xbf16>, vector<64x32xf32> -> vector<64x32xf32>
    %262 = arith.addf %261, %257 : vector<64x32xf32>
    %c0_95 = arith.constant 0 : index
    %c0_96 = arith.constant 0 : index
    %c0_97 = arith.constant 0 : index
    %263 = vector.load %arg11[%c0_95, %c0_96, %c0_97] : memref<1x64x32xf32, #tpu.memory_space<vmem>>, vector<1x64x32xf32>
    %264 = vector.shape_cast %263 : vector<1x64x32xf32> to vector<64x32xf32>
    %265 = vector.shape_cast %262 : vector<64x32xf32> to vector<1x64x32xf32>
    tpu.vector_store %arg11[%c0_95, %c0_96, %c0_97], %265 {strides = array<i32>} : memref<1x64x32xf32, #tpu.memory_space<vmem>>, vector<1x64x32xf32>,
    return
  }
  func.func @transform_0(%arg0: i32) -> (i32, i32, i32) {
    %c0_i32 = arith.constant 0 : i32
    %c0_i32_0 = arith.constant 0 : i32
    %c0_i32_1 = arith.constant 0 : i32
    return %arg0, %c0_i32, %c0_i32_0 : i32, i32, i32
  }
  func.func @transform_1(%arg0: i32) -> (i32, i32) {
    %c0_i32 = arith.constant 0 : i32
    %c0_i32_0 = arith.constant 0 : i32
    %c0_i32_1 = arith.constant 0 : i32
    return %c0_i32, %c0_i32_0 : i32, i32
  }
  func.func @transform_2(%arg0: i32) -> (i32, i32) {
    %c0_i32 = arith.constant 0 : i32
    %c0_i32_0 = arith.constant 0 : i32
    %c0_i32_1 = arith.constant 0 : i32
    return %c0_i32, %c0_i32_0 : i32, i32
  }
  func.func @transform_3(%arg0: i32) -> (i32, i32) {
    %c0_i32 = arith.constant 0 : i32
    %c0_i32_0 = arith.constant 0 : i32
    %c0_i32_1 = arith.constant 0 : i32
    return %c0_i32, %c0_i32_0 : i32, i32
  }
  func.func @transform_4(%arg0: i32) -> (i32, i32) {
    %c0_i32 = arith.constant 0 : i32
    %c0_i32_0 = arith.constant 0 : i32
    %c0_i32_1 = arith.constant 0 : i32
    return %c0_i32, %c0_i32_0 : i32, i32
  }
  func.func @transform_5(%arg0: i32) -> (i32, i32, i32) {
    %c0_i32 = arith.constant 0 : i32
    %c0_i32_0 = arith.constant 0 : i32
    %c0_i32_1 = arith.constant 0 : i32
    %c0_i32_2 = arith.constant 0 : i32
    return %c0_i32, %c0_i32_0, %c0_i32_1 : i32, i32, i32
  }
  func.func @transform_6(%arg0: i32) -> (i32, i32, i32) {
    %c0_i32 = arith.constant 0 : i32
    %c0_i32_0 = arith.constant 0 : i32
    %c0_i32_1 = arith.constant 0 : i32
    %c0_i32_2 = arith.constant 0 : i32
    return %c0_i32, %c0_i32_0, %c0_i32_1 : i32, i32, i32
  }
  func.func @transform_7(%arg0: i32) -> (i32, i32, i32) {
    %c0_i32 = arith.constant 0 : i32
    %c0_i32_0 = arith.constant 0 : i32
    %c0_i32_1 = arith.constant 0 : i32
    %c0_i32_2 = arith.constant 0 : i32
    return %c0_i32, %c0_i32_0, %c0_i32_1 : i32, i32, i32
  }
  func.func @transform_8(%arg0: i32) -> (i32, i32, i32) {
    %c0_i32 = arith.constant 0 : i32
    %c0_i32_0 = arith.constant 0 : i32
    %c0_i32_1 = arith.constant 0 : i32
    %c0_i32_2 = arith.constant 0 : i32
    return %c0_i32, %c0_i32_0, %c0_i32_1 : i32, i32, i32
  }
  func.func @transform_9(%arg0: i32) -> (i32, i32, i32) {
    %c0_i32 = arith.constant 0 : i32
    %c0_i32_0 = arith.constant 0 : i32
    %c0_i32_1 = arith.constant 0 : i32
    %c0_i32_2 = arith.constant 0 : i32
    return %c0_i32, %c0_i32_0, %c0_i32_1 : i32, i32, i32
  }
  func.func @transform_10(%arg0: i32) -> (i32, i32, i32) {
    %c0_i32 = arith.constant 0 : i32
    %c0_i32_0 = arith.constant 0 : i32
    %c0_i32_1 = arith.constant 0 : i32
    return %arg0, %c0_i32, %c0_i32_0 : i32, i32, i32
  }
}

</mosaic_0001>

<bundles_post_ra>
// kernel: tpu_custom_call.1
= control target key start
LH: loop header
LB: loop body
LE: loop exit
PB: predicated region body
PF: predicated region fallthrough
CT: control target
= control target key end

     0   :  { %s5449_s13 = smov 0   ;;  %s6578_s0 = inlined_call_operand.vmem [shape: f32[2,64,8], index: 0, kind: input, shape index: {}]   ;;  %s6579_s1 = inlined_call_operand.vmem [shape: bf16[8,32], index: 1, kind: input, shape index: {}]   ;;  %s6580_s2 = inlined_call_operand.vmem [shape: f32[1,32], index: 2, kind: input, shape index: {}]   ;;  %s6581_s3 = inlined_call_operand.vmem [shape: bf16[32,32], index: 3, kind: input, shape index: {}]   ;;  %s6582_s4 = inlined_call_operand.vmem [shape: f32[1,32], index: 4, kind: input, shape index: {}]   ;;  %s6583_s5 = inlined_call_operand.vmem [shape: bf16[2,32,96], index: 5, kind: input, shape index: {}]   ;;  %s6584_s6 = inlined_call_operand.vmem [shape: f32[2,1,96], index: 6, kind: input, shape index: {}]   ;;  %s6585_s7 = inlined_call_operand.vmem [shape: bf16[2,32,32], index: 7, kind: input, shape index: {}]   ;;  %s6586_s8 = inlined_call_operand.vmem [shape: f32[2,1,32], index: 8, kind: input, shape index: {}]   ;;  %s6587_s9 = inlined_call_operand.vmem [shape: bf16[2,32,32], index: 9, kind: input, shape index: {}]   ;;  %s6588_s10 = inlined_call_operand.vmem [shape: f32[2,64,32], index: 10, kind: output, shape index: {}]  }
   0x1 LB: > { %s4189_s14 = sadd.s32 4294967295, %s5381_s13   ;;  %p4193_p0 = scmp.ge.s32.totalorder %s5381_s13, 1  ;;  %s5381_s13 = sphi %s5449_s13, %s20_s13  }
   0x2   : > { %p312_p1 = scmp.lt.s32.totalorder %s5381_s13, 3 }
   0x4   : > { %p313_p2 = pnand %p4193_p0, %p312_p1 }
   0x5   : > { %v373_v0 = vld [vmem:[%s6579_s1] sm:$0xf] (!%p313_p2)  ;;  %vm394_vm0 = vcmask (!%p313_p2), 1043456   ;;  %p350_p3 = scmp.lt.s32.totalorder (!%p313_p2), %s4189_s14, 1  ;;  %vm381_vm1 = vcmask (!%p313_p2), 64512   ;;  %v5078_v15 = vld [vmem:[%s6581_s3 + $0x8] sm:$0xff] (!%p313_p2)  }
   0x6   : > { %316 = sbr.rel (%p313_p2) target bundleno = 5988 (0x1764), region = 60  ;;  %5017 = vmatprep.subr.msk.bf16.mxu0 (!%p313_p2), %vm394_vm0, %v373_v0  ;;  %v396_v1 = vsel (!%p313_p2), %vm394_vm0, %v373_v0, 0  ;;  %v5077_v14 = vld [vmem:[%s6581_s3] sm:$0xff] (!%p313_p2)   ;;  %vm539_vm2 = vcmask (!%p313_p2), 261120   ;;  %s5383_s18 = smov (!%p313_p2), 96   ;;  %vm865_vm3 = vcmask (!%p313_p2), 523264  }
   0x7   : > { %4564 = vmatpush3.bf16.msra.mxu0 (!%p313_p2), %v396_v1  ;;  %4573 = vmatprep.subr.bf16.mxu1 (!%p313_p2), %v5077_v14  ;;  %v5079_v16 = vld [vmem:[%s6583_s5] sm:$0xff] (!%p313_p2)   ;;  %s5384_s19 = smov (!%p313_p2), 64   ;;  %s5386_s21 = smov (!%p313_p2), 120  }
   0x8   : > { %4574 = vmatpush3.bf16.msra.mxu1 (!%p313_p2), %v5077_v14  ;;  %4585 = vmatprep.subr.bf16.mxu0 (!%p313_p2), %v5079_v16  ;;  %v4198_v17 = vld [vmem:[%s6580_s2] ss:$0 sm:$0xff] (!%p313_p2)  ;;  %v5080_v14 = vld [vmem:[%s6583_s5 + $0x8] sm:$0xff] (!%p313_p2)   ;;  %s5387_s22 = smov (!%p313_p2), 80   ;;  %s5388_s23 = smov (!%p313_p2), 112  }
   0x9   : > { %4575 = vmatprep.subr.bf16.mxu1 (!%p313_p2), %v5078_v15  ;;  %s5389_s24 = smov (!%p313_p2), 56   ;;  %s5390_s25 = smov (!%p313_p2), 72  }
   0xa   : > { %s5391_s26 = smov (!%p313_p2), 104   ;;  %s5392_s27 = smov (!%p313_p2), 48  }
   0xb   : > { %s5393_s16 = smov (!%p313_p2), 40  }
   0xc   : > { %4576 = vmatpush3.bf16.msra.mxu1 (!%p313_p2), %v5078_v15 }
   0xd   : > { %s6590_s14 = smov (!%p350_p3, %s4189_s14), 1 }
   0xe   : > { %s4358_s17 = sshll.u32 %s6590_s14, 6 }
   0xf   : > { %s354_s20 = scalar_lea.vmem %s6578_s0, %s4358_s17  ;;  %s359_s29 = scalar_lea.vmem %s6588_s10, %s4358_s17 }
  0x10   : > { %v361_v2 = vld [vmem:[%s354_s20] sm:$0xff]  ;;  %v362_v3 = vld [vmem:[%s354_s20 + $0x8] sm:$0xff]  ;;  %v363_v4 = vld [vmem:[%s354_s20 + $0x10] sm:$0xff] }
  0x11   : > { %v369_v5 = vpack.c.bf16 %v362_v3, %v361_v2  ;;  %v364_v6 = vld [vmem:[%s354_s20 + $0x18] sm:$0xff]  ;;  %v365_v7 = vld [vmem:[%s354_s20 + $0x20] sm:$0xff]  ;;  %v366_v8 = vld [vmem:[%s354_s20 + $0x28] sm:$0xff] }
  0x12   : > { %v370_v9 = vpack.c.bf16 %v364_v6, %v363_v4  ;;  %v371_v10 = vpack.c.bf16 %v366_v8, %v365_v7  ;;  %v367_v11 = vld [vmem:[%s354_s20 + $0x30] sm:$0xff]  ;;  %v368_v12 = vld [vmem:[%s354_s20 + $0x38] sm:$0xff]  ;;  %s5385_s20 = smov 88  }
  0x13   : > { %4565 = vmatprep.mubr.msk.bf16.mxu0 %vm381_vm1, %v369_v5  ;;  %v372_v13 = vpack.c.bf16 %v368_v12, %v367_v11 }
  0x14   : > { %4566 = vmatmul.mubr.msk.bf16.vlgmr.msra.gmra.mrb[0].mxu0 %vm381_vm1, %v370_v9 }
  0x15   : > { %4569 = vmatprep.mubr.msk.bf16.mxu0 %vm381_vm1, %v371_v10  ;;  %4586 = vmatpush3.bf16.msra.mxu0 %v5079_v16 }
  0x16   : > { %4587 = vmatprep.subr.bf16.mxu0 %v5080_v14 }
  0x19   : > { %4588 = vmatpush3.bf16.msra.mxu0 %v5080_v14 }
  0x1c   : > { %4570 = vmatmul.mubr.msk.bf16.gmra.mrb[4].mxu0 %vm381_vm1, %v372_v13 }
  0xe7   : > { %v4567_v18 = vpop.f32.mrb[0].mxu0 }
  0xe8   : > { %v441_v19 = vadd.f32 %v4567_v18, %v4198_v17  ;;  %v432_v20 = vpop.f32.mrb[1].mxu0 }
  0xe9   : > { %v433_v21 = vadd.f32 %v4198_v17, %v432_v20  ;;  %v4568_v22 = vpop.f32.mrb[2].mxu0  ;;  %v4217_v20 = vld [vmem:[%s6582_s4] ss:$0 sm:$0xff] }
  0xea   : > { %v4205_v23 = vmul.f32 -1.442695, %v441_v19  ;;  %v444_v24 = vadd.f32 %v4568_v22, %v4198_v17  ;;  %v435_v25 = vpop.f32.mrb[3].mxu0 }
  0xeb   : > { %v4203_v26 = vmul.f32 -1.442695, %v433_v21  ;;  %v436_v27 = vadd.f32 %v4198_v17, %v435_v25 }
  0xec   : > { %5087 = vpow2.f32 %v4205_v23  ;;  %v4206_v28 = vmul.f32 -1.442695, %v444_v24 }
  0xed   : > { %5089 = vpow2.f32 %v4203_v26  ;;  %v4204_v29 = vmul.f32 -1.442695, %v436_v27 }
  0xee   : > { %5091 = vpow2.f32 %v4206_v28 }
  0xef   : > { %5093 = vpow2.f32 %v4204_v29  ;;  %v4571_v30 = vpop.f32.mrb[4].mxu0 }
  0xf0   : > { %v457_v31 = vadd.f32 %v4571_v30, %v4198_v17  ;;  %v448_v32 = vpop.f32.mrb[5].mxu0 }
  0xf1   : > { %v449_v33 = vadd.f32 %v4198_v17, %v448_v32  ;;  %v4572_v34 = vpop.f32.mrb[6].mxu0 }
  0xf2   : > { %v4209_v35 = vmul.f32 -1.442695, %v457_v31  ;;  %v460_v36 = vadd.f32 %v4572_v34, %v4198_v17  ;;  %v451_v37 = vpop.f32.mrb[7].mxu0 }
  0xf3   : > { %v4207_v38 = vmul.f32 -1.442695, %v449_v33  ;;  %v452_v39 = vadd.f32 %v4198_v17, %v451_v37 }
  0xf4   : > { %5095 = vpow2.f32 %v4209_v35  ;;  %v4210_v40 = vmul.f32 -1.442695, %v460_v36 }
  0xf5   : > { %5097 = vpow2.f32 %v4207_v38  ;;  %v4208_v41 = vmul.f32 -1.442695, %v452_v39 }
  0xf6   : > { %v5088_v42 = vpop.eup %5087  ;;  %5099 = vpow2.f32 %v4210_v40 }
  0xf7   : > { %v5090_v43 = vpop.eup %5089  ;;  %v489_v44 = vadd.f32 1.0, %v5088_v42  ;;  %5101 = vpow2.f32 %v4208_v41 }
  0xf8   : > { %v5092_v45 = vpop.eup %5091  ;;  %v487_v46 = vadd.f32 1.0, %v5090_v43 }
  0xf9   : > { %v5094_v47 = vpop.eup %5093  ;;  %5103 = vrcp.f32 %v489_v44  ;;  %v490_v48 = vadd.f32 1.0, %v5092_v45  ;;  %v4218_v44 = vld [vmem:[%s6584_s6] ss:$0 sm:$0xff] }
  0xfa   : > { %5105 = vrcp.f32 %v487_v46  ;;  %v488_v49 = vadd.f32 1.0, %v5094_v47 }
  0xfb   : > { %5107 = vrcp.f32 %v490_v48 }
  0xfc   : > { %5109 = vrcp.f32 %v488_v49 }
  0xfe   : > { %v5096_v50 = vpop.eup %5095 }
  0xff   : > { %v5098_v51 = vpop.eup %5097  ;;  %v493_v52 = vadd.f32 1.0, %v5096_v50 }
 0x100   : > { %v5100_v53 = vpop.eup %5099  ;;  %v491_v54 = vadd.f32 1.0, %v5098_v51 }
 0x101   : > { %v5102_v55 = vpop.eup %5101  ;;  %5111 = vrcp.f32 %v493_v52  ;;  %v494_v56 = vadd.f32 1.0, %v5100_v53 }
 0x102   : > { %5113 = vrcp.f32 %v491_v54  ;;  %v492_v57 = vadd.f32 1.0, %v5102_v55 }
 0x103   : > { %v5104_v58 = vpop.eup %5103  ;;  %5115 = vrcp.f32 %v494_v56 }
 0x104   : > { %v5106_v59 = vpop.eup %5105  ;;  %5117 = vrcp.f32 %v492_v57  ;;  %v513_v1 = vmul.f32 %v5104_v58, %v441_v19 }
 0x105   : > { %v5108_v60 = vpop.eup %5107  ;;  %v511_v63 = vmul.f32 %v5106_v59, %v433_v21 }
 0x106   : > { %v5110_v61 = vpop.eup %5109  ;;  %v514_v62 = vmul.f32 %v5108_v60, %v444_v24 }
 0x107   : > { %v512_v0 = vmul.f32 %v5110_v61, %v436_v27 }
 0x108   : > { %v520_v3 = vpack.c.bf16 %v514_v62, %v513_v1 }
 0x109   : > { %v519_v2 = vpack.c.bf16 %v512_v0, %v511_v63 }
 0x10b   : > { %v5112_v4 = vpop.eup %5111  ;;  %4577 = vmatprep.mubr.msk.bf16.mxu1 %vm539_vm2, %v519_v2 }
 0x10c   : > { %v5114_v5 = vpop.eup %5113  ;;  %4578 = vmatmul.mubr.msk.bf16.vlgmr.msra.gmra.mrb[0].mxu1 %vm539_vm2, %v520_v3  ;;  %v517_v11 = vmul.f32 %v5112_v4, %v457_v31 }
 0x10d   : > { %v5116_v6 = vpop.eup %5115  ;;  %v515_v9 = vmul.f32 %v5114_v5, %v449_v33 }
 0x10e   : > { %v5118_v7 = vpop.eup %5117  ;;  %v518_v8 = vmul.f32 %v5116_v6, %v460_v36 }
 0x10f   : > { %v516_v10 = vmul.f32 %v5118_v7, %v452_v39 }
 0x110   : > { %v522_v13 = vpack.c.bf16 %v518_v8, %v517_v11 }
 0x111   : > { %v521_v12 = vpack.c.bf16 %v516_v10, %v515_v9 }
 0x113   : > { %4581 = vmatprep.mubr.msk.bf16.mxu1 %vm539_vm2, %v521_v12 }
 0x114   : > { %4582 = vmatmul.mubr.msk.bf16.gmra.mrb[4].mxu1 %vm539_vm2, %v522_v13 }
 0x1df   : > { %v4579_v15 = vpop.f32.mrb[0].mxu1 }
 0x1e0   : > { %v586_v16 = vpop.f32.mrb[1].mxu1  ;;  %v619_v19 = vadd.f32 %v4579_v15, %v513_v1 }
 0x1e1   : > { %v617_v17 = vadd.f32 %v586_v16, %v511_v63  ;;  %v4580_v18 = vpop.f32.mrb[2].mxu1 }
 0x1e2   : > { %v620_v21 = vadd.f32 %v4580_v18, %v514_v62  ;;  %v589_v22 = vpop.f32.mrb[3].mxu1  ;;  %v5502_v27 = vadd.f32 %v4217_v20, %v619_v19 }
 0x1e3   : > { %v618_v23 = vadd.f32 %v589_v22, %v512_v0  ;;  %v5498_v25 = vadd.f32 %v4217_v20, %v617_v17 }
 0x1e4   : > { %v5496_v24 = vadd.f32 %v4217_v20, %v620_v21 }
 0x1e5   : > { %v5500_v26 = vadd.f32 %v4217_v20, %v618_v23 }
 0x1e6   : > { %v641_v30 = vpack.c.bf16 %v5496_v24, %v5502_v27 }
 0x1e7   : > { %v640_v28 = vpack.c.bf16 %v5500_v26, %v5498_v25  ;;  %v4583_v29 = vpop.f32.mrb[4].mxu1 }
 0x1e8   : > { %v602_v31 = vpop.f32.mrb[5].mxu1  ;;  %v623_v34 = vadd.f32 %v4583_v29, %v517_v11 }
 0x1e9   : > { %v621_v32 = vadd.f32 %v602_v31, %v515_v9  ;;  %v4584_v33 = vpop.f32.mrb[6].mxu1  ;;  %4589 = vmatprep.mubr.msk.bf16.mxu0 %vm539_vm2, %v640_v28 }
 0x1ea   : > { %v624_v35 = vadd.f32 %v4584_v33, %v518_v8  ;;  %v605_v36 = vpop.f32.mrb[7].mxu1  ;;  %4590 = vmatmul.mubr.msk.bf16.vlgmr.msra.gmra.mrb[8].mxu0 %vm539_vm2, %v641_v30  ;;  %v5516_v41 = vadd.f32 %v4217_v20, %v623_v34 }
 0x1eb   : > { %v622_v37 = vadd.f32 %v605_v36, %v516_v10  ;;  %v5512_v39 = vadd.f32 %v4217_v20, %v621_v32 }
 0x1ec   : > { %v5510_v38 = vadd.f32 %v4217_v20, %v624_v35 }
 0x1ed   : > { %v5514_v40 = vadd.f32 %v4217_v20, %v622_v37 }
 0x1ee   : > { %v643_v43 = vpack.c.bf16 %v5510_v38, %v5516_v41 }
 0x1ef   : > { %v642_v42 = vpack.c.bf16 %v5514_v40, %v5512_v39 }
 0x1f1   : > { %4593 = vmatprep.mubr.msk.bf16.mxu0 %vm539_vm2, %v642_v42 }
 0x1f2   : > { %4594 = vmatmul.mubr.msk.bf16.gmra.mrb[12].mxu0 %vm539_vm2, %v643_v43 }
 0x2bd   : > { %v4591_v45 = vpop.f32.mrb[8].mxu0 }
 0x2be   : > { %v722_v46 = vadd.f32 %v4591_v45, %v4218_v44  ;;  %v713_v47 = vpop.f32.mrb[9].mxu0 }
 0x2bf   : > { %v714_v48 = vadd.f32 %v4218_v44, %v713_v47  ;;  %v4592_v49 = vpop.f32.mrb[10].mxu0 }
 0x2c0   : > { %v725_v50 = vadd.f32 %v4592_v49, %v4218_v44  ;;  %v716_v51 = vpop.f32.mrb[11].mxu0  ;;  %v750_v53 = vmul.f32 0.35355338, %v722_v46 }
 0x2c1   : > { %v717_v52 = vadd.f32 %v4218_v44, %v716_v51  ;;  %v748_v56 = vmul.f32 0.35355338, %v714_v48 }
 0x2c2   : > { %v751_v54 = vmul.f32 0.35355338, %v725_v50  ;;  %v5527_v55 = vpack.c.bf16 %v725_v50, %v722_v46 }
 0x2c3   : > { %v749_v57 = vmul.f32 0.35355338, %v717_v52  ;;  %v5529_v58 = vpack.c.bf16 %v717_v52, %v714_v48 }
 0x2c4   : > { %v5531_v59 = vpack.c.bf16 %v751_v54, %v750_v53 }
 0x2c5   : > { %v5533_v60 = vpack.c.bf16 %v749_v57, %v748_v56  ;;  %768 = vrot.lane.b32.xlu0 %v5529_v58, %s5383_s18  ;;  %v4595_v61 = vpop.f32.mrb[12].mxu0 }
 0x2c6   : > { %v738_v62 = vadd.f32 %v4595_v61, %v4218_v44  ;;  %v729_v63 = vpop.f32.mrb[13].mxu0 }
 0x2c7   : > { %v730_v0 = vadd.f32 %v4218_v44, %v729_v63  ;;  %v4596_v1 = vpop.f32.mrb[14].mxu0  ;;  %4605 = vmatprep.mubr.msk.bf16.mxu1 %vm381_vm1, %v5533_v60 }
 0x2c8   : > { %v741_v2 = vadd.f32 %v4596_v1, %v4218_v44  ;;  %v732_v3 = vpop.f32.mrb[15].mxu0  ;;  %v754_v5 = vmul.f32 0.35355338, %v738_v62 }
 0x2c9   : > { %v733_v4 = vadd.f32 %v4218_v44, %v732_v3  ;;  %770 = vrot.lane.b32.xlu0 %v5527_v55, %s5383_s18  ;;  %v752_v8 = vmul.f32 0.35355338, %v730_v0 }
 0x2ca   : > { %v755_v6 = vmul.f32 0.35355338, %v741_v2  ;;  %v5541_v7 = vpack.c.bf16 %v741_v2, %v738_v62 }
 0x2cb   : > { %v753_v9 = vmul.f32 0.35355338, %v733_v4  ;;  %v5543_v10 = vpack.c.bf16 %v733_v4, %v730_v0 }
 0x2cc   : > { %v5545_v11 = vpack.c.bf16 %v755_v6, %v754_v5 }
 0x2cd   : > { %v5547_v12 = vpack.c.bf16 %v753_v9, %v752_v8  ;;  %772 = vrot.lane.b32.xlu1 %v5543_v10, %s5383_s18 }
 0x2d1   : > { %774 = vrot.lane.b32.xlu1 %v5541_v7, %s5383_s18 }
 0x337   : > { %v769_v13 = vpop.permute.xlu0 %768 }
 0x338   : > { %5018 = vmatprep.subr.msk.bf16.mxu1 %vm381_vm1, %v769_v13  ;;  %v789_v14 = vsel %vm381_vm1, %v769_v13, 0 }
 0x339   : > { %4598 = vmatpush3.bf16.xpose.msra.mxu1 %v789_v14 }
 0x33b   : > { %v771_v15 = vpop.permute.xlu0 %770 }
 0x33c   : > { %5019 = vmatprep.subr.msk.bf16.mxu1 %vm381_vm1, %v771_v15  ;;  %v792_v16 = vsel %vm381_vm1, %v771_v15, 0 }
 0x33f   : > { %v773_v17 = vpop.permute.xlu1 %772 }
 0x340   : > { %v795_v18 = vsel %vm381_vm1, %v773_v17, 0 }
 0x341   : > { %4600 = vmatpush3.bf16.xpose.msra.mxu1 %v792_v16 }
 0x342   : > { %5020 = vmatprep.subr.msk.bf16.mxu1 %vm381_vm1, %v773_v17 }
 0x343   : > { %v775_v19 = vpop.permute.xlu1 %774 }
 0x344   : > { %v798_v20 = vsel %vm381_vm1, %v775_v19, 0 }
 0x349   : > { %4602 = vmatpush3.bf16.xpose.msra.mxu1 %v795_v18 }
 0x34a   : > { %5021 = vmatprep.subr.msk.bf16.mxu1 %vm381_vm1, %v775_v19 }
 0x351   : > { %4604 = vmatpush3.bf16.xpose.msra.mxu1 %v798_v20 }
 0x358   : > { %4606 = vmatmul.mubr.msk.bf16.vlgmr.msra.gmra.mrb[8].mxu1 %vm381_vm1, %v5531_v59 }
 0x359   : > { %4609 = vmatprep.mubr.msk.bf16.mxu1 %vm381_vm1, %v5547_v12 }
 0x360   : > { %4610 = vmatmul.mubr.msk.bf16.gmra.mrb[12].mxu1 %vm381_vm1, %v5545_v11 }
 0x42b   : > { %v4607_v21 = vpop.f32.mrb[8].mxu1 }
 0x42c   : > { %v834_v22 = vpop.f32.mrb[9].mxu1  ;;  %v872_v23 = vsel %vm865_vm3, %v4607_v21, -inf }
 0x42d   : > { %873 = vmax.xlane.f32.xlu0 %v872_v23  ;;  %v4608_v28 = vpop.f32.mrb[10].mxu1  ;;  %v866_v31 = vsel %vm865_vm3, %v834_v22, -inf }
 0x42e   : > { %v837_v29 = vpop.f32.mrb[11].mxu1  ;;  %v875_v34 = vsel %vm865_vm3, %v4608_v28, -inf }
 0x42f   : > { %v869_v30 = vsel %vm865_vm3, %v837_v29, -inf }
 0x430   : > { %870 = vmax.xlane.f32.xlu1 %v869_v30 }
 0x431   : > { %867 = vmax.xlane.f32.xlu0 %v866_v31 }
 0x433   : > { %v4611_v32 = vpop.f32.mrb[12].mxu1 }
 0x434   : > { %v850_v33 = vpop.f32.mrb[13].mxu1  ;;  %v884_v35 = vsel %vm865_vm3, %v4611_v32, -inf }
 0x435   : > { %876 = vmax.xlane.f32.xlu0 %v875_v34  ;;  %885 = vmax.xlane.f32.xlu1 %v884_v35  ;;  %v4612_v36 = vpop.f32.mrb[14].mxu1  ;;  %v878_v43 = vsel %vm865_vm3, %v850_v33, -inf }
 0x436   : > { %v5572_v37 = vpop.f32.mrb[15].mxu1  ;;  %v887_v44 = vsel %vm865_vm3, %v4612_v36, -inf }
 0x437   : > { %v881_v42 = vsel %vm865_vm3, %v5572_v37, -inf }
 0x439   : > { %879 = vmax.xlane.f32.xlu1 %v878_v43  ;;  %882 = vmax.xlane.f32.xlu0 %v881_v42 }
 0x43d   : > { %888 = vmax.xlane.f32.xlu0 %v887_v44 }
 0x44a   : > { %958 = vrot.lane.b32.xlu1 %v5529_v58, %s5384_s19 }
 0x44e   : > { %962 = vrot.lane.b32.xlu1 %v5543_v10, %s5384_s19 }
 0x452   : > { %964 = vrot.lane.b32.xlu1 %v5541_v7, %s5384_s19 }
 0x453   : > { %960 = vrot.lane.b32.xlu0 %v5527_v55, %s5384_s19 }
 0x456   : > { %1063 = vrot.lane.b32.xlu1 %v5529_v58, %s5385_s20 }
 0x4ba   : > { %v874_v45 = vpop.xlane.xlu0 %873 }
 0x4bb   : > { %v892_v46 = vsub.f32 %v4607_v21, %v874_v45 }
 0x4bd   : > { %v902_v47 = vmul.f32 1.442695, %v892_v46  ;;  %v871_v48 = vpop.xlane.xlu1 %870 }
 0x4be   : > { %v868_v49 = vpop.xlane.xlu0 %867  ;;  %v891_v51 = vsub.f32 %v837_v29, %v871_v48 }
 0x4bf   : > { %5119 = vpow2.f32 %v902_v47  ;;  %v890_v50 = vsub.f32 %v834_v22, %v868_v49 }
 0x4c0   : > { %v900_v57 = vmul.f32 1.442695, %v891_v51 }
 0x4c1   : > { %v898_v52 = vmul.f32 1.442695, %v890_v50 }
 0x4c2   : > { %v877_v53 = vpop.xlane.xlu0 %876  ;;  %v886_v54 = vpop.xlane.xlu1 %885 }
 0x4c3   : > { %5121 = vpow2.f32 %v898_v52  ;;  %v893_v56 = vsub.f32 %v4608_v28, %v877_v53  ;;  %v896_v62 = vsub.f32 %v4611_v32, %v886_v54 }
 0x4c5   : > { %v904_v61 = vmul.f32 1.442695, %v893_v56  ;;  %v910_v2 = vmul.f32 1.442695, %v896_v62 }
 0x4c6   : > { %v880_v63 = vpop.xlane.xlu1 %879  ;;  %v883_v0 = vpop.xlane.xlu0 %882 }
 0x4c7   : > { %5123 = vpow2.f32 %v904_v61  ;;  %v894_v3 = vsub.f32 %v850_v33, %v880_v63  ;;  %v895_v34 = vsub.f32 %v5572_v37, %v883_v0 }
 0x4c8   : > { %5125 = vpow2.f32 %v900_v57 }
 0x4c9   : > { %v5588_v1 = vpop.eup %5119  ;;  %5127 = vpow2.f32 %v910_v2  ;;  %v906_v9 = vmul.f32 1.442695, %v894_v3  ;;  %v908_v35 = vmul.f32 1.442695, %v895_v34 }
 0x4ca   : > { %v959_v4 = vpop.permute.xlu1 %958  ;;  %v889_v5 = vpop.xlane.xlu0 %888  ;;  %v920_v6 = vsel %vm865_vm3, %v5588_v1, 0.0 }
 0x4cb   : > { %921 = vadd.xlane.f32.xlu1 %v920_v6  ;;  %4613 = vmatprep.subr.bf16.mxu0 %v959_v4  ;;  %v897_v13 = vsub.f32 %v4612_v36, %v889_v5  ;;  %5129 = vpow2.f32 %v906_v9 }
 0x4cc   : > { %4614 = vmatpush3.bf16.msra.mxu0 %v959_v4 }
 0x4cd   : > { %v5592_v8 = vpop.eup %5121  ;;  %v912_v18 = vmul.f32 1.442695, %v897_v13 }
 0x4ce   : > { %v963_v14 = vpop.permute.xlu1 %962  ;;  %v961_v15 = vpop.permute.xlu0 %960  ;;  %v914_v16 = vsel %vm865_vm3, %v5592_v8, 0.0 }
 0x4cf   : > { %915 = vadd.xlane.f32.xlu1 %v914_v16  ;;  %4615 = vmatprep.subr.bf16.mxu0 %v961_v15  ;;  %5131 = vpow2.f32 %v912_v18 }
 0x4d0   : > { %4616 = vmatpush3.bf16.msra.mxu0 %v961_v15  ;;  %5133 = vpow2.f32 %v908_v35 }
 0x4d1   : > { %v5596_v17 = vpop.eup %5123  ;;  %4617 = vmatprep.subr.bf16.mxu0 %v963_v14 }
 0x4d2   : > { %v965_v19 = vpop.permute.xlu1 %964  ;;  %v923_v20 = vsel %vm865_vm3, %v5596_v17, 0.0  ;;  %v5126_v21 = vpop.eup %5125 }
 0x4d3   : > { %924 = vadd.xlane.f32.xlu0 %v923_v20  ;;  %v917_v22 = vsel %vm865_vm3, %v5126_v21, 0.0  ;;  %v5601_v23 = vpop.eup %5127 }
 0x4d4   : > { %4618 = vmatpush3.bf16.msra.mxu0 %v963_v14  ;;  %v932_v29 = vsel %vm865_vm3, %v5601_v23, 0.0 }
 0x4d5   : > { %4619 = vmatprep.subr.bf16.mxu0 %v965_v19  ;;  %v5606_v30 = vpop.eup %5129 }
 0x4d6   : > { %v1064_v28 = vpop.permute.xlu1 %1063  ;;  %v926_v31 = vsel %vm865_vm3, %v5606_v30, 0.0 }
 0x4d7   : > { %918 = vadd.xlane.f32.xlu0 %v917_v22  ;;  %v1084_v0 = vsel %vm381_vm1, %v1064_v28, 0 }
 0x4d8   : > { %4620 = vmatpush3.bf16.msra.mxu0 %v965_v19 }
 0x4d9   : > { %5022 = vmatprep.subr.msk.bf16.mxu0 %vm381_vm1, %v1064_v28  ;;  %v5610_v32 = vpop.eup %5131 }
 0x4da   : > { %v935_v33 = vsel %vm865_vm3, %v5610_v32, 0.0  ;;  %v5621_v36 = vpop.eup %5133 }
 0x4db   : > { %933 = vadd.xlane.f32.xlu0 %v932_v29  ;;  %v929_v42 = vsel %vm865_vm3, %v5621_v36, 0.0 }
 0x4df   : > { %927 = vadd.xlane.f32.xlu0 %v926_v31 }
 0x4e0   : > { %1067 = vrot.lane.b32.xlu1 %v5543_v10, %s5385_s20 }
 0x4e3   : > { %936 = vadd.xlane.f32.xlu0 %v935_v33 }
 0x4f9   : > { %1065 = vrot.lane.b32.xlu0 %v5527_v55, %s5385_s20 }
 0x4fd   : > { %1055 = vrot.lane.b32.xlu0 %v5533_v60, %s5386_s21 }
 0x501   : > { %1059 = vrot.lane.b32.xlu0 %v5547_v12, %s5386_s21 }
 0x504   : > { %930 = vadd.xlane.f32.xlu1 %v929_v42 }
 0x505   : > { %1513 = vrot.lane.b32.xlu0 %v5529_v58, %s5387_s22 }
 0x509   : > { %1517 = vrot.lane.b32.xlu0 %v5543_v10, %s5387_s22 }
 0x50d   : > { %1505 = vrot.lane.b32.xlu0 %v5533_v60, %s5388_s23 }
 0x511   : > { %1509 = vrot.lane.b32.xlu0 %v5547_v12, %s5388_s23 }
 0x515   : > { %1069 = vrot.lane.b32.xlu1 %v5541_v7, %s5385_s20 }
 0x519   : > { %1057 = vrot.lane.b32.xlu1 %v5531_v59, %s5386_s21 }
 0x51d   : > { %1061 = vrot.lane.b32.xlu1 %v5545_v11, %s5386_s21 }
 0x521   : > { %1515 = vrot.lane.b32.xlu1 %v5527_v55, %s5387_s22 }
 0x525   : > { %1519 = vrot.lane.b32.xlu1 %v5541_v7, %s5387_s22 }
 0x529   : > { %1507 = vrot.lane.b32.xlu1 %v5531_v59, %s5388_s23 }
 0x52d   : > { %1511 = vrot.lane.b32.xlu1 %v5545_v11, %s5388_s23 }
 0x558   : > { %v922_v37 = vpop.xlane.xlu1 %921 }
 0x55c   : > { %v916_v43 = vpop.xlane.xlu1 %915 }
 0x560   : > { %v925_v44 = vpop.xlane.xlu0 %924  ;;  %v1068_v3 = vpop.permute.xlu1 %1067 }
 0x561   : > { %5135 = vrcp.f32 %v925_v44 }
 0x562   : > { %5137 = vrcp.f32 %v916_v43 }
 0x563   : > { %5139 = vrcp.f32 %v922_v37 }
 0x564   : > { %v919_v45 = vpop.xlane.xlu0 %918 }
 0x565   : > { %5141 = vrcp.f32 %v919_v45 }
 0x568   : > { %v934_v46 = vpop.xlane.xlu0 %933 }
 0x56b   : > { %v5136_v47 = vpop.eup %5135 }
 0x56c   : > { %v928_v48 = vpop.xlane.xlu0 %927  ;;  %v5138_v49 = vpop.eup %5137  ;;  %v949_v52 = vmul.f32 %v5136_v47, %v5596_v17 }
 0x56d   : > { %v5140_v50 = vpop.eup %5139  ;;  %v946_v54 = vmul.f32 %v5138_v49, %v5592_v8 }
 0x56e   : > { %v948_v57 = vmul.f32 %v5140_v50, %v5588_v1  ;;  %v1090_v1 = vsel %vm381_vm1, %v1068_v3, 0 }
 0x56f   : > { %v5142_v51 = vpop.eup %5141 }
 0x570   : > { %v937_v53 = vpop.xlane.xlu0 %936  ;;  %v947_v56 = vmul.f32 %v5142_v51, %v5126_v21  ;;  %v955_v62 = vpack.c.bf16 %v949_v52, %v948_v57 }
 0x571   : > { %5143 = vrcp.f32 %v937_v53 }
 0x572   : > { %v954_v61 = vpack.c.bf16 %v947_v56, %v946_v54  ;;  %5145 = vrcp.f32 %v928_v48 }
 0x573   : > { %5147 = vrcp.f32 %v934_v46 }
 0x574   : > { %4621 = vmatprep.mubr.msk.bf16.mxu0 %vm865_vm3, %v954_v61  ;;  %v1066_v63 = vpop.permute.xlu0 %1065 }
 0x575   : > { %4622 = vmatmul.mubr.msk.bf16.vlgmr.msra.gmra.mrb[16].mxu0 %vm865_vm3, %v955_v62  ;;  %v1087_v2 = vsel %vm381_vm1, %v1066_v63, 0 }
 0x576   : > { %4630 = vmatpush3.bf16.xpose.msra.mxu0 %v1084_v0 }
 0x577   : > { %5023 = vmatprep.subr.msk.bf16.mxu0 %vm381_vm1, %v1066_v63 }
 0x578   : > { %v1056_v4 = vpop.permute.xlu0 %1055 }
 0x57b   : > { %v5144_v14 = vpop.eup %5143 }
 0x57c   : > { %v1060_v5 = vpop.permute.xlu0 %1059  ;;  %v5146_v15 = vpop.eup %5145  ;;  %v953_v18 = vmul.f32 %v5144_v14, %v5610_v32 }
 0x57d   : > { %v5148_v16 = vpop.eup %5147  ;;  %v950_v19 = vmul.f32 %v5146_v15, %v5606_v30 }
 0x57e   : > { %4632 = vmatpush3.bf16.xpose.msra.mxu0 %v1087_v2  ;;  %v952_v21 = vmul.f32 %v5148_v16, %v5601_v23 }
 0x57f   : > { %5024 = vmatprep.subr.msk.bf16.mxu0 %vm381_vm1, %v1068_v3 }
 0x580   : > { %v1514_v13 = vpop.permute.xlu0 %1513  ;;  %v957_v29 = vpack.c.bf16 %v953_v18, %v952_v21 }
 0x581   : > { %v1534_v32 = vsel %vm381_vm1, %v1514_v13, 0 }
 0x584   : > { %v1518_v30 = vpop.permute.xlu0 %1517 }
 0x585   : > { %v1540_v35 = vsel %vm381_vm1, %v1518_v30, 0 }
 0x586   : > { %4634 = vmatpush3.bf16.xpose.msra.mxu0 %v1090_v1 }
 0x588   : > { %v1506_v23 = vpop.permute.xlu0 %1505 }
 0x58c   : > { %v1510_v43 = vpop.permute.xlu0 %1509 }
 0x591   : > { %v931_v6 = vpop.xlane.xlu1 %930 }
 0x592   : > { %5149 = vrcp.f32 %v931_v6 }
 0x595   : > { %v1070_v8 = vpop.permute.xlu1 %1069 }
 0x596   : > { %5025 = vmatprep.subr.msk.bf16.mxu0 %vm381_vm1, %v1070_v8  ;;  %v1093_v9 = vsel %vm381_vm1, %v1070_v8, 0 }
 0x597   : > { %4636 = vmatpush3.bf16.xpose.msra.mxu0 %v1093_v9 }
 0x598   : > { %5028 = vmatprep.subr.msk.bf16.mxu0 %vm381_vm1, %v1514_v13 }
 0x599   : > { %v1058_v22 = vpop.permute.xlu1 %1057 }
 0x59c   : > { %v5150_v17 = vpop.eup %5149 }
 0x59d   : > { %v951_v20 = vmul.f32 %v5150_v17, %v5621_v36  ;;  %v1062_v31 = vpop.permute.xlu1 %1061 }
 0x59f   : > { %v956_v28 = vpack.c.bf16 %v951_v20, %v950_v19 }
 0x5a1   : > { %4625 = vmatprep.mubr.msk.bf16.mxu0 %vm865_vm3, %v956_v28  ;;  %v1516_v33 = vpop.permute.xlu1 %1515 }
 0x5a2   : > { %4626 = vmatmul.mubr.msk.bf16.gmra.mrb[20].mxu0 %vm865_vm3, %v957_v29  ;;  %v1537_v34 = vsel %vm381_vm1, %v1516_v33, 0 }
 0x5a3   : > { %4637 = vmatprep.mubr.msk.bf16.mxu0 %vm381_vm1, %v1056_v4 }
 0x5a5   : > { %v1520_v36 = vpop.permute.xlu1 %1519 }
 0x5a6   : > { %v1543_v42 = vsel %vm381_vm1, %v1520_v36, 0 }
 0x5a9   : > { %v1508_v37 = vpop.permute.xlu1 %1507 }
 0x5aa   : > { %4638 = vmatmul.mubr.msk.bf16.vlgmr.msra.gmra.mrb[24].mxu0 %vm381_vm1, %v1058_v22 }
 0x5ab   : > { %4682 = vmatpush3.bf16.xpose.msra.mxu0 %v1534_v32  ;;  %4641 = vmatprep.mubr.msk.bf16.mxu0 %vm381_vm1, %v1060_v5 }
 0x5ac   : > { %5029 = vmatprep.subr.msk.bf16.mxu0 %vm381_vm1, %v1516_v33 }
 0x5ad   : > { %v1512_v44 = vpop.permute.xlu1 %1511 }
 0x5b2   : > { %4642 = vmatmul.mubr.msk.bf16.gmra.mrb[28].mxu0 %vm381_vm1, %v1062_v31 }
 0x5b3   : > { %4684 = vmatpush3.bf16.xpose.msra.mxu0 %v1537_v34  ;;  %4689 = vmatprep.mubr.msk.bf16.mxu0 %vm381_vm1, %v1506_v23 }
 0x5b4   : > { %5030 = vmatprep.subr.msk.bf16.mxu0 %vm381_vm1, %v1518_v30 }
 0x5bb   : > { %4686 = vmatpush3.bf16.xpose.msra.mxu0 %v1540_v35 }
 0x5bc   : > { %5031 = vmatprep.subr.msk.bf16.mxu0 %vm381_vm1, %v1520_v36 }
 0x5c3   : > { %4688 = vmatpush3.bf16.xpose.msra.mxu0 %v1543_v42 }
 0x5ca   : > { %4690 = vmatmul.mubr.msk.bf16.vlgmr.msra.gmra.mrb[32].mxu0 %vm381_vm1, %v1508_v37 }
 0x5cb   : > { %4693 = vmatprep.mubr.msk.bf16.mxu0 %vm381_vm1, %v1510_v43 }
 0x5d2   : > { %4694 = vmatmul.mubr.msk.bf16.gmra.mrb[36].mxu0 %vm381_vm1, %v1512_v44 }
 0x648   : > { %v5683_v45 = vpop.f32.mrb[16].mxu0 }
 0x649   : > { %v5685_v46 = vpop.f32.mrb[17].mxu0 }
 0x64a   : > { %v5687_v47 = vpop.f32.mrb[18].mxu0 }
 0x64b   : > { %v1048_v48 = vpack.c.bf16 %v5687_v47, %v5683_v45  ;;  %v5691_v49 = vpop.f32.mrb[19].mxu0 }
 0x64c   : > { %v1047_v50 = vpack.c.bf16 %v5691_v49, %v5685_v46 }
 0x675   : > { %v5695_v51 = vpop.f32.mrb[20].mxu0 }
 0x676   : > { %v5697_v52 = vpop.f32.mrb[21].mxu0 }
 0x677   : > { %v5699_v53 = vpop.f32.mrb[22].mxu0 }
 0x678   : > { %v1050_v54 = vpack.c.bf16 %v5699_v53, %v5695_v51  ;;  %v5703_v56 = vpop.f32.mrb[23].mxu0 }
 0x679   : > { %v1049_v57 = vpack.c.bf16 %v5703_v56, %v5697_v52 }
 0x67d   : > { %v4639_v61 = vpop.f32.mrb[24].mxu0 }
 0x67e   : > { %v1129_v62 = vpop.f32.mrb[25].mxu0  ;;  %v1166_v1 = vsel %vm865_vm3, %v4639_v61, -inf }
 0x67f   : > { %v4640_v63 = vpop.f32.mrb[26].mxu0  ;;  %v1160_v0 = vsel %vm865_vm3, %v1129_v62, -inf }
 0x680   : > { %1161 = vmax.xlane.f32.xlu0 %v1160_v0  ;;  %v1132_v2 = vpop.f32.mrb[27].mxu0  ;;  %v1169_v8 = vsel %vm865_vm3, %v4640_v63, -inf }
 0x681   : > { %v1163_v3 = vsel %vm865_vm3, %v1132_v2, -inf }
 0x682   : > { %1164 = vmax.xlane.f32.xlu1 %v1163_v3 }
 0x684   : > { %1167 = vmax.xlane.f32.xlu0 %v1166_v1 }
 0x685   : > { %v4643_v4 = vpop.f32.mrb[28].mxu0 }
 0x686   : > { %v1145_v5 = vpop.f32.mrb[29].mxu0  ;;  %v1178_v14 = vsel %vm865_vm3, %v4643_v4, -inf }
 0x687   : > { %v4644_v6 = vpop.f32.mrb[30].mxu0  ;;  %v1172_v9 = vsel %vm865_vm3, %v1145_v5, -inf }
 0x688   : > { %1170 = vmax.xlane.f32.xlu0 %v1169_v8  ;;  %1173 = vmax.xlane.f32.xlu1 %v1172_v9  ;;  %v1148_v13 = vpop.f32.mrb[31].mxu0  ;;  %v1181_v16 = vsel %vm865_vm3, %v4644_v6, -inf }
 0x689   : > { %v1175_v15 = vsel %vm865_vm3, %v1148_v13, -inf }
 0x68c   : > { %1179 = vmax.xlane.f32.xlu1 %v1178_v14  ;;  %1176 = vmax.xlane.f32.xlu0 %v1175_v15 }
 0x690   : > { %1182 = vmax.xlane.f32.xlu0 %v1181_v16 }
 0x69d   : > { %v5715_v17 = vpop.f32.mrb[32].mxu0  ;;  %1252 = vrot.lane.b32.xlu1 %v5529_v58, %s5389_s24 }
 0x69e   : > { %v5719_v18 = vpop.f32.mrb[33].mxu0 }
 0x69f   : > { %v5721_v19 = vpop.f32.mrb[34].mxu0 }
 0x6a0   : > { %v5723_v20 = vpop.f32.mrb[35].mxu0 }
 0x6a5   : > { %v5725_v21 = vpop.f32.mrb[36].mxu0 }
 0x6a6   : > { %v5727_v22 = vpop.f32.mrb[37].mxu0 }
 0x6a7   : > { %v5729_v28 = vpop.f32.mrb[38].mxu0 }
 0x6a8   : > { %v5731_v29 = vpop.f32.mrb[39].mxu0 }
 0x70d   : > { %v1162_v31 = vpop.xlane.xlu0 %1161 }
 0x70e   : > { %v1184_v32 = vsub.f32 %v1129_v62, %v1162_v31 }
 0x70f   : > { %v1165_v33 = vpop.xlane.xlu1 %1164 }
 0x710   : > { %v1192_v34 = vmul.f32 1.442695, %v1184_v32  ;;  %v1185_v36 = vsub.f32 %v1132_v2, %v1165_v33 }
 0x711   : > { %v1168_v30 = vpop.xlane.xlu0 %1167 }
 0x712   : > { %v1186_v23 = vsub.f32 %v4639_v61, %v1168_v30  ;;  %v1194_v3 = vmul.f32 1.442695, %v1185_v36 }
 0x714   : > { %v1196_v35 = vmul.f32 1.442695, %v1186_v23 }
 0x715   : > { %v1174_v42 = vpop.xlane.xlu1 %1173  ;;  %v1171_v37 = vpop.xlane.xlu0 %1170 }
 0x716   : > { %5151 = vpow2.f32 %v1196_v35  ;;  %v1187_v43 = vsub.f32 %v4640_v63, %v1171_v37  ;;  %v1188_v44 = vsub.f32 %v1145_v5, %v1174_v42 }
 0x717   : > { %5153 = vpow2.f32 %v1192_v34 }
 0x718   : > { %v1198_v0 = vmul.f32 1.442695, %v1187_v43  ;;  %v1200_v14 = vmul.f32 1.442695, %v1188_v44 }
 0x719   : > { %v1180_v1 = vpop.xlane.xlu1 %1179  ;;  %v1177_v8 = vpop.xlane.xlu0 %1176 }
 0x71a   : > { %v1190_v9 = vsub.f32 %v4643_v4, %v1180_v1  ;;  %5155 = vpow2.f32 %v1198_v0  ;;  %v1189_v15 = vsub.f32 %v1148_v13, %v1177_v8  ;;  %v1610_v1 = vsel %vm865_vm3, %v5719_v18, -inf }
 0x71b   : > { %5157 = vpow2.f32 %v1194_v3  ;;  %v1613_v3 = vsel %vm865_vm3, %v5723_v20, -inf  ;;  %v1625_v8 = vsel %vm865_vm3, %v5731_v29, -inf }
 0x71c   : > { %v1204_v62 = vmul.f32 1.442695, %v1190_v9  ;;  %v1202_v5 = vmul.f32 1.442695, %v1189_v15  ;;  %v1631_v9 = vsel %vm865_vm3, %v5729_v28, -inf }
 0x71d   : > { %v1253_v61 = vpop.permute.xlu1 %1252  ;;  %v1183_v16 = vpop.xlane.xlu0 %1182 }
 0x71e   : > { %5159 = vpow2.f32 %v1204_v62  ;;  %v1191_v2 = vsub.f32 %v4644_v6, %v1183_v16  ;;  %4645 = vmatprep.subr.bf16.mxu1 %v1253_v61 }
 0x71f   : > { %4646 = vmatpush3.bf16.msra.mxu1 %v1253_v61  ;;  %5161 = vpow2.f32 %v1200_v14 }
 0x720   : > { %v5733_v31 = vpop.eup %5151  ;;  %v1206_v63 = vmul.f32 1.442695, %v1191_v2 }
 0x721   : > { %v1214_v32 = vsel %vm865_vm3, %v5733_v31, 0.0  ;;  %v5737_v4 = vpop.eup %5153 }
 0x722   : > { %5163 = vpow2.f32 %v1206_v63  ;;  %1215 = vadd.xlane.f32.xlu1 %v1214_v32  ;;  %v1208_v6 = vsel %vm865_vm3, %v5737_v4, 0.0 }
 0x723   : > { %5165 = vpow2.f32 %v1202_v5 }
 0x724   : > { %v5739_v33 = vpop.eup %5155 }
 0x725   : > { %v1217_v13 = vsel %vm865_vm3, %v5739_v33, 0.0  ;;  %v5745_v30 = vpop.eup %5157 }
 0x726   : > { %1209 = vadd.xlane.f32.xlu1 %v1208_v6  ;;  %1218 = vadd.xlane.f32.xlu0 %v1217_v13  ;;  %v1211_v36 = vsel %vm865_vm3, %v5745_v30, 0.0 }
 0x728   : > { %v5747_v23 = vpop.eup %5159 }
 0x729   : > { %v1226_v34 = vsel %vm865_vm3, %v5747_v23, 0.0  ;;  %v5751_v35 = vpop.eup %5161 }
 0x72a   : > { %1227 = vadd.xlane.f32.xlu1 %v1226_v34  ;;  %1212 = vadd.xlane.f32.xlu0 %v1211_v36  ;;  %v1220_v37 = vsel %vm865_vm3, %v5751_v35, 0.0 }
 0x72c   : > { %v5755_v42 = vpop.eup %5163 }
 0x72d   : > { %v1229_v43 = vsel %vm865_vm3, %v5755_v42, 0.0  ;;  %v5761_v44 = vpop.eup %5165 }
 0x72e   : > { %1221 = vadd.xlane.f32.xlu1 %v1220_v37  ;;  %1230 = vadd.xlane.f32.xlu0 %v1229_v43  ;;  %v1223_v0 = vsel %vm865_vm3, %v5761_v44, 0.0 }
 0x732   : > { %1224 = vadd.xlane.f32.xlu0 %v1223_v0 }
 0x73f   : > { %1256 = vrot.lane.b32.xlu1 %v5543_v10, %s5389_s24 }
 0x743   : > { %1258 = vrot.lane.b32.xlu1 %v5541_v7, %s5389_s24 }
 0x747   : > { %1893 = vrot.lane.b32.xlu1 %v5527_v55, %s5390_s25 }
 0x748   : > { %1254 = vrot.lane.b32.xlu0 %v5527_v55, %s5389_s24 }
 0x74b   : > { %1897 = vrot.lane.b32.xlu1 %v5541_v7, %s5390_s25 }
 0x74c   : > { %1891 = vrot.lane.b32.xlu0 %v5529_v58, %s5390_s25 }
 0x74f   : > { %1885 = vrot.lane.b32.xlu1 %v5531_v59, %s5391_s26  ;;  %v1622_v59 = vsel %vm865_vm3, %v5727_v22, -inf }
 0x750   : > { %1895 = vrot.lane.b32.xlu0 %v5543_v10, %s5390_s25 }
 0x753   : > { %1889 = vrot.lane.b32.xlu1 %v5545_v11, %s5391_s26  ;;  %v1616_v11 = vsel %vm865_vm3, %v5715_v17, -inf }
 0x754   : > { %1883 = vrot.lane.b32.xlu0 %v5533_v60, %s5391_s26  ;;  %v1628_v60 = vsel %vm865_vm3, %v5725_v21, -inf }
 0x758   : > { %1887 = vrot.lane.b32.xlu0 %v5547_v12, %s5391_s26  ;;  %v1619_v12 = vsel %vm865_vm3, %v5721_v19, -inf }
 0x777   : > { %1614 = vmax.xlane.f32.xlu1 %v1613_v3  ;;  %1611 = vmax.xlane.f32.xlu0 %v1610_v1 }
 0x77b   : > { %1623 = vmax.xlane.f32.xlu1 %v1622_v59  ;;  %1617 = vmax.xlane.f32.xlu0 %v1616_v11 }
 0x77f   : > { %1629 = vmax.xlane.f32.xlu1 %v1628_v60  ;;  %1620 = vmax.xlane.f32.xlu0 %v1619_v12 }
 0x783   : > { %1626 = vmax.xlane.f32.xlu0 %v1625_v8 }
 0x787   : > { %1632 = vmax.xlane.f32.xlu0 %v1631_v9 }
 0x790   : > { %1702 = vrot.lane.b32.xlu1 %v5529_v58, %s5392_s27 }
 0x7af   : > { %v1216_v14 = vpop.xlane.xlu1 %1215 }
 0x7b3   : > { %v1210_v62 = vpop.xlane.xlu1 %1209  ;;  %v1219_v15 = vpop.xlane.xlu0 %1218 }
 0x7b4   : > { %5167 = vrcp.f32 %v1210_v62 }
 0x7b7   : > { %v1228_v61 = vpop.xlane.xlu1 %1227  ;;  %v1213_v16 = vpop.xlane.xlu0 %1212 }
 0x7b8   : > { %5169 = vrcp.f32 %v1213_v16 }
 0x7b9   : > { %5171 = vrcp.f32 %v1219_v15 }
 0x7ba   : > { %5173 = vrcp.f32 %v1216_v14 }
 0x7bb   : > { %v1222_v2 = vpop.xlane.xlu1 %1221  ;;  %v1231_v63 = vpop.xlane.xlu0 %1230 }
 0x7bc   : > { %5175 = vrcp.f32 %v1222_v2 }
 0x7be   : > { %v5168_v6 = vpop.eup %5167 }
 0x7bf   : > { %v1257_v5 = vpop.permute.xlu1 %1256  ;;  %v1225_v32 = vpop.xlane.xlu0 %1224  ;;  %v1240_v37 = vmul.f32 %v5168_v6, %v5737_v4 }
 0x7c0   : > { %5177 = vrcp.f32 %v1225_v32 }
 0x7c1   : > { %5179 = vrcp.f32 %v1231_v63 }
 0x7c2   : > { %v5170_v13 = vpop.eup %5169  ;;  %5181 = vrcp.f32 %v1228_v61 }
 0x7c3   : > { %v1259_v34 = vpop.permute.xlu1 %1258  ;;  %v1255_v36 = vpop.permute.xlu0 %1254  ;;  %v1241_v43 = vmul.f32 %v5170_v13, %v5745_v30 }
 0x7c4   : > { %4647 = vmatprep.subr.bf16.mxu1 %v1255_v36  ;;  %v5172_v3 = vpop.eup %5171 }
 0x7c5   : > { %4648 = vmatpush3.bf16.msra.mxu1 %v1255_v36  ;;  %v1248_v0 = vpack.c.bf16 %v1241_v43, %v1240_v37  ;;  %v5174_v59 = vpop.eup %5173  ;;  %v1243_v30 = vmul.f32 %v5172_v3, %v5739_v33 }
 0x7c6   : > { %4649 = vmatprep.subr.bf16.mxu1 %v1257_v5  ;;  %v5176_v60 = vpop.eup %5175  ;;  %v1242_v14 = vmul.f32 %v5174_v59, %v5733_v31 }
 0x7c7   : > { %4653 = vmatprep.mubr.msk.bf16.mxu1 %vm865_vm3, %v1248_v0  ;;  %v1892_v1 = vpop.permute.xlu0 %1891  ;;  %v1894_v12 = vpop.permute.xlu1 %1893  ;;  %v1244_v62 = vmul.f32 %v5176_v60, %v5751_v35 }
 0x7c8   : > { %5033 = vmatprep.subr.msk.bf16.mxu0 %vm381_vm1, %v1892_v1  ;;  %v1912_v11 = vsel %vm381_vm1, %v1892_v1, 0  ;;  %v1249_v15 = vpack.c.bf16 %v1243_v30, %v1242_v14  ;;  %v1915_v33 = vsel %vm381_vm1, %v1894_v12, 0 }
 0x7c9   : > { %4650 = vmatpush3.bf16.msra.mxu1 %v1257_v5  ;;  %4724 = vmatpush3.bf16.xpose.msra.mxu0 %v1912_v11 }
 0x7ca   : > { %v5178_v4 = vpop.eup %5177  ;;  %4651 = vmatprep.subr.bf16.mxu1 %v1259_v34  ;;  %5034 = vmatprep.subr.msk.bf16.mxu0 %vm381_vm1, %v1894_v12 }
 0x7cb   : > { %v1896_v8 = vpop.permute.xlu0 %1895  ;;  %v1245_v9 = vmul.f32 %v5178_v4, %v5761_v44  ;;  %v5180_v61 = vpop.eup %5179 }
 0x7cc   : > { %v5182_v63 = vpop.eup %5181  ;;  %v1247_v31 = vmul.f32 %v5180_v61, %v5755_v42  ;;  %v1918_v5 = vsel %vm381_vm1, %v1896_v8, 0  ;;  %v1898_v32 = vpop.permute.xlu1 %1897 }
 0x7cd   : > { %4652 = vmatpush3.bf16.msra.mxu1 %v1259_v34  ;;  %v1250_v2 = vpack.c.bf16 %v1245_v9, %v1244_v62  ;;  %v1246_v35 = vmul.f32 %v5182_v63, %v5747_v23  ;;  %v1921_v6 = vsel %vm381_vm1, %v1898_v32, 0 }
 0x7cf   : > { %v1884_v16 = vpop.permute.xlu0 %1883  ;;  %v1251_v44 = vpack.c.bf16 %v1247_v31, %v1246_v35 }
 0x7d0   : > { %4654 = vmatmul.mubr.msk.bf16.vlgmr.msra.gmra.mrb[16].mxu1 %vm865_vm3, %v1249_v15  ;;  %4731 = vmatprep.mubr.msk.bf16.mxu0 %vm381_vm1, %v1884_v16  ;;  %v1886_v13 = vpop.permute.xlu1 %1885 }
 0x7d1   : > { %4657 = vmatprep.mubr.msk.bf16.mxu1 %vm865_vm3, %v1250_v2  ;;  %4726 = vmatpush3.bf16.xpose.msra.mxu0 %v1915_v33 }
 0x7d2   : > { %5035 = vmatprep.subr.msk.bf16.mxu0 %vm381_vm1, %v1896_v8 }
 0x7d3   : > { %v1888_v34 = vpop.permute.xlu0 %1887 }
 0x7d4   : > { %v1890_v42 = vpop.permute.xlu1 %1889 }
 0x7d8   : > { %4658 = vmatmul.mubr.msk.bf16.gmra.mrb[20].mxu1 %vm865_vm3, %v1251_v44 }
 0x7d9   : > { %4728 = vmatpush3.bf16.xpose.msra.mxu0 %v1918_v5 }
 0x7da   : > { %5036 = vmatprep.subr.msk.bf16.mxu0 %vm381_vm1, %v1898_v32 }
 0x7e1   : > { %4730 = vmatpush3.bf16.xpose.msra.mxu0 %v1921_v6 }
 0x7e8   : > { %4732 = vmatmul.mubr.msk.bf16.vlgmr.msra.gmra.mrb[40].mxu0 %vm381_vm1, %v1886_v13 }
 0x7e9   : > { %4735 = vmatprep.mubr.msk.bf16.mxu0 %vm381_vm1, %v1888_v34  ;;  %v745_v34 = vld [vmem:[%s6585_s7 + $0x4] sm:$0xf] }
 0x7ea   : > { %5026 = vmatprep.subr.msk.bf16.mxu1 %vm394_vm0, %v745_v34 }
 0x7f0   : > { %4736 = vmatmul.mubr.msk.bf16.gmra.mrb[44].mxu0 %vm381_vm1, %v1890_v42 }
 0x804   : > { %v1615_v23 = vpop.xlane.xlu1 %1614  ;;  %v1612_v36 = vpop.xlane.xlu0 %1611 }
 0x805   : > { %v1634_v37 = vsub.f32 %v5719_v18, %v1612_v36  ;;  %v1635_v1 = vsub.f32 %v5723_v20, %v1615_v23  ;;  %v1358_v23 = vsel %vm394_vm0, %v745_v34, 0 }
 0x806   : > { %4662 = vmatpush3.bf16.msra.mxu1 %v1358_v23 }
 0x807   : > { %v1642_v59 = vmul.f32 1.442695, %v1634_v37  ;;  %v1644_v8 = vmul.f32 1.442695, %v1635_v1  ;;  %v744_v37 = vld [vmem:[%s6585_s7] sm:$0xf] }
 0x808   : > { %v1624_v43 = vpop.xlane.xlu1 %1623  ;;  %v1618_v0 = vpop.xlane.xlu0 %1617  ;;  %5027 = vmatprep.subr.msk.bf16.mxu1 %vm394_vm0, %v744_v37 }
 0x809   : > { %v1636_v3 = vsub.f32 %v5715_v17, %v1618_v0  ;;  %v1638_v9 = vsub.f32 %v5727_v22, %v1624_v43 }
 0x80b   : > { %v1646_v11 = vmul.f32 1.442695, %v1636_v3  ;;  %v1650_v17 = vmul.f32 1.442695, %v1638_v9 }
 0x80c   : > { %v1630_v60 = vpop.xlane.xlu1 %1629  ;;  %v1621_v4 = vpop.xlane.xlu0 %1620 }
 0x80d   : > { %v1640_v12 = vsub.f32 %v5725_v21, %v1630_v60  ;;  %5183 = vpow2.f32 %v1646_v11  ;;  %v1637_v30 = vsub.f32 %v5721_v19, %v1621_v4  ;;  %v1438_v4 = vsel %vm394_vm0, %v744_v37, 0 }
 0x80e   : > { %5185 = vpow2.f32 %v1642_v59 }
 0x80f   : > { %v1654_v18 = vmul.f32 1.442695, %v1640_v12  ;;  %v1648_v14 = vmul.f32 1.442695, %v1637_v30 }
 0x810   : > { %v1627_v62 = vpop.xlane.xlu0 %1626  ;;  %v1703_v43 = vpop.permute.xlu1 %1702 }
 0x811   : > { %5187 = vpow2.f32 %v1648_v14  ;;  %v1639_v20 = vsub.f32 %v5731_v29, %v1627_v62 }
 0x812   : > { %5189 = vpow2.f32 %v1644_v8 }
 0x813   : > { %5191 = vpow2.f32 %v1654_v18  ;;  %v1652_v19 = vmul.f32 1.442695, %v1639_v20 }
 0x814   : > { %v1633_v15 = vpop.xlane.xlu0 %1632  ;;  %5193 = vpow2.f32 %v1650_v17 }
 0x815   : > { %v1641_v21 = vsub.f32 %v5729_v28, %v1633_v15 }
 0x817   : > { %v5837_v61 = vpop.eup %5183  ;;  %v1656_v16 = vmul.f32 1.442695, %v1641_v21 }
 0x818   : > { %v1664_v22 = vsel %vm865_vm3, %v5837_v61, 0.0  ;;  %v5841_v2 = vpop.eup %5185 }
 0x819   : > { %5195 = vpow2.f32 %v1656_v16  ;;  %1665 = vadd.xlane.f32.xlu1 %v1664_v22  ;;  %v1658_v28 = vsel %vm865_vm3, %v5841_v2, 0.0 }
 0x81a   : > { %5197 = vpow2.f32 %v1652_v19 }
 0x81b   : > { %v5843_v33 = vpop.eup %5187 }
 0x81c   : > { %v5845_v63 = vpop.eup %5189  ;;  %v1667_v29 = vsel %vm865_vm3, %v5843_v33, 0.0 }
 0x81d   : > { %v5851_v31 = vpop.eup %5191  ;;  %1659 = vadd.xlane.f32.xlu1 %v1658_v28  ;;  %1668 = vadd.xlane.f32.xlu0 %v1667_v29  ;;  %v1661_v44 = vsel %vm865_vm3, %v5845_v63, 0.0 }
 0x81e   : > { %v1676_v35 = vsel %vm865_vm3, %v5851_v31, 0.0  ;;  %v5857_v5 = vpop.eup %5193 }
 0x81f   : > { %v1670_v6 = vsel %vm865_vm3, %v5857_v5, 0.0 }
 0x821   : > { %1677 = vadd.xlane.f32.xlu1 %v1676_v35  ;;  %1662 = vadd.xlane.f32.xlu0 %v1661_v44 }
 0x823   : > { %v5859_v32 = vpop.eup %5195 }
 0x824   : > { %v1679_v13 = vsel %vm865_vm3, %v5859_v32, 0.0  ;;  %v5868_v42 = vpop.eup %5197 }
 0x825   : > { %1671 = vadd.xlane.f32.xlu1 %v1670_v6  ;;  %1680 = vadd.xlane.f32.xlu0 %v1679_v13  ;;  %v1673_v36 = vsel %vm865_vm3, %v5868_v42, 0.0 }
 0x829   : > { %1674 = vadd.xlane.f32.xlu0 %v1673_v36 }
 0x836   : > { %1706 = vrot.lane.b32.xlu1 %v5543_v10, %s5392_s27 }
 0x83a   : > { %1708 = vrot.lane.b32.xlu1 %v5541_v7, %s5392_s27 }
 0x83f   : > { %1704 = vrot.lane.b32.xlu0 %v5527_v55, %s5392_s27 }
 0x8a3   : > { %v4655_v0 = vpop.f32.mrb[16].mxu1 }
 0x8a4   : > { %v1310_v3 = vpop.f32.mrb[17].mxu1 }
 0x8a5   : > { %v4656_v1 = vpop.f32.mrb[18].mxu1 }
 0x8a6   : > { %v1342_v59 = vpack.c.bf16 %v4656_v1, %v4655_v0  ;;  %v1313_v11 = vpop.f32.mrb[19].mxu1  ;;  %v1666_v60 = vpop.xlane.xlu1 %1665 }
 0x8a7   : > { %v1341_v12 = vpack.c.bf16 %v1313_v11, %v1310_v3 }
 0x8a9   : > { %4663 = vmatprep.mubr.msk.bf16.mxu1 %vm381_vm1, %v1341_v12 }
 0x8aa   : > { %4664 = vmatmul.mubr.msk.bf16.vlgmr.msra.gmra.mrb[24].mxu1 %vm381_vm1, %v1342_v59  ;;  %v1669_v30 = vpop.xlane.xlu0 %1668  ;;  %v1660_v8 = vpop.xlane.xlu1 %1659 }
 0x8ab   : > { %4672 = vmatpush3.bf16.msra.mxu1 %v1438_v4  ;;  %v4659_v9 = vpop.f32.mrb[20].mxu1 }
 0x8ac   : > { %4697 = vmatprep.subr.bf16.mxu1 %v1703_v43  ;;  %v1326_v18 = vpop.f32.mrb[21].mxu1 }
 0x8ad   : > { %v4660_v14 = vpop.f32.mrb[22].mxu1 }
 0x8ae   : > { %v1344_v62 = vpack.c.bf16 %v4660_v14, %v4659_v9  ;;  %v1329_v17 = vpop.f32.mrb[23].mxu1  ;;  %v1663_v15 = vpop.xlane.xlu0 %1662  ;;  %v746_v9 = vld [vmem:[%s6585_s7 + $0x8] sm:$0xf] }
 0x8af   : > { %v1343_v20 = vpack.c.bf16 %v1329_v17, %v1326_v18  ;;  %5199 = vrcp.f32 %v1663_v15  ;;  %v1678_v21 = vpop.xlane.xlu1 %1677  ;;  %v1808_v18 = vsel %vm394_vm0, %v746_v9, 0 }
 0x8b0   : > { %5201 = vrcp.f32 %v1660_v8 }
 0x8b1   : > { %4667 = vmatprep.mubr.msk.bf16.mxu1 %vm381_vm1, %v1343_v20  ;;  %5203 = vrcp.f32 %v1669_v30 }
 0x8b2   : > { %4668 = vmatmul.mubr.msk.bf16.gmra.mrb[28].mxu1 %vm381_vm1, %v1344_v62  ;;  %v1681_v19 = vpop.xlane.xlu0 %1680 }
 0x8b3   : > { %4673 = vmatprep.mubr.msk.bf16.mxu1 %vm381_vm1, %v1047_v50  ;;  %v1672_v16 = vpop.xlane.xlu1 %1671 }
 0x8b6   : > { %v1675_v22 = vpop.xlane.xlu0 %1674 }
 0x8b7   : > { %5205 = vrcp.f32 %v1675_v22  ;;  %v1707_v35 = vpop.permute.xlu1 %1706 }
 0x8b8   : > { %5207 = vrcp.f32 %v1666_v60 }
 0x8b9   : > { %v5200_v28 = vpop.eup %5199  ;;  %5209 = vrcp.f32 %v1672_v16 }
 0x8ba   : > { %4674 = vmatmul.mubr.msk.bf16.vlgmr.msra.gmra.mrb[24].mxu1 %vm381_vm1, %v1048_v48  ;;  %v1705_v29 = vpop.permute.xlu0 %1704  ;;  %v5202_v49 = vpop.eup %5201  ;;  %v1691_v47 = vmul.f32 %v5200_v28, %v5845_v63  ;;  %5211 = vrcp.f32 %v1681_v19 }
 0x8bb   : > { %4698 = vmatpush3.bf16.msra.mxu1 %v1703_v43  ;;  %4677 = vmatprep.mubr.msk.bf16.mxu1 %vm381_vm1, %v1049_v57  ;;  %v5901_v46 = vpop.f32.mrb[40].mxu0  ;;  %v1690_v56 = vmul.f32 %v5202_v49, %v5841_v2  ;;  %v5204_v13 = vpop.eup %5203  ;;  %5213 = vrcp.f32 %v1678_v21 }
 0x8bc   : > { %4699 = vmatprep.subr.bf16.mxu1 %v1705_v29  ;;  %v5903_v50 = vpop.f32.mrb[41].mxu0  ;;  %v1994_v57 = vsel %vm865_vm3, %v5901_v46, -inf  ;;  %v1709_v34 = vpop.permute.xlu1 %1708  ;;  %v1693_v43 = vmul.f32 %v5204_v13, %v5843_v33 }
 0x8bd   : > { %v5905_v44 = vpop.f32.mrb[42].mxu0  ;;  %v1988_v45 = vsel %vm865_vm3, %v5903_v50, -inf  ;;  %v1698_v6 = vpack.c.bf16 %v1691_v47, %v1690_v56 }
 0x8be   : > { %v5910_v48 = vpop.f32.mrb[43].mxu0  ;;  %1989 = vmax.xlane.f32.xlu0 %v1988_v45  ;;  %v1997_v51 = vsel %vm865_vm3, %v5905_v44, -inf }
 0x8bf   : > { %4700 = vmatpush3.bf16.msra.mxu1 %v1705_v29  ;;  %v1991_v52 = vsel %vm865_vm3, %v5910_v48, -inf }
 0x8c0   : > { %4701 = vmatprep.subr.bf16.mxu1 %v1707_v35  ;;  %1992 = vmax.xlane.f32.xlu1 %v1991_v52 }
 0x8c1   : > { %v5206_v63 = vpop.eup %5205 }
 0x8c2   : > { %4678 = vmatmul.mubr.msk.bf16.gmra.mrb[28].mxu1 %vm381_vm1, %v1050_v54  ;;  %1995 = vmax.xlane.f32.xlu0 %v1994_v57  ;;  %v5208_v23 = vpop.eup %5207  ;;  %v1695_v54 = vmul.f32 %v5206_v63, %v5868_v42 }
 0x8c3   : > { %4702 = vmatpush3.bf16.msra.mxu1 %v1707_v35  ;;  %4705 = vmatprep.mubr.msk.bf16.mxu1 %vm865_vm3, %v1698_v6  ;;  %v4737_v2 = vpop.f32.mrb[44].mxu0  ;;  %v5210_v37 = vpop.eup %5209  ;;  %v1692_v1 = vmul.f32 %v5208_v23, %v5837_v61 }
 0x8c4   : > { %4703 = vmatprep.subr.bf16.mxu1 %v1709_v34  ;;  %v1973_v36 = vpop.f32.mrb[45].mxu0  ;;  %v1694_v59 = vmul.f32 %v5210_v37, %v5857_v5  ;;  %v2006_v33 = vsel %vm865_vm3, %v4737_v2, -inf  ;;  %v5212_v12 = vpop.eup %5211 }
 0x8c5   : > { %v5923_v0 = vpop.f32.mrb[46].mxu0  ;;  %v2000_v3 = vsel %vm865_vm3, %v1973_v36, -inf  ;;  %v1699_v11 = vpack.c.bf16 %v1693_v43, %v1692_v1  ;;  %v5214_v30 = vpop.eup %5213  ;;  %v1697_v5 = vmul.f32 %v5212_v12, %v5859_v32 }
 0x8c6   : > { %v5928_v53 = vpop.f32.mrb[47].mxu0  ;;  %2001 = vmax.xlane.f32.xlu1 %v2000_v3  ;;  %1998 = vmax.xlane.f32.xlu0 %v1997_v51  ;;  %v1700_v4 = vpack.c.bf16 %v1695_v54, %v1694_v59  ;;  %v2009_v61 = vsel %vm865_vm3, %v5923_v0, -inf  ;;  %v1696_v42 = vmul.f32 %v5214_v30, %v5851_v31 }
 0x8c7   : > { %4704 = vmatpush3.bf16.msra.mxu1 %v1709_v34  ;;  %v2003_v60 = vsel %vm865_vm3, %v5928_v53, -inf }
 0x8c8   : > { %v1701_v8 = vpack.c.bf16 %v1697_v5, %v1696_v42  ;;  %5032 = vmatprep.subr.msk.bf16.mxu1 %vm394_vm0, %v746_v9 }
 0x8ca   : > { %2007 = vmax.xlane.f32.xlu1 %v2006_v33  ;;  %2004 = vmax.xlane.f32.xlu0 %v2003_v60 }
 0x8cb   : > { %4706 = vmatmul.mubr.msk.bf16.vlgmr.msra.gmra.mrb[32].mxu1 %vm865_vm3, %v1699_v11 }
 0x8cc   : > { %4709 = vmatprep.mubr.msk.bf16.mxu1 %vm865_vm3, %v1700_v4  ;;  %4714 = vmatpush3.bf16.msra.mxu1 %v1808_v18 }
 0x8ce   : > { %2010 = vmax.xlane.f32.xlu0 %v2009_v61 }
 0x8d3   : > { %4710 = vmatmul.mubr.msk.bf16.gmra.mrb[36].mxu1 %vm865_vm3, %v1701_v8 }
 0x8db   : > { %2080 = vrot.lane.b32.xlu1 %v5529_v58, %s5393_s16 }
 0x8df   : > { %2082 = vrot.lane.b32.xlu1 %v5527_v55, %s5393_s16 }
 0x94b   : > { %v1990_v31 = vpop.xlane.xlu0 %1989 }
 0x94c   : > { %v2012_v32 = vsub.f32 %v5903_v50, %v1990_v31 }
 0x94d   : > { %v1993_v14 = vpop.xlane.xlu1 %1992 }
 0x94e   : > { %v2020_v20 = vmul.f32 1.442695, %v2012_v32  ;;  %v2013_v21 = vsub.f32 %v5910_v48, %v1993_v14 }
 0x94f   : > { %v1996_v62 = vpop.xlane.xlu0 %1995 }
 0x950   : > { %v2014_v17 = vsub.f32 %v5901_v46, %v1996_v62  ;;  %v2022_v28 = vmul.f32 1.442695, %v2013_v21 }
 0x952   : > { %v2024_v15 = vmul.f32 1.442695, %v2014_v17 }
 0x953   : > { %v2002_v58 = vpop.xlane.xlu1 %2001  ;;  %v1999_v19 = vpop.xlane.xlu0 %1998 }
 0x954   : > { %5215 = vpow2.f32 %v2024_v15  ;;  %v2015_v16 = vsub.f32 %v5905_v44, %v1999_v19  ;;  %v2016_v50 = vsub.f32 %v1973_v36, %v2002_v58 }
 0x955   : > { %5217 = vpow2.f32 %v2020_v20 }
 0x956   : > { %v2026_v22 = vmul.f32 1.442695, %v2015_v16  ;;  %v2028_v48 = vmul.f32 1.442695, %v2016_v50  ;;  %v747_v50 = vld [vmem:[%s6585_s7 + $0xc] sm:$0xf] }
 0x957   : > { %v2008_v55 = vpop.xlane.xlu1 %2007  ;;  %v2005_v29 = vpop.xlane.xlu0 %2004 }
 0x958   : > { %v2018_v49 = vsub.f32 %v4737_v2, %v2008_v55  ;;  %5219 = vpow2.f32 %v2026_v22  ;;  %v2017_v6 = vsub.f32 %v5928_v53, %v2005_v29 }
 0x959   : > { %5221 = vpow2.f32 %v2022_v28 }
 0x95a   : > { %v2032_v35 = vmul.f32 1.442695, %v2018_v49  ;;  %v2030_v23 = vmul.f32 1.442695, %v2017_v6 }
 0x95b   : > { %v2081_v46 = vpop.permute.xlu1 %2080  ;;  %v2011_v45 = vpop.xlane.xlu0 %2010 }
 0x95c   : > { %4739 = vmatprep.subr.bf16.mxu1 %v2081_v46  ;;  %5223 = vpow2.f32 %v2032_v35  ;;  %v2019_v52 = vsub.f32 %v5923_v0, %v2011_v45 }
 0x95d   : > { %5225 = vpow2.f32 %v2028_v48 }
 0x95e   : > { %v5956_v47 = vpop.eup %5215  ;;  %v2034_v13 = vmul.f32 1.442695, %v2019_v52  ;;  %v2186_v52 = vsel %vm394_vm0, %v747_v50, 0 }
 0x95f   : > { %v2042_v44 = vsel %vm865_vm3, %v5956_v47, 0.0  ;;  %v5961_v56 = vpop.eup %5217  ;;  %v2083_v30 = vpop.permute.xlu1 %2082 }
 0x960   : > { %2043 = vadd.xlane.f32.xlu1 %v2042_v44  ;;  %v2036_v63 = vsel %vm865_vm3, %v5961_v56, 0.0  ;;  %5227 = vpow2.f32 %v2034_v13 }
 0x961   : > { %5229 = vpow2.f32 %v2030_v23 }
 0x962   : > { %v5963_v57 = vpop.eup %5219 }
 0x963   : > { %v2045_v34 = vsel %vm865_vm3, %v5963_v57, 0.0  ;;  %v5222_v2 = vpop.eup %5221 }
 0x964   : > { %2037 = vadd.xlane.f32.xlu1 %v2036_v63  ;;  %2046 = vadd.xlane.f32.xlu0 %v2045_v34  ;;  %v2039_v36 = vsel %vm865_vm3, %v5222_v2, 0.0 }
 0x966   : > { %v5971_v37 = vpop.eup %5223 }
 0x967   : > { %v2054_v43 = vsel %vm865_vm3, %v5971_v37, 0.0  ;;  %v5975_v0 = vpop.eup %5225 }
 0x968   : > { %2040 = vadd.xlane.f32.xlu0 %v2039_v36  ;;  %v2048_v3 = vsel %vm865_vm3, %v5975_v0, 0.0 }
 0x96a   : > { %v5979_v51 = vpop.eup %5227 }
 0x96b   : > { %v2057_v53 = vsel %vm865_vm3, %v5979_v51, 0.0  ;;  %v5983_v54 = vpop.eup %5229 }
 0x96c   : > { %2055 = vadd.xlane.f32.xlu0 %v2054_v43  ;;  %v2051_v1 = vsel %vm865_vm3, %v5983_v54, 0.0 }
 0x970   : > { %2049 = vadd.xlane.f32.xlu0 %v2048_v3 }
 0x974   : > { %2058 = vadd.xlane.f32.xlu0 %v2057_v53 }
 0x975   : > { %2086 = vrot.lane.b32.xlu1 %v5541_v7, %s5393_s16 }
 0x978   : > { %2052 = vadd.xlane.f32.xlu0 %v2051_v1 }
 0x98e   : > { %2084 = vrot.lane.b32.xlu0 %v5543_v10, %s5393_s16 }
 0x99e   : > { %v4707_v59 = vpop.f32.mrb[32].mxu1 }
 0x99f   : > { %v1760_v11 = vpop.f32.mrb[33].mxu1 }
 0x9a0   : > { %v4708_v33 = vpop.f32.mrb[34].mxu1 }
 0x9a1   : > { %v1792_v60 = vpack.c.bf16 %v4708_v33, %v4707_v59  ;;  %v1763_v12 = vpop.f32.mrb[35].mxu1  ;;  %v5082_v33 = vld [vmem:[%s6587_s9 + $0x8] sm:$0xff]  }
 0x9a2   : > { %v1791_v4 = vpack.c.bf16 %v1763_v12, %v1760_v11  ;;  %v4273_v12 = vld [vmem:[%s6586_s8] ss:$0 sm:$0xff] }
 0x9a4   : > { %4715 = vmatprep.mubr.msk.bf16.mxu1 %vm381_vm1, %v1791_v4 }
 0x9a5   : > { %4716 = vmatmul.mubr.msk.bf16.vlgmr.msra.gmra.mrb[24].mxu1 %vm381_vm1, %v1792_v60  ;;  %v5083_v60 = vld [vmem:[%s6583_s5 + $0x10] sm:$0xff]  }
 0x9a6   : > { %4740 = vmatpush3.bf16.msra.mxu1 %v2081_v46  ;;  %v4711_v7 = vpop.f32.mrb[36].mxu1 }
 0x9a7   : > { %4741 = vmatprep.subr.bf16.mxu1 %v2083_v30  ;;  %v1776_v61 = vpop.f32.mrb[37].mxu1 }
 0x9a8   : > { %v4712_v5 = vpop.f32.mrb[38].mxu1 }
 0x9a9   : > { %v1794_v42 = vpack.c.bf16 %v4712_v5, %v4711_v7  ;;  %v1779_v8 = vpop.f32.mrb[39].mxu1 }
 0x9aa   : > { %v1793_v9 = vpack.c.bf16 %v1779_v8, %v1776_v61  ;;  %4742 = vmatpush3.bf16.msra.mxu1 %v2083_v30 }
 0x9ac   : > { %4719 = vmatprep.mubr.msk.bf16.mxu1 %vm381_vm1, %v1793_v9 }
 0x9ad   : > { %4720 = vmatmul.mubr.msk.bf16.gmra.mrb[28].mxu1 %vm381_vm1, %v1794_v42 }
 0x9ed   : > { %v2044_v10 = vpop.xlane.xlu1 %2043 }
 0x9f1   : > { %v2038_v18 = vpop.xlane.xlu1 %2037  ;;  %v2047_v31 = vpop.xlane.xlu0 %2046 }
 0x9f2   : > { %5231 = vrcp.f32 %v2038_v18 }
 0x9f5   : > { %v2041_v32 = vpop.xlane.xlu0 %2040  ;;  %v2087_v29 = vpop.permute.xlu1 %2086 }
 0x9f6   : > { %5233 = vrcp.f32 %v2041_v32 }
 0x9f7   : > { %5235 = vrcp.f32 %v2047_v31 }
 0x9f8   : > { %5237 = vrcp.f32 %v2044_v10 }
 0x9f9   : > { %v2056_v14 = vpop.xlane.xlu0 %2055 }
 0x9fc   : > { %v5232_v17 = vpop.eup %5231 }
 0x9fd   : > { %v2050_v62 = vpop.xlane.xlu0 %2049  ;;  %v2068_v21 = vmul.f32 %v5232_v17, %v5961_v56 }
 0x9fe   : > { %5239 = vrcp.f32 %v2050_v62 }
 0xa00   : > { %v5234_v20 = vpop.eup %5233 }
 0xa01   : > { %v2059_v15 = vpop.xlane.xlu0 %2058  ;;  %v2069_v58 = vmul.f32 %v5234_v20, %v5222_v2  ;;  %v5236_v22 = vpop.eup %5235  ;;  %v5081_v2 = vld [vmem:[%s6587_s9] sm:$0xff]  }
 0xa02   : > { %v5238_v55 = vpop.eup %5237  ;;  %v2071_v49 = vmul.f32 %v5236_v22, %v5963_v57  ;;  %4765 = vmatprep.subr.bf16.mxu0 %v5081_v2 }
 0xa03   : > { %v2076_v19 = vpack.c.bf16 %v2069_v58, %v2068_v21  ;;  %v2070_v46 = vmul.f32 %v5238_v55, %v5956_v47  ;;  %4766 = vmatpush3.bf16.msra.mxu0 %v5081_v2 }
 0xa04   : > { %4767 = vmatprep.subr.bf16.mxu0 %v5082_v33 }
 0xa05   : > { %4747 = vmatprep.mubr.msk.bf16.mxu1 %vm865_vm3, %v2076_v19  ;;  %v2053_v16 = vpop.xlane.xlu0 %2052  ;;  %v2077_v48 = vpack.c.bf16 %v2071_v49, %v2070_v46 }
 0xa06   : > { %5241 = vrcp.f32 %v2053_v16 }
 0xa07   : > { %5243 = vrcp.f32 %v2059_v15  ;;  %4768 = vmatpush3.bf16.msra.mxu0 %v5082_v33 }
 0xa08   : > { %5245 = vrcp.f32 %v2056_v14  ;;  %v5240_v35 = vpop.eup %5239  ;;  %4777 = vmatprep.subr.bf16.mxu0 %v5083_v60 }
 0xa09   : > { %v2085_v28 = vpop.permute.xlu0 %2084  ;;  %v2072_v56 = vmul.f32 %v5240_v35, %v5975_v0 }
 0xa0a   : > { %4743 = vmatprep.subr.bf16.mxu1 %v2085_v28 }
 0xa0b   : > { %4744 = vmatpush3.bf16.msra.mxu1 %v2085_v28 }
 0xa0c   : > { %4745 = vmatprep.subr.bf16.mxu1 %v2087_v29 }
 0xa0f   : > { %4746 = vmatpush3.bf16.msra.mxu1 %v2087_v29  ;;  %v5084_v29 = vld [vmem:[%s6583_s5 + $0x18] sm:$0xff]  }
 0xa10   : > { %v5242_v45 = vpop.eup %5241  ;;  %5037 = vmatprep.subr.msk.bf16.mxu1 %vm394_vm0, %v747_v50 }
 0xa11   : > { %v5244_v44 = vpop.eup %5243  ;;  %v2073_v57 = vmul.f32 %v5242_v45, %v5983_v54 }
 0xa12   : > { %4748 = vmatmul.mubr.msk.bf16.vlgmr.msra.gmra.mrb[40].mxu1 %vm865_vm3, %v2077_v48  ;;  %v5246_v6 = vpop.eup %5245  ;;  %v2075_v63 = vmul.f32 %v5244_v44, %v5979_v51 }
 0xa13   : > { %v2078_v13 = vpack.c.bf16 %v2073_v57, %v2072_v56  ;;  %4756 = vmatpush3.bf16.msra.mxu1 %v2186_v52  ;;  %v2074_v47 = vmul.f32 %v5246_v6, %v5971_v37 }
 0xa15   : > { %4751 = vmatprep.mubr.msk.bf16.mxu1 %vm865_vm3, %v2078_v13  ;;  %v2079_v34 = vpack.c.bf16 %v2075_v63, %v2074_v47 }
 0xa1a   : > { %4752 = vmatmul.mubr.msk.bf16.gmra.mrb[44].mxu1 %vm865_vm3, %v2079_v34 }
 0xae5   : > { %v4749_v23 = vpop.f32.mrb[40].mxu1 }
 0xae6   : > { %v2138_v36 = vpop.f32.mrb[41].mxu1 }
 0xae7   : > { %v4750_v43 = vpop.f32.mrb[42].mxu1 }
 0xae8   : > { %v2170_v0 = vpack.c.bf16 %v4750_v43, %v4749_v23  ;;  %v2141_v3 = vpop.f32.mrb[43].mxu1  ;;  %v4285_v23 = vld [vmem:[%s6584_s6 + $0x1] ss:$0 sm:$0xff] }
 0xae9   : > { %v2169_v53 = vpack.c.bf16 %v2141_v3, %v2138_v36 }
 0xaeb   : > { %4757 = vmatprep.mubr.msk.bf16.mxu1 %vm381_vm1, %v2169_v53 }
 0xaec   : > { %4758 = vmatmul.mubr.msk.bf16.vlgmr.msra.gmra.mrb[24].mxu1 %vm381_vm1, %v2170_v0 }
 0xaed   : > { %v4753_v37 = vpop.f32.mrb[44].mxu1 }
 0xaee   : > { %v2154_v51 = vpop.f32.mrb[45].mxu1 }
 0xaef   : > { %v4754_v54 = vpop.f32.mrb[46].mxu1 }
 0xaf0   : > { %v2172_v1 = vpack.c.bf16 %v4754_v54, %v4753_v37  ;;  %v2157_v59 = vpop.f32.mrb[47].mxu1 }
 0xaf1   : > { %v2171_v11 = vpack.c.bf16 %v2157_v59, %v2154_v51 }
 0xaf3   : > { %4761 = vmatprep.mubr.msk.bf16.mxu1 %vm381_vm1, %v2171_v11 }
 0xaf4   : > { %4762 = vmatmul.mubr.msk.bf16.gmra.mrb[28].mxu1 %vm381_vm1, %v2172_v1 }
 0xbbf   : > { %v4759_v4 = vpop.f32.mrb[24].mxu1 }
 0xbc0   : > { %v2222_v30 = vpop.f32.mrb[25].mxu1  ;;  %v2270_v5 = vadd.f32 %v4759_v4, %v4273_v12 }
 0xbc1   : > { %v2268_v7 = vadd.f32 %v4273_v12, %v2222_v30  ;;  %v4760_v61 = vpop.f32.mrb[26].mxu1 }
 0xbc2   : > { %v2271_v42 = vadd.f32 %v4760_v61, %v4273_v12  ;;  %v2225_v8 = vpop.f32.mrb[27].mxu1  ;;  %v2278_v32 = vadd.f32 %v2270_v5, %v5502_v27 }
 0xbc3   : > { %v2269_v9 = vadd.f32 %v4273_v12, %v2225_v8  ;;  %v2276_v18 = vadd.f32 %v2268_v7, %v5498_v25 }
 0xbc4   : > { %v2279_v10 = vadd.f32 %v2271_v42, %v5496_v24 }
 0xbc5   : > { %v2277_v31 = vadd.f32 %v2269_v9, %v5500_v26 }
 0xbc6   : > { %v2285_v17 = vpack.c.bf16 %v2279_v10, %v2278_v32 }
 0xbc7   : > { %v2284_v14 = vpack.c.bf16 %v2277_v31, %v2276_v18  ;;  %v4763_v62 = vpop.f32.mrb[28].mxu1 }
 0xbc8   : > { %v2238_v20 = vpop.f32.mrb[29].mxu1  ;;  %v2274_v58 = vadd.f32 %v4763_v62, %v4273_v12 }
 0xbc9   : > { %v2272_v15 = vadd.f32 %v4273_v12, %v2238_v20  ;;  %v4764_v21 = vpop.f32.mrb[30].mxu1  ;;  %4769 = vmatprep.mubr.msk.bf16.mxu0 %vm539_vm2, %v2284_v14 }
 0xbca   : > { %v2275_v19 = vadd.f32 %v4764_v21, %v4273_v12  ;;  %v2241_v16 = vpop.f32.mrb[31].mxu1  ;;  %4770 = vmatmul.mubr.msk.bf16.vlgmr.msra.gmra.mrb[48].mxu0 %vm539_vm2, %v2285_v17  ;;  %v2282_v22 = vadd.f32 %v2274_v58, %v5516_v41 }
 0xbcb   : > { %v2273_v24 = vadd.f32 %v4273_v12, %v2241_v16  ;;  %4778 = vmatpush3.bf16.msra.mxu0 %v5083_v60  ;;  %v2280_v26 = vadd.f32 %v2272_v15, %v5512_v39 }
 0xbcc   : > { %v2283_v25 = vadd.f32 %v2275_v19, %v5510_v38  ;;  %4779 = vmatprep.subr.bf16.mxu0 %v5084_v29 }
 0xbcd   : > { %v2281_v27 = vadd.f32 %v2273_v24, %v5514_v40 }
 0xbce   : > { %v2287_v55 = vpack.c.bf16 %v2283_v25, %v2282_v22 }
 0xbcf   : > { %v2286_v28 = vpack.c.bf16 %v2281_v27, %v2280_v26  ;;  %4780 = vmatpush3.bf16.msra.mxu0 %v5084_v29 }
 0xbd1   : > { %4773 = vmatprep.mubr.msk.bf16.mxu0 %vm539_vm2, %v2286_v28 }
 0xbd2   : > { %4774 = vmatmul.mubr.msk.bf16.gmra.mrb[52].mxu0 %vm539_vm2, %v2287_v55 }
 0xc9d   : > { %v4771_v49 = vpop.f32.mrb[48].mxu0 }
 0xc9e   : > { %v2350_v38 = vpop.f32.mrb[49].mxu0  ;;  %v6048_v46 = vadd.f32 %v4771_v49, %v2278_v32 }
 0xc9f   : > { %v4772_v50 = vpop.f32.mrb[50].mxu0  ;;  %v6044_v35 = vadd.f32 %v2350_v38, %v2276_v18 }
 0xca0   : > { %v6042_v39 = vadd.f32 %v4772_v50, %v2279_v10  ;;  %v2353_v40 = vpop.f32.mrb[51].mxu0 }
 0xca1   : > { %v6046_v41 = vadd.f32 %v2353_v40, %v2277_v31 }
 0xca2   : > { %v2382_v48 = vpack.c.bf16 %v6042_v39, %v6048_v46 }
 0xca3   : > { %v2381_v45 = vpack.c.bf16 %v6046_v41, %v6044_v35 }
 0xca5   : > { %v4775_v52 = vpop.f32.mrb[52].mxu0  ;;  %4781 = vmatprep.mubr.msk.bf16.mxu0 %vm539_vm2, %v2381_v45 }
 0xca6   : > { %v2366_v44 = vpop.f32.mrb[53].mxu0  ;;  %4782 = vmatmul.mubr.msk.bf16.vlgmr.msra.gmra.mrb[56].mxu0 %vm539_vm2, %v2382_v48  ;;  %v6062_v47 = vadd.f32 %v4775_v52, %v2282_v22 }
 0xca7   : > { %v4776_v56 = vpop.f32.mrb[54].mxu0  ;;  %v6058_v13 = vadd.f32 %v2366_v44, %v2280_v26 }
 0xca8   : > { %v6056_v57 = vadd.f32 %v4776_v56, %v2283_v25  ;;  %v2369_v6 = vpop.f32.mrb[55].mxu0 }
 0xca9   : > { %v6060_v63 = vadd.f32 %v2369_v6, %v2281_v27 }
 0xcaa   : > { %v2384_v2 = vpack.c.bf16 %v6056_v57, %v6062_v47 }
 0xcab   : > { %v2383_v34 = vpack.c.bf16 %v6060_v63, %v6058_v13 }
 0xcad   : > { %4785 = vmatprep.mubr.msk.bf16.mxu0 %vm539_vm2, %v2383_v34 }
 0xcae   : > { %4786 = vmatmul.mubr.msk.bf16.gmra.mrb[60].mxu0 %vm539_vm2, %v2384_v2 }
 0xd79   : > { %v4783_v36 = vpop.f32.mrb[56].mxu0 }
 0xd7a   : > { %v2465_v43 = vadd.f32 %v4783_v36, %v4285_v23  ;;  %v2456_v0 = vpop.f32.mrb[57].mxu0 }
 0xd7b   : > { %v2457_v3 = vadd.f32 %v4285_v23, %v2456_v0  ;;  %v4784_v53 = vpop.f32.mrb[58].mxu0 }
 0xd7c   : > { %v2468_v37 = vadd.f32 %v4784_v53, %v4285_v23  ;;  %v2459_v51 = vpop.f32.mrb[59].mxu0  ;;  %v2494_v1 = vmul.f32 0.35355338, %v2465_v43 }
 0xd7d   : > { %v2460_v54 = vadd.f32 %v4285_v23, %v2459_v51  ;;  %v2492_v33 = vmul.f32 0.35355338, %v2457_v3 }
 0xd7e   : > { %v2495_v59 = vmul.f32 0.35355338, %v2468_v37  ;;  %v6073_v11 = vpack.c.bf16 %v2468_v37, %v2465_v43 }
 0xd7f   : > { %v2493_v60 = vmul.f32 0.35355338, %v2460_v54  ;;  %v6075_v12 = vpack.c.bf16 %v2460_v54, %v2457_v3 }
 0xd80   : > { %v6077_v4 = vpack.c.bf16 %v2495_v59, %v2494_v1 }
 0xd81   : > { %v6079_v30 = vpack.c.bf16 %v2493_v60, %v2492_v33  ;;  %2512 = vrot.lane.b32.xlu1 %v6075_v12, %s5383_s18  ;;  %v4787_v7 = vpop.f32.mrb[60].mxu0 }
 0xd82   : > { %v2481_v61 = vadd.f32 %v4787_v7, %v4285_v23  ;;  %v2472_v5 = vpop.f32.mrb[61].mxu0 }
 0xd83   : > { %v2473_v42 = vadd.f32 %v4285_v23, %v2472_v5  ;;  %v4788_v8 = vpop.f32.mrb[62].mxu0  ;;  %4797 = vmatprep.mubr.msk.bf16.mxu1 %vm381_vm1, %v6079_v30 }
 0xd84   : > { %v2484_v9 = vadd.f32 %v4788_v8, %v4285_v23  ;;  %v2475_v10 = vpop.f32.mrb[63].mxu0  ;;  %v2498_v31 = vmul.f32 0.35355338, %v2481_v61 }
 0xd85   : > { %v2476_v18 = vadd.f32 %v4285_v23, %v2475_v10  ;;  %2514 = vrot.lane.b32.xlu1 %v6073_v11, %s5383_s18  ;;  %v2496_v62 = vmul.f32 0.35355338, %v2473_v42 }
 0xd86   : > { %v2499_v32 = vmul.f32 0.35355338, %v2484_v9  ;;  %v6087_v14 = vpack.c.bf16 %v2484_v9, %v2481_v61 }
 0xd87   : > { %v2497_v17 = vmul.f32 0.35355338, %v2476_v18  ;;  %v6089_v20 = vpack.c.bf16 %v2476_v18, %v2473_v42 }
 0xd88   : > { %v6091_v15 = vpack.c.bf16 %v2499_v32, %v2498_v31 }
 0xd89   : > { %v6093_v21 = vpack.c.bf16 %v2497_v17, %v2496_v62  ;;  %2516 = vrot.lane.b32.xlu1 %v6089_v20, %s5383_s18 }
 0xd8d   : > { %2518 = vrot.lane.b32.xlu1 %v6087_v14, %s5383_s18 }
 0xdf3   : > { %v2513_v58 = vpop.permute.xlu1 %2512 }
 0xdf4   : > { %5038 = vmatprep.subr.msk.bf16.mxu1 %vm381_vm1, %v2513_v58  ;;  %v2533_v19 = vsel %vm381_vm1, %v2513_v58, 0 }
 0xdf5   : > { %4790 = vmatpush3.bf16.xpose.msra.mxu1 %v2533_v19 }
 0xdf7   : > { %v2515_v16 = vpop.permute.xlu1 %2514 }
 0xdf8   : > { %5039 = vmatprep.subr.msk.bf16.mxu1 %vm381_vm1, %v2515_v16  ;;  %v2536_v24 = vsel %vm381_vm1, %v2515_v16, 0 }
 0xdfb   : > { %v2517_v25 = vpop.permute.xlu1 %2516 }
 0xdfc   : > { %v2539_v26 = vsel %vm381_vm1, %v2517_v25, 0 }
 0xdfd   : > { %4792 = vmatpush3.bf16.xpose.msra.mxu1 %v2536_v24 }
 0xdfe   : > { %5040 = vmatprep.subr.msk.bf16.mxu1 %vm381_vm1, %v2517_v25 }
 0xdff   : > { %v2519_v27 = vpop.permute.xlu1 %2518 }
 0xe00   : > { %v2542_v22 = vsel %vm381_vm1, %v2519_v27, 0 }
 0xe05   : > { %4794 = vmatpush3.bf16.xpose.msra.mxu1 %v2539_v26 }
 0xe06   : > { %5041 = vmatprep.subr.msk.bf16.mxu1 %vm381_vm1, %v2519_v27 }
 0xe0d   : > { %4796 = vmatpush3.bf16.xpose.msra.mxu1 %v2542_v22 }
 0xe14   : > { %4798 = vmatmul.mubr.msk.bf16.vlgmr.msra.gmra.mrb[48].mxu1 %vm381_vm1, %v6077_v4 }
 0xe15   : > { %4801 = vmatprep.mubr.msk.bf16.mxu1 %vm381_vm1, %v6093_v21 }
 0xe1c   : > { %4802 = vmatmul.mubr.msk.bf16.gmra.mrb[52].mxu1 %vm381_vm1, %v6091_v15 }
 0xee7   : > { %v4799_v28 = vpop.f32.mrb[48].mxu1 }
 0xee8   : > { %v2578_v55 = vpop.f32.mrb[49].mxu1  ;;  %v2615_v29 = vsel %vm865_vm3, %v4799_v28, -inf }
 0xee9   : > { %2616 = vmax.xlane.f32.xlu0 %v2615_v29  ;;  %v4800_v49 = vpop.f32.mrb[50].mxu1  ;;  %v2609_v40 = vsel %vm865_vm3, %v2578_v55, -inf }
 0xeea   : > { %v2581_v38 = vpop.f32.mrb[51].mxu1  ;;  %v2618_v52 = vsel %vm865_vm3, %v4800_v49, -inf }
 0xeeb   : > { %v2612_v50 = vsel %vm865_vm3, %v2581_v38, -inf }
 0xeec   : > { %2613 = vmax.xlane.f32.xlu1 %v2612_v50 }
 0xeed   : > { %2610 = vmax.xlane.f32.xlu0 %v2609_v40 }
 0xeef   : > { %v4803_v45 = vpop.f32.mrb[52].mxu1 }
 0xef0   : > { %v2594_v48 = vpop.f32.mrb[53].mxu1  ;;  %v2627_v44 = vsel %vm865_vm3, %v4803_v45, -inf }
 0xef1   : > { %2619 = vmax.xlane.f32.xlu0 %v2618_v52  ;;  %2628 = vmax.xlane.f32.xlu1 %v2627_v44  ;;  %v4804_v56 = vpop.f32.mrb[54].mxu1  ;;  %v2621_v2 = vsel %vm865_vm3, %v2594_v48, -inf }
 0xef2   : > { %v6118_v6 = vpop.f32.mrb[55].mxu1  ;;  %v2630_v23 = vsel %vm865_vm3, %v4804_v56, -inf }
 0xef3   : > { %v2624_v34 = vsel %vm865_vm3, %v6118_v6, -inf }
 0xef5   : > { %2622 = vmax.xlane.f32.xlu1 %v2621_v2  ;;  %2625 = vmax.xlane.f32.xlu0 %v2624_v34 }
 0xef9   : > { %2631 = vmax.xlane.f32.xlu0 %v2630_v23 }
 0xf06   : > { %2701 = vrot.lane.b32.xlu1 %v6075_v12, %s5384_s19 }
 0xf0a   : > { %2705 = vrot.lane.b32.xlu1 %v6089_v20, %s5384_s19 }
 0xf0e   : > { %2707 = vrot.lane.b32.xlu1 %v6087_v14, %s5384_s19 }
 0xf0f   : > { %2703 = vrot.lane.b32.xlu0 %v6073_v11, %s5384_s19 }
 0xf12   : > { %2806 = vrot.lane.b32.xlu1 %v6075_v12, %s5385_s20 }
 0xf76   : > { %v2617_v36 = vpop.xlane.xlu0 %2616 }
 0xf77   : > { %v2635_v43 = vsub.f32 %v4799_v28, %v2617_v36 }
 0xf79   : > { %v2645_v0 = vmul.f32 1.442695, %v2635_v43  ;;  %v2614_v3 = vpop.xlane.xlu1 %2613 }
 0xf7a   : > { %v2611_v53 = vpop.xlane.xlu0 %2610  ;;  %v2634_v51 = vsub.f32 %v2581_v38, %v2614_v3 }
 0xf7b   : > { %5247 = vpow2.f32 %v2645_v0  ;;  %v2633_v37 = vsub.f32 %v2578_v55, %v2611_v53 }
 0xf7c   : > { %v2643_v60 = vmul.f32 1.442695, %v2634_v51 }
 0xf7d   : > { %v2641_v54 = vmul.f32 1.442695, %v2633_v37 }
 0xf7e   : > { %v2620_v1 = vpop.xlane.xlu0 %2619  ;;  %v2629_v59 = vpop.xlane.xlu1 %2628 }
 0xf7f   : > { %5249 = vpow2.f32 %v2641_v54  ;;  %v2636_v33 = vsub.f32 %v4800_v49, %v2620_v1  ;;  %v2639_v61 = vsub.f32 %v4803_v45, %v2629_v59 }
 0xf81   : > { %v2647_v7 = vmul.f32 1.442695, %v2636_v33  ;;  %v2653_v9 = vmul.f32 1.442695, %v2639_v61 }
 0xf82   : > { %v2623_v5 = vpop.xlane.xlu1 %2622  ;;  %v2626_v42 = vpop.xlane.xlu0 %2625 }
 0xf83   : > { %5251 = vpow2.f32 %v2647_v7  ;;  %v2637_v10 = vsub.f32 %v2594_v48, %v2623_v5  ;;  %v2638_v52 = vsub.f32 %v6118_v6, %v2626_v42 }
 0xf84   : > { %5253 = vpow2.f32 %v2643_v60 }
 0xf85   : > { %v6134_v8 = vpop.eup %5247  ;;  %5255 = vpow2.f32 %v2653_v9  ;;  %v2649_v17 = vmul.f32 1.442695, %v2637_v10  ;;  %v2651_v44 = vmul.f32 1.442695, %v2638_v52 }
 0xf86   : > { %v2702_v18 = vpop.permute.xlu1 %2701  ;;  %v2632_v31 = vpop.xlane.xlu0 %2631  ;;  %v2663_v32 = vsel %vm865_vm3, %v6134_v8, 0.0 }
 0xf87   : > { %2664 = vadd.xlane.f32.xlu1 %v2663_v32  ;;  %4805 = vmatprep.subr.bf16.mxu0 %v2702_v18  ;;  %v2640_v58 = vsub.f32 %v4804_v56, %v2632_v31  ;;  %5257 = vpow2.f32 %v2649_v17 }
 0xf88   : > { %4806 = vmatpush3.bf16.msra.mxu0 %v2702_v18 }
 0xf89   : > { %v6138_v62 = vpop.eup %5249  ;;  %v2655_v26 = vmul.f32 1.442695, %v2640_v58 }
 0xf8a   : > { %v2706_v19 = vpop.permute.xlu1 %2705  ;;  %v2704_v16 = vpop.permute.xlu0 %2703  ;;  %v2657_v24 = vsel %vm865_vm3, %v6138_v62, 0.0 }
 0xf8b   : > { %2658 = vadd.xlane.f32.xlu1 %v2657_v24  ;;  %4807 = vmatprep.subr.bf16.mxu0 %v2704_v16  ;;  %5259 = vpow2.f32 %v2655_v26 }
 0xf8c   : > { %4808 = vmatpush3.bf16.msra.mxu0 %v2704_v16  ;;  %5261 = vpow2.f32 %v2651_v44 }
 0xf8d   : > { %v5252_v25 = vpop.eup %5251  ;;  %4809 = vmatprep.subr.bf16.mxu0 %v2706_v19 }
 0xf8e   : > { %v2708_v27 = vpop.permute.xlu1 %2707  ;;  %v2666_v22 = vsel %vm865_vm3, %v5252_v25, 0.0  ;;  %v5254_v28 = vpop.eup %5253 }
 0xf8f   : > { %2667 = vadd.xlane.f32.xlu0 %v2666_v22  ;;  %v2660_v55 = vsel %vm865_vm3, %v5254_v28, 0.0  ;;  %v6144_v29 = vpop.eup %5255 }
 0xf90   : > { %4810 = vmatpush3.bf16.msra.mxu0 %v2706_v19  ;;  %v2675_v38 = vsel %vm865_vm3, %v6144_v29, 0.0 }
 0xf91   : > { %4811 = vmatprep.subr.bf16.mxu0 %v2708_v27  ;;  %v6149_v50 = vpop.eup %5257 }
 0xf92   : > { %v2807_v49 = vpop.permute.xlu1 %2806  ;;  %v2669_v40 = vsel %vm865_vm3, %v6149_v50, 0.0 }
 0xf93   : > { %2661 = vadd.xlane.f32.xlu0 %v2660_v55  ;;  %v2827_v42 = vsel %vm381_vm1, %v2807_v49, 0 }
 0xf94   : > { %4812 = vmatpush3.bf16.msra.mxu0 %v2708_v27 }
 0xf95   : > { %5042 = vmatprep.subr.msk.bf16.mxu0 %vm381_vm1, %v2807_v49  ;;  %v6153_v45 = vpop.eup %5259 }
 0xf96   : > { %v2678_v48 = vsel %vm865_vm3, %v6153_v45, 0.0  ;;  %v6164_v56 = vpop.eup %5261 }
 0xf97   : > { %2676 = vadd.xlane.f32.xlu0 %v2675_v38  ;;  %v2672_v34 = vsel %vm865_vm3, %v6164_v56, 0.0 }
 0xf9b   : > { %2670 = vadd.xlane.f32.xlu0 %v2669_v40 }
 0xf9c   : > { %2810 = vrot.lane.b32.xlu1 %v6089_v20, %s5385_s20 }
 0xf9f   : > { %2679 = vadd.xlane.f32.xlu0 %v2678_v48 }
 0xfb5   : > { %2808 = vrot.lane.b32.xlu0 %v6073_v11, %s5385_s20 }
 0xfb9   : > { %2798 = vrot.lane.b32.xlu0 %v6079_v30, %s5386_s21 }
 0xfbd   : > { %2802 = vrot.lane.b32.xlu0 %v6093_v21, %s5386_s21 }
 0xfc0   : > { %2673 = vadd.xlane.f32.xlu1 %v2672_v34 }
 0xfc1   : > { %3256 = vrot.lane.b32.xlu0 %v6075_v12, %s5387_s22 }
 0xfc5   : > { %3260 = vrot.lane.b32.xlu0 %v6089_v20, %s5387_s22 }
 0xfc9   : > { %3248 = vrot.lane.b32.xlu0 %v6079_v30, %s5388_s23 }
 0xfcd   : > { %3252 = vrot.lane.b32.xlu0 %v6093_v21, %s5388_s23 }
 0xfd1   : > { %2812 = vrot.lane.b32.xlu1 %v6087_v14, %s5385_s20 }
 0xfd5   : > { %2800 = vrot.lane.b32.xlu1 %v6077_v4, %s5386_s21 }
 0xfd9   : > { %2804 = vrot.lane.b32.xlu1 %v6091_v15, %s5386_s21 }
 0xfdd   : > { %3258 = vrot.lane.b32.xlu1 %v6073_v11, %s5387_s22 }
 0xfe1   : > { %3262 = vrot.lane.b32.xlu1 %v6087_v14, %s5387_s22 }
 0xfe5   : > { %3250 = vrot.lane.b32.xlu1 %v6077_v4, %s5388_s23 }
 0xfe9   : > { %3254 = vrot.lane.b32.xlu1 %v6091_v15, %s5388_s23 }
0x1014   : > { %v2665_v6 = vpop.xlane.xlu1 %2664 }
0x1018   : > { %v2659_v2 = vpop.xlane.xlu1 %2658 }
0x101c   : > { %v2668_v23 = vpop.xlane.xlu0 %2667  ;;  %v2811_v10 = vpop.permute.xlu1 %2810 }
0x101d   : > { %5263 = vrcp.f32 %v2668_v23 }
0x101e   : > { %5265 = vrcp.f32 %v2659_v2 }
0x101f   : > { %5267 = vrcp.f32 %v2665_v6 }
0x1020   : > { %v2662_v36 = vpop.xlane.xlu0 %2661 }
0x1021   : > { %5269 = vrcp.f32 %v2662_v36 }
0x1024   : > { %v2677_v43 = vpop.xlane.xlu0 %2676 }
0x1027   : > { %v5264_v0 = vpop.eup %5263 }
0x1028   : > { %v2671_v3 = vpop.xlane.xlu0 %2670  ;;  %v5266_v53 = vpop.eup %5265  ;;  %v2692_v54 = vmul.f32 %v5264_v0, %v5252_v25 }
0x1029   : > { %v5268_v37 = vpop.eup %5267  ;;  %v2689_v59 = vmul.f32 %v5266_v53, %v6138_v62 }
0x102a   : > { %v2691_v60 = vmul.f32 %v5268_v37, %v6134_v8  ;;  %v2833_v8 = vsel %vm381_vm1, %v2811_v10, 0 }
0x102b   : > { %v5270_v51 = vpop.eup %5269 }
0x102c   : > { %v2680_v1 = vpop.xlane.xlu0 %2679  ;;  %v2690_v33 = vmul.f32 %v5270_v51, %v5254_v28  ;;  %v2698_v61 = vpack.c.bf16 %v2692_v54, %v2691_v60 }
0x102d   : > { %5271 = vrcp.f32 %v2680_v1 }
0x102e   : > { %v2697_v7 = vpack.c.bf16 %v2690_v33, %v2689_v59  ;;  %5273 = vrcp.f32 %v2671_v3 }
0x102f   : > { %5275 = vrcp.f32 %v2677_v43 }
0x1030   : > { %4813 = vmatprep.mubr.msk.bf16.mxu0 %vm865_vm3, %v2697_v7  ;;  %v2809_v5 = vpop.permute.xlu0 %2808 }
0x1031   : > { %4814 = vmatmul.mubr.msk.bf16.vlgmr.msra.gmra.mrb[64].mxu0 %vm865_vm3, %v2698_v61  ;;  %v2830_v9 = vsel %vm381_vm1, %v2809_v5, 0 }
0x1032   : > { %4822 = vmatpush3.bf16.xpose.msra.mxu0 %v2827_v42 }
0x1033   : > { %5043 = vmatprep.subr.msk.bf16.mxu0 %vm381_vm1, %v2809_v5 }
0x1034   : > { %v2799_v18 = vpop.permute.xlu0 %2798 }
0x1037   : > { %v5272_v19 = vpop.eup %5271 }
0x1038   : > { %v2803_v31 = vpop.permute.xlu0 %2802  ;;  %v5274_v16 = vpop.eup %5273  ;;  %v2696_v26 = vmul.f32 %v5272_v19, %v6153_v45 }
0x1039   : > { %v5276_v24 = vpop.eup %5275  ;;  %v2693_v27 = vmul.f32 %v5274_v16, %v6149_v50 }
0x103a   : > { %4824 = vmatpush3.bf16.xpose.msra.mxu0 %v2830_v9  ;;  %v2695_v28 = vmul.f32 %v5276_v24, %v6144_v29 }
0x103b   : > { %5044 = vmatprep.subr.msk.bf16.mxu0 %vm381_vm1, %v2811_v10 }
0x103c   : > { %v3257_v58 = vpop.permute.xlu0 %3256  ;;  %v2700_v38 = vpack.c.bf16 %v2696_v26, %v2695_v28 }
0x103d   : > { %v3277_v48 = vsel %vm381_vm1, %v3257_v58, 0 }
0x1040   : > { %v3261_v50 = vpop.permute.xlu0 %3260 }
0x1041   : > { %v3283_v44 = vsel %vm381_vm1, %v3261_v50, 0 }
0x1042   : > { %4826 = vmatpush3.bf16.xpose.msra.mxu0 %v2833_v8 }
0x1044   : > { %v3249_v29 = vpop.permute.xlu0 %3248 }
0x1048   : > { %v3253_v2 = vpop.permute.xlu0 %3252 }
0x104d   : > { %v2674_v32 = vpop.xlane.xlu1 %2673 }
0x104e   : > { %5277 = vrcp.f32 %v2674_v32 }
0x1051   : > { %v2813_v62 = vpop.permute.xlu1 %2812 }
0x1052   : > { %v2836_v17 = vsel %vm381_vm1, %v2813_v62, 0  ;;  %5045 = vmatprep.subr.msk.bf16.mxu0 %vm381_vm1, %v2813_v62 }
0x1053   : > { %4828 = vmatpush3.bf16.xpose.msra.mxu0 %v2836_v17 }
0x1054   : > { %5048 = vmatprep.subr.msk.bf16.mxu0 %vm381_vm1, %v3257_v58 }
0x1055   : > { %v2801_v55 = vpop.permute.xlu1 %2800 }
0x1058   : > { %v5278_v25 = vpop.eup %5277 }
0x1059   : > { %v2694_v22 = vmul.f32 %v5278_v25, %v6164_v56  ;;  %v2805_v40 = vpop.permute.xlu1 %2804 }
0x105b   : > { %v2699_v49 = vpack.c.bf16 %v2694_v22, %v2693_v27 }
0x105d   : > { %4817 = vmatprep.mubr.msk.bf16.mxu0 %vm865_vm3, %v2699_v49  ;;  %v3259_v45 = vpop.permute.xlu1 %3258 }
0x105e   : > { %4818 = vmatmul.mubr.msk.bf16.gmra.mrb[68].mxu0 %vm865_vm3, %v2700_v38  ;;  %v3280_v52 = vsel %vm381_vm1, %v3259_v45, 0 }
0x105f   : > { %4829 = vmatprep.mubr.msk.bf16.mxu0 %vm381_vm1, %v2799_v18 }
0x1061   : > { %v3263_v56 = vpop.permute.xlu1 %3262 }
0x1062   : > { %v3286_v34 = vsel %vm381_vm1, %v3263_v56, 0 }
0x1065   : > { %v3251_v6 = vpop.permute.xlu1 %3250 }
0x1066   : > { %4830 = vmatmul.mubr.msk.bf16.vlgmr.msra.gmra.mrb[72].mxu0 %vm381_vm1, %v2801_v55 }
0x1067   : > { %4874 = vmatpush3.bf16.xpose.msra.mxu0 %v3277_v48  ;;  %4833 = vmatprep.mubr.msk.bf16.mxu0 %vm381_vm1, %v2803_v31 }
0x1068   : > { %5049 = vmatprep.subr.msk.bf16.mxu0 %vm381_vm1, %v3259_v45 }
0x1069   : > { %v3255_v23 = vpop.permute.xlu1 %3254 }
0x106e   : > { %4834 = vmatmul.mubr.msk.bf16.gmra.mrb[76].mxu0 %vm381_vm1, %v2805_v40 }
0x106f   : > { %4876 = vmatpush3.bf16.xpose.msra.mxu0 %v3280_v52  ;;  %4881 = vmatprep.mubr.msk.bf16.mxu0 %vm381_vm1, %v3249_v29 }
0x1070   : > { %5050 = vmatprep.subr.msk.bf16.mxu0 %vm381_vm1, %v3261_v50 }
0x1077   : > { %4878 = vmatpush3.bf16.xpose.msra.mxu0 %v3283_v44 }
0x1078   : > { %5051 = vmatprep.subr.msk.bf16.mxu0 %vm381_vm1, %v3263_v56 }
0x107f   : > { %4880 = vmatpush3.bf16.xpose.msra.mxu0 %v3286_v34 }
0x1086   : > { %4882 = vmatmul.mubr.msk.bf16.vlgmr.msra.gmra.mrb[80].mxu0 %vm381_vm1, %v3251_v6 }
0x1087   : > { %4885 = vmatprep.mubr.msk.bf16.mxu0 %vm381_vm1, %v3253_v2 }
0x108e   : > { %4886 = vmatmul.mubr.msk.bf16.gmra.mrb[84].mxu0 %vm381_vm1, %v3255_v23 }
0x1104   : > { %v6225_v36 = vpop.f32.mrb[64].mxu0 }
0x1105   : > { %v6227_v43 = vpop.f32.mrb[65].mxu0 }
0x1106   : > { %v6229_v0 = vpop.f32.mrb[66].mxu0 }
0x1107   : > { %v2791_v3 = vpack.c.bf16 %v6229_v0, %v6225_v36  ;;  %v6233_v53 = vpop.f32.mrb[67].mxu0 }
0x1108   : > { %v2790_v37 = vpack.c.bf16 %v6233_v53, %v6227_v43 }
0x1131   : > { %v6237_v51 = vpop.f32.mrb[68].mxu0 }
0x1132   : > { %v6239_v54 = vpop.f32.mrb[69].mxu0 }
0x1133   : > { %v6241_v1 = vpop.f32.mrb[70].mxu0 }
0x1134   : > { %v2793_v59 = vpack.c.bf16 %v6241_v1, %v6237_v51  ;;  %v6245_v33 = vpop.f32.mrb[71].mxu0 }
0x1135   : > { %v2792_v60 = vpack.c.bf16 %v6245_v33, %v6239_v54 }
0x1139   : > { %v4831_v7 = vpop.f32.mrb[72].mxu0 }
0x113a   : > { %v2872_v61 = vpop.f32.mrb[73].mxu0  ;;  %v2909_v8 = vsel %vm865_vm3, %v4831_v7, -inf }
0x113b   : > { %v4832_v5 = vpop.f32.mrb[74].mxu0  ;;  %v2903_v42 = vsel %vm865_vm3, %v2872_v61, -inf }
0x113c   : > { %2904 = vmax.xlane.f32.xlu0 %v2903_v42  ;;  %v2875_v9 = vpop.f32.mrb[75].mxu0  ;;  %v2912_v62 = vsel %vm865_vm3, %v4832_v5, -inf }
0x113d   : > { %v2906_v10 = vsel %vm865_vm3, %v2875_v9, -inf }
0x113e   : > { %2907 = vmax.xlane.f32.xlu1 %v2906_v10 }
0x1140   : > { %2910 = vmax.xlane.f32.xlu0 %v2909_v8 }
0x1141   : > { %v4835_v18 = vpop.f32.mrb[76].mxu0 }
0x1142   : > { %v2888_v31 = vpop.f32.mrb[77].mxu0  ;;  %v2921_v19 = vsel %vm865_vm3, %v4835_v18, -inf }
0x1143   : > { %v4836_v32 = vpop.f32.mrb[78].mxu0  ;;  %v2915_v17 = vsel %vm865_vm3, %v2888_v31, -inf }
0x1144   : > { %2913 = vmax.xlane.f32.xlu0 %v2912_v62  ;;  %2916 = vmax.xlane.f32.xlu1 %v2915_v17  ;;  %v2891_v58 = vpop.f32.mrb[79].mxu0  ;;  %v2924_v24 = vsel %vm865_vm3, %v4836_v32, -inf }
0x1145   : > { %v2918_v16 = vsel %vm865_vm3, %v2891_v58, -inf }
0x1148   : > { %2922 = vmax.xlane.f32.xlu1 %v2921_v19  ;;  %2919 = vmax.xlane.f32.xlu0 %v2918_v16 }
0x114c   : > { %2925 = vmax.xlane.f32.xlu0 %v2924_v24 }
0x1159   : > { %v6257_v25 = vpop.f32.mrb[80].mxu0  ;;  %2995 = vrot.lane.b32.xlu1 %v6075_v12, %s5389_s24 }
0x115a   : > { %v6261_v26 = vpop.f32.mrb[81].mxu0 }
0x115b   : > { %v6263_v27 = vpop.f32.mrb[82].mxu0 }
0x115c   : > { %v6265_v22 = vpop.f32.mrb[83].mxu0 }
0x1161   : > { %v6267_v28 = vpop.f32.mrb[84].mxu0 }
0x1162   : > { %v6269_v55 = vpop.f32.mrb[85].mxu0 }
0x1163   : > { %v6271_v49 = vpop.f32.mrb[86].mxu0 }
0x1164   : > { %v6273_v38 = vpop.f32.mrb[87].mxu0 }
0x11c9   : > { %v2905_v40 = vpop.xlane.xlu0 %2904 }
0x11ca   : > { %v2927_v48 = vsub.f32 %v2872_v61, %v2905_v40 }
0x11cb   : > { %v2908_v45 = vpop.xlane.xlu1 %2907 }
0x11cc   : > { %v2935_v52 = vmul.f32 1.442695, %v2927_v48  ;;  %v2928_v56 = vsub.f32 %v2875_v9, %v2908_v45 }
0x11cd   : > { %v2911_v50 = vpop.xlane.xlu0 %2910 }
0x11ce   : > { %v2929_v29 = vsub.f32 %v4831_v7, %v2911_v50  ;;  %v2937_v10 = vmul.f32 1.442695, %v2928_v56 }
0x11d0   : > { %v2939_v44 = vmul.f32 1.442695, %v2929_v29 }
0x11d1   : > { %v2917_v34 = vpop.xlane.xlu1 %2916  ;;  %v2914_v6 = vpop.xlane.xlu0 %2913 }
0x11d2   : > { %5279 = vpow2.f32 %v2939_v44  ;;  %v2930_v2 = vsub.f32 %v4832_v5, %v2914_v6  ;;  %v2931_v23 = vsub.f32 %v2888_v31, %v2917_v34 }
0x11d3   : > { %5281 = vpow2.f32 %v2935_v52 }
0x11d4   : > { %v2941_v42 = vmul.f32 1.442695, %v2930_v2  ;;  %v2943_v19 = vmul.f32 1.442695, %v2931_v23 }
0x11d5   : > { %v2923_v8 = vpop.xlane.xlu1 %2922  ;;  %v2920_v62 = vpop.xlane.xlu0 %2919 }
0x11d6   : > { %v2933_v17 = vsub.f32 %v4835_v18, %v2923_v8  ;;  %5283 = vpow2.f32 %v2941_v42  ;;  %v2932_v16 = vsub.f32 %v2891_v58, %v2920_v62  ;;  %v3353_v8 = vsel %vm865_vm3, %v6261_v26, -inf }
0x11d7   : > { %5285 = vpow2.f32 %v2937_v10  ;;  %v3356_v10 = vsel %vm865_vm3, %v6265_v22, -inf  ;;  %v3368_v62 = vsel %vm865_vm3, %v6273_v38, -inf }
0x11d8   : > { %v2947_v61 = vmul.f32 1.442695, %v2933_v17  ;;  %v2945_v31 = vmul.f32 1.442695, %v2932_v16  ;;  %v3374_v17 = vsel %vm865_vm3, %v6271_v49, -inf }
0x11d9   : > { %v2996_v7 = vpop.permute.xlu1 %2995  ;;  %v2926_v24 = vpop.xlane.xlu0 %2925 }
0x11da   : > { %5287 = vpow2.f32 %v2947_v61  ;;  %v2934_v9 = vsub.f32 %v4836_v32, %v2926_v24  ;;  %4837 = vmatprep.subr.bf16.mxu1 %v2996_v7 }
0x11db   : > { %4838 = vmatpush3.bf16.msra.mxu1 %v2996_v7  ;;  %5289 = vpow2.f32 %v2943_v19 }
0x11dc   : > { %v6275_v40 = vpop.eup %5279  ;;  %v2949_v5 = vmul.f32 1.442695, %v2934_v9 }
0x11dd   : > { %v2957_v48 = vsel %vm865_vm3, %v6275_v40, 0.0  ;;  %v6279_v18 = vpop.eup %5281 }
0x11de   : > { %5291 = vpow2.f32 %v2949_v5  ;;  %2958 = vadd.xlane.f32.xlu1 %v2957_v48  ;;  %v2951_v32 = vsel %vm865_vm3, %v6279_v18, 0.0 }
0x11df   : > { %5293 = vpow2.f32 %v2945_v31 }
0x11e0   : > { %v6281_v45 = vpop.eup %5283 }
0x11e1   : > { %v2960_v58 = vsel %vm865_vm3, %v6281_v45, 0.0  ;;  %v6287_v50 = vpop.eup %5285 }
0x11e2   : > { %2952 = vadd.xlane.f32.xlu1 %v2951_v32  ;;  %2961 = vadd.xlane.f32.xlu0 %v2960_v58  ;;  %v2954_v56 = vsel %vm865_vm3, %v6287_v50, 0.0 }
0x11e4   : > { %v6289_v29 = vpop.eup %5287 }
0x11e5   : > { %v2969_v52 = vsel %vm865_vm3, %v6289_v29, 0.0  ;;  %v6293_v44 = vpop.eup %5289 }
0x11e6   : > { %2970 = vadd.xlane.f32.xlu1 %v2969_v52  ;;  %2955 = vadd.xlane.f32.xlu0 %v2954_v56  ;;  %v2963_v6 = vsel %vm865_vm3, %v6293_v44, 0.0 }
0x11e8   : > { %v6297_v34 = vpop.eup %5291 }
0x11e9   : > { %v2972_v2 = vsel %vm865_vm3, %v6297_v34, 0.0  ;;  %v6303_v23 = vpop.eup %5293 }
0x11ea   : > { %2964 = vadd.xlane.f32.xlu1 %v2963_v6  ;;  %2973 = vadd.xlane.f32.xlu0 %v2972_v2  ;;  %v2966_v42 = vsel %vm865_vm3, %v6303_v23, 0.0 }
0x11ee   : > { %2967 = vadd.xlane.f32.xlu0 %v2966_v42 }
0x11fb   : > { %2999 = vrot.lane.b32.xlu1 %v6089_v20, %s5389_s24 }
0x11ff   : > { %3001 = vrot.lane.b32.xlu1 %v6087_v14, %s5389_s24 }
0x1203   : > { %3636 = vrot.lane.b32.xlu1 %v6073_v11, %s5390_s25 }
0x1204   : > { %2997 = vrot.lane.b32.xlu0 %v6073_v11, %s5389_s24 }
0x1207   : > { %3640 = vrot.lane.b32.xlu1 %v6087_v14, %s5390_s25 }
0x1208   : > { %3634 = vrot.lane.b32.xlu0 %v6075_v12, %s5390_s25 }
0x120b   : > { %3628 = vrot.lane.b32.xlu1 %v6077_v4, %s5391_s26  ;;  %v3365_v4 = vsel %vm865_vm3, %v6269_v55, -inf }
0x120c   : > { %3638 = vrot.lane.b32.xlu0 %v6089_v20, %s5390_s25 }
0x120f   : > { %3632 = vrot.lane.b32.xlu1 %v6091_v15, %s5391_s26  ;;  %v3359_v15 = vsel %vm865_vm3, %v6257_v25, -inf }
0x1210   : > { %3626 = vrot.lane.b32.xlu0 %v6079_v30, %s5391_s26  ;;  %v3371_v30 = vsel %vm865_vm3, %v6267_v28, -inf }
0x1214   : > { %3630 = vrot.lane.b32.xlu0 %v6093_v21, %s5391_s26  ;;  %v3362_v21 = vsel %vm865_vm3, %v6263_v27, -inf }
0x1233   : > { %3357 = vmax.xlane.f32.xlu1 %v3356_v10  ;;  %3354 = vmax.xlane.f32.xlu0 %v3353_v8 }
0x1237   : > { %3366 = vmax.xlane.f32.xlu1 %v3365_v4  ;;  %3360 = vmax.xlane.f32.xlu0 %v3359_v15 }
0x123b   : > { %3372 = vmax.xlane.f32.xlu1 %v3371_v30  ;;  %3363 = vmax.xlane.f32.xlu0 %v3362_v21 }
0x123f   : > { %3369 = vmax.xlane.f32.xlu0 %v3368_v62 }
0x1243   : > { %3375 = vmax.xlane.f32.xlu0 %v3374_v17 }
0x124c   : > { %3445 = vrot.lane.b32.xlu1 %v6075_v12, %s5392_s27 }
0x126b   : > { %v2959_v19 = vpop.xlane.xlu1 %2958 }
0x126f   : > { %v2953_v61 = vpop.xlane.xlu1 %2952  ;;  %v2962_v16 = vpop.xlane.xlu0 %2961 }
0x1270   : > { %5295 = vrcp.f32 %v2953_v61 }
0x1273   : > { %v2971_v7 = vpop.xlane.xlu1 %2970  ;;  %v2956_v24 = vpop.xlane.xlu0 %2955 }
0x1274   : > { %5297 = vrcp.f32 %v2956_v24 }
0x1275   : > { %5299 = vrcp.f32 %v2962_v16 }
0x1276   : > { %5301 = vrcp.f32 %v2959_v19 }
0x1277   : > { %v2965_v9 = vpop.xlane.xlu1 %2964  ;;  %v2974_v5 = vpop.xlane.xlu0 %2973 }
0x1278   : > { %5303 = vrcp.f32 %v2965_v9 }
0x127a   : > { %v5296_v32 = vpop.eup %5295 }
0x127b   : > { %v3000_v31 = vpop.permute.xlu1 %2999  ;;  %v2968_v48 = vpop.xlane.xlu0 %2967  ;;  %v2983_v6 = vmul.f32 %v5296_v32, %v6279_v18 }
0x127c   : > { %5305 = vrcp.f32 %v2968_v48 }
0x127d   : > { %5307 = vrcp.f32 %v2974_v5 }
0x127e   : > { %v5298_v58 = vpop.eup %5297  ;;  %5309 = vrcp.f32 %v2971_v7 }
0x127f   : > { %v3002_v52 = vpop.permute.xlu1 %3001  ;;  %v2998_v56 = vpop.permute.xlu0 %2997  ;;  %v2984_v2 = vmul.f32 %v5298_v58, %v6287_v50 }
0x1280   : > { %4839 = vmatprep.subr.bf16.mxu1 %v2998_v56  ;;  %v5300_v10 = vpop.eup %5299 }
0x1281   : > { %4840 = vmatpush3.bf16.msra.mxu1 %v2998_v56  ;;  %v2991_v42 = vpack.c.bf16 %v2984_v2, %v2983_v6  ;;  %v5302_v4 = vpop.eup %5301  ;;  %v2986_v50 = vmul.f32 %v5300_v10, %v6281_v45 }
0x1282   : > { %4841 = vmatprep.subr.bf16.mxu1 %v3000_v31  ;;  %v5304_v30 = vpop.eup %5303  ;;  %v2985_v19 = vmul.f32 %v5302_v4, %v6275_v40 }
0x1283   : > { %4845 = vmatprep.mubr.msk.bf16.mxu1 %vm865_vm3, %v2991_v42  ;;  %v3635_v8 = vpop.permute.xlu0 %3634  ;;  %v3637_v21 = vpop.permute.xlu1 %3636  ;;  %v2987_v61 = vmul.f32 %v5304_v30, %v6293_v44 }
0x1284   : > { %v3655_v15 = vsel %vm381_vm1, %v3635_v8, 0  ;;  %5053 = vmatprep.subr.msk.bf16.mxu0 %vm381_vm1, %v3635_v8  ;;  %v2992_v16 = vpack.c.bf16 %v2986_v50, %v2985_v19  ;;  %v3658_v5 = vsel %vm381_vm1, %v3637_v21, 0 }
0x1285   : > { %4842 = vmatpush3.bf16.msra.mxu1 %v3000_v31  ;;  %4916 = vmatpush3.bf16.xpose.msra.mxu0 %v3655_v15 }
0x1286   : > { %v5306_v18 = vpop.eup %5305  ;;  %4843 = vmatprep.subr.bf16.mxu1 %v3002_v52  ;;  %5054 = vmatprep.subr.msk.bf16.mxu0 %vm381_vm1, %v3637_v21 }
0x1287   : > { %v3639_v62 = vpop.permute.xlu0 %3638  ;;  %v2988_v17 = vmul.f32 %v5306_v18, %v6303_v23  ;;  %v5308_v7 = vpop.eup %5307 }
0x1288   : > { %v5310_v45 = vpop.eup %5309  ;;  %v2990_v40 = vmul.f32 %v5308_v7, %v6297_v34  ;;  %v3661_v31 = vsel %vm381_vm1, %v3639_v62, 0  ;;  %v3641_v48 = vpop.permute.xlu1 %3640 }
0x1289   : > { %4844 = vmatpush3.bf16.msra.mxu1 %v3002_v52  ;;  %v2993_v9 = vpack.c.bf16 %v2988_v17, %v2987_v61  ;;  %v2989_v44 = vmul.f32 %v5310_v45, %v6289_v29  ;;  %v3664_v32 = vsel %vm381_vm1, %v3641_v48, 0 }
0x128b   : > { %v3627_v24 = vpop.permute.xlu0 %3626  ;;  %v2994_v23 = vpack.c.bf16 %v2990_v40, %v2989_v44 }
0x128c   : > { %4846 = vmatmul.mubr.msk.bf16.vlgmr.msra.gmra.mrb[56].mxu1 %vm865_vm3, %v2992_v16  ;;  %4923 = vmatprep.mubr.msk.bf16.mxu0 %vm381_vm1, %v3627_v24  ;;  %v3629_v58 = vpop.permute.xlu1 %3628 }
0x128d   : > { %4849 = vmatprep.mubr.msk.bf16.mxu1 %vm865_vm3, %v2993_v9  ;;  %4918 = vmatpush3.bf16.xpose.msra.mxu0 %v3658_v5 }
0x128e   : > { %5055 = vmatprep.subr.msk.bf16.mxu0 %vm381_vm1, %v3639_v62 }
0x128f   : > { %v3631_v52 = vpop.permute.xlu0 %3630 }
0x1290   : > { %v3633_v34 = vpop.permute.xlu1 %3632 }
0x1294   : > { %4850 = vmatmul.mubr.msk.bf16.gmra.mrb[60].mxu1 %vm865_vm3, %v2994_v23 }
0x1295   : > { %4920 = vmatpush3.bf16.xpose.msra.mxu0 %v3661_v31 }
0x1296   : > { %5056 = vmatprep.subr.msk.bf16.mxu0 %vm381_vm1, %v3641_v48 }
0x129d   : > { %4922 = vmatpush3.bf16.xpose.msra.mxu0 %v3664_v32 }
0x12a4   : > { %4924 = vmatmul.mubr.msk.bf16.vlgmr.msra.gmra.mrb[88].mxu0 %vm381_vm1, %v3629_v58 }
0x12a5   : > { %4927 = vmatprep.mubr.msk.bf16.mxu0 %vm381_vm1, %v3631_v52  ;;  %v4293_v52 = vld [vmem:[%s6585_s7 + $0x14] sm:$0xf] }
0x12a6   : > { %5046 = vmatprep.subr.msk.bf16.mxu1 %vm394_vm0, %v4293_v52 }
0x12ac   : > { %4928 = vmatmul.mubr.msk.bf16.gmra.mrb[92].mxu0 %vm381_vm1, %v3633_v34 }
0x12c0   : > { %v3358_v29 = vpop.xlane.xlu1 %3357  ;;  %v3355_v56 = vpop.xlane.xlu0 %3354 }
0x12c1   : > { %v3377_v6 = vsub.f32 %v6261_v26, %v3355_v56  ;;  %v3378_v8 = vsub.f32 %v6265_v22, %v3358_v29  ;;  %v3101_v29 = vsel %vm394_vm0, %v4293_v52, 0 }
0x12c2   : > { %4854 = vmatpush3.bf16.msra.mxu1 %v3101_v29 }
0x12c3   : > { %v3385_v4 = vmul.f32 1.442695, %v3377_v6  ;;  %v3387_v62 = vmul.f32 1.442695, %v3378_v8  ;;  %v4292_v6 = vld [vmem:[%s6585_s7 + $0x10] sm:$0xf] }
0x12c4   : > { %v3367_v2 = vpop.xlane.xlu1 %3366  ;;  %v3361_v42 = vpop.xlane.xlu0 %3360  ;;  %5047 = vmatprep.subr.msk.bf16.mxu1 %vm394_vm0, %v4292_v6 }
0x12c5   : > { %v3379_v10 = vsub.f32 %v6257_v25, %v3361_v42  ;;  %v3381_v17 = vsub.f32 %v6269_v55, %v3367_v2 }
0x12c7   : > { %v3389_v15 = vmul.f32 1.442695, %v3379_v10  ;;  %v3393_v25 = vmul.f32 1.442695, %v3381_v17 }
0x12c8   : > { %v3373_v30 = vpop.xlane.xlu1 %3372  ;;  %v3364_v18 = vpop.xlane.xlu0 %3363 }
0x12c9   : > { %v3383_v21 = vsub.f32 %v6267_v28, %v3373_v30  ;;  %5311 = vpow2.f32 %v3389_v15  ;;  %v3380_v50 = vsub.f32 %v6263_v27, %v3364_v18  ;;  %v3181_v18 = vsel %vm394_vm0, %v4292_v6, 0 }
0x12ca   : > { %5313 = vpow2.f32 %v3385_v4 }
0x12cb   : > { %v3397_v26 = vmul.f32 1.442695, %v3383_v21  ;;  %v3391_v19 = vmul.f32 1.442695, %v3380_v50 }
0x12cc   : > { %v3370_v61 = vpop.xlane.xlu0 %3369  ;;  %v3446_v2 = vpop.permute.xlu1 %3445 }
0x12cd   : > { %5315 = vpow2.f32 %v3391_v19  ;;  %v3382_v22 = vsub.f32 %v6273_v38, %v3370_v61 }
0x12ce   : > { %5317 = vpow2.f32 %v3387_v62 }
0x12cf   : > { %5319 = vpow2.f32 %v3397_v26  ;;  %v3395_v27 = vmul.f32 1.442695, %v3382_v22 }
0x12d0   : > { %v3376_v16 = vpop.xlane.xlu0 %3375  ;;  %5321 = vpow2.f32 %v3393_v25 }
0x12d1   : > { %v3384_v28 = vsub.f32 %v6271_v49, %v3376_v16 }
0x12d3   : > { %v6379_v7 = vpop.eup %5311  ;;  %v3399_v24 = vmul.f32 1.442695, %v3384_v28 }
0x12d4   : > { %v3407_v55 = vsel %vm865_vm3, %v6379_v7, 0.0  ;;  %v6383_v9 = vpop.eup %5313 }
0x12d5   : > { %5323 = vpow2.f32 %v3399_v24  ;;  %3408 = vadd.xlane.f32.xlu1 %v3407_v55  ;;  %v3401_v49 = vsel %vm865_vm3, %v6383_v9, 0.0 }
0x12d6   : > { %5325 = vpow2.f32 %v3395_v27 }
0x12d7   : > { %v6385_v5 = vpop.eup %5315 }
0x12d8   : > { %v6387_v45 = vpop.eup %5317  ;;  %v3410_v38 = vsel %vm865_vm3, %v6385_v5, 0.0 }
0x12d9   : > { %v6393_v40 = vpop.eup %5319  ;;  %3402 = vadd.xlane.f32.xlu1 %v3401_v49  ;;  %3411 = vadd.xlane.f32.xlu0 %v3410_v38  ;;  %v3404_v23 = vsel %vm865_vm3, %v6387_v45, 0.0 }
0x12da   : > { %v3419_v44 = vsel %vm865_vm3, %v6393_v40, 0.0  ;;  %v6399_v31 = vpop.eup %5321 }
0x12db   : > { %v3413_v32 = vsel %vm865_vm3, %v6399_v31, 0.0 }
0x12dd   : > { %3420 = vadd.xlane.f32.xlu1 %v3419_v44  ;;  %3405 = vadd.xlane.f32.xlu0 %v3404_v23 }
0x12df   : > { %v6401_v48 = vpop.eup %5323 }
0x12e0   : > { %v3422_v58 = vsel %vm865_vm3, %v6401_v48, 0.0  ;;  %v6410_v34 = vpop.eup %5325 }
0x12e1   : > { %3414 = vadd.xlane.f32.xlu1 %v3413_v32  ;;  %3423 = vadd.xlane.f32.xlu0 %v3422_v58  ;;  %v3416_v56 = vsel %vm865_vm3, %v6410_v34, 0.0 }
0x12e5   : > { %3417 = vadd.xlane.f32.xlu0 %v3416_v56 }
0x12f2   : > { %3449 = vrot.lane.b32.xlu1 %v6089_v20, %s5392_s27 }
0x12f6   : > { %3451 = vrot.lane.b32.xlu1 %v6087_v14, %s5392_s27 }
0x12fb   : > { %3447 = vrot.lane.b32.xlu0 %v6073_v11, %s5392_s27 }
0x135f   : > { %v4847_v42 = vpop.f32.mrb[56].mxu1 }
0x1360   : > { %v3053_v10 = vpop.f32.mrb[57].mxu1 }
0x1361   : > { %v4848_v8 = vpop.f32.mrb[58].mxu1 }
0x1362   : > { %v3085_v4 = vpack.c.bf16 %v4848_v8, %v4847_v42  ;;  %v3056_v15 = vpop.f32.mrb[59].mxu1  ;;  %v3409_v30 = vpop.xlane.xlu1 %3408 }
0x1363   : > { %v3084_v21 = vpack.c.bf16 %v3056_v15, %v3053_v10 }
0x1365   : > { %4855 = vmatprep.mubr.msk.bf16.mxu1 %vm381_vm1, %v3084_v21 }
0x1366   : > { %4856 = vmatmul.mubr.msk.bf16.vlgmr.msra.gmra.mrb[64].mxu1 %vm381_vm1, %v3085_v4  ;;  %v3412_v50 = vpop.xlane.xlu0 %3411  ;;  %v3403_v62 = vpop.xlane.xlu1 %3402 }
0x1367   : > { %4864 = vmatpush3.bf16.msra.mxu1 %v3181_v18  ;;  %v4851_v17 = vpop.f32.mrb[60].mxu1 }
0x1368   : > { %4889 = vmatprep.subr.bf16.mxu1 %v3446_v2  ;;  %v3069_v26 = vpop.f32.mrb[61].mxu1 }
0x1369   : > { %v4852_v19 = vpop.f32.mrb[62].mxu1 }
0x136a   : > { %v3087_v61 = vpack.c.bf16 %v4852_v19, %v4851_v17  ;;  %v3072_v25 = vpop.f32.mrb[63].mxu1  ;;  %v3406_v16 = vpop.xlane.xlu0 %3405  ;;  %v4294_v17 = vld [vmem:[%s6585_s7 + $0x18] sm:$0xf] }
0x136b   : > { %v3086_v22 = vpack.c.bf16 %v3072_v25, %v3069_v26  ;;  %5327 = vrcp.f32 %v3406_v16  ;;  %v3421_v28 = vpop.xlane.xlu1 %3420  ;;  %v3551_v26 = vsel %vm394_vm0, %v4294_v17, 0 }
0x136c   : > { %5329 = vrcp.f32 %v3403_v62 }
0x136d   : > { %4859 = vmatprep.mubr.msk.bf16.mxu1 %vm381_vm1, %v3086_v22  ;;  %5331 = vrcp.f32 %v3412_v50 }
0x136e   : > { %4860 = vmatmul.mubr.msk.bf16.gmra.mrb[68].mxu1 %vm381_vm1, %v3087_v61  ;;  %v3424_v27 = vpop.xlane.xlu0 %3423 }
0x136f   : > { %4865 = vmatprep.mubr.msk.bf16.mxu1 %vm381_vm1, %v2790_v37  ;;  %v3415_v24 = vpop.xlane.xlu1 %3414 }
0x1372   : > { %v3418_v55 = vpop.xlane.xlu0 %3417 }
0x1373   : > { %5333 = vrcp.f32 %v3418_v55  ;;  %v3450_v44 = vpop.permute.xlu1 %3449 }
0x1374   : > { %5335 = vrcp.f32 %v3409_v30 }
0x1375   : > { %v5328_v49 = vpop.eup %5327  ;;  %5337 = vrcp.f32 %v3415_v24 }
0x1376   : > { %4866 = vmatmul.mubr.msk.bf16.vlgmr.msra.gmra.mrb[64].mxu1 %vm381_vm1, %v2791_v3  ;;  %v3448_v38 = vpop.permute.xlu0 %3447  ;;  %v5330_v53 = vpop.eup %5329  ;;  %v3434_v0 = vmul.f32 %v5328_v49, %v6387_v45  ;;  %5339 = vrcp.f32 %v3424_v27 }
0x1377   : > { %4890 = vmatpush3.bf16.msra.mxu1 %v3446_v2  ;;  %4869 = vmatprep.mubr.msk.bf16.mxu1 %vm381_vm1, %v2792_v60  ;;  %v6443_v43 = vpop.f32.mrb[88].mxu0  ;;  %v3433_v33 = vmul.f32 %v5330_v53, %v6383_v9  ;;  %v5332_v58 = vpop.eup %5331  ;;  %5341 = vrcp.f32 %v3421_v28 }
0x1378   : > { %4891 = vmatprep.subr.bf16.mxu1 %v3448_v38  ;;  %v6445_v37 = vpop.f32.mrb[89].mxu0  ;;  %v3737_v60 = vsel %vm865_vm3, %v6443_v43, -inf  ;;  %v3452_v52 = vpop.permute.xlu1 %3451  ;;  %v3436_v2 = vmul.f32 %v5332_v58, %v6385_v5 }
0x1379   : > { %v6447_v23 = vpop.f32.mrb[90].mxu0  ;;  %v3731_v36 = vsel %vm865_vm3, %v6445_v37, -inf  ;;  %v3441_v32 = vpack.c.bf16 %v3434_v0, %v3433_v33 }
0x137a   : > { %v6452_v3 = vpop.f32.mrb[91].mxu0  ;;  %3732 = vmax.xlane.f32.xlu0 %v3731_v36  ;;  %v3740_v51 = vsel %vm865_vm3, %v6447_v23, -inf }
0x137b   : > { %4892 = vmatpush3.bf16.msra.mxu1 %v3448_v38  ;;  %v3734_v54 = vsel %vm865_vm3, %v6452_v3, -inf }
0x137c   : > { %4893 = vmatprep.subr.bf16.mxu1 %v3450_v44  ;;  %3735 = vmax.xlane.f32.xlu1 %v3734_v54 }
0x137d   : > { %v5334_v45 = vpop.eup %5333 }
0x137e   : > { %4870 = vmatmul.mubr.msk.bf16.gmra.mrb[68].mxu1 %vm381_vm1, %v2793_v59  ;;  %3738 = vmax.xlane.f32.xlu0 %v3737_v60  ;;  %v5336_v29 = vpop.eup %5335  ;;  %v3438_v59 = vmul.f32 %v5334_v45, %v6410_v34 }
0x137f   : > { %4894 = vmatpush3.bf16.msra.mxu1 %v3450_v44  ;;  %4897 = vmatprep.mubr.msk.bf16.mxu1 %vm865_vm3, %v3441_v32  ;;  %v4929_v9 = vpop.f32.mrb[92].mxu0  ;;  %v5338_v6 = vpop.eup %5337  ;;  %v3435_v8 = vmul.f32 %v5336_v29, %v6379_v7 }
0x1380   : > { %4895 = vmatprep.subr.bf16.mxu1 %v3452_v52  ;;  %v3716_v56 = vpop.f32.mrb[93].mxu0  ;;  %v3437_v4 = vmul.f32 %v5338_v6, %v6399_v31  ;;  %v3749_v30 = vsel %vm865_vm3, %v4929_v9, -inf  ;;  %v5340_v21 = vpop.eup %5339 }
0x1381   : > { %v4930_v42 = vpop.f32.mrb[94].mxu0  ;;  %v3743_v10 = vsel %vm865_vm3, %v3716_v56, -inf  ;;  %v3442_v15 = vpack.c.bf16 %v3436_v2, %v3435_v8  ;;  %v5342_v50 = vpop.eup %5341  ;;  %v3440_v7 = vmul.f32 %v5340_v21, %v6401_v48 }
0x1382   : > { %v3719_v1 = vpop.f32.mrb[95].mxu0  ;;  %3744 = vmax.xlane.f32.xlu1 %v3743_v10  ;;  %3741 = vmax.xlane.f32.xlu0 %v3740_v51  ;;  %v3443_v18 = vpack.c.bf16 %v3438_v59, %v3437_v4  ;;  %v3752_v34 = vsel %vm865_vm3, %v4930_v42, -inf  ;;  %v3439_v31 = vmul.f32 %v5342_v50, %v6393_v40 }
0x1383   : > { %4896 = vmatpush3.bf16.msra.mxu1 %v3452_v52  ;;  %v3746_v5 = vsel %vm865_vm3, %v3719_v1, -inf }
0x1384   : > { %v3444_v62 = vpack.c.bf16 %v3440_v7, %v3439_v31  ;;  %5052 = vmatprep.subr.msk.bf16.mxu1 %vm394_vm0, %v4294_v17 }
0x1386   : > { %3750 = vmax.xlane.f32.xlu1 %v3749_v30  ;;  %3747 = vmax.xlane.f32.xlu0 %v3746_v5 }
0x1387   : > { %4898 = vmatmul.mubr.msk.bf16.vlgmr.msra.gmra.mrb[72].mxu1 %vm865_vm3, %v3442_v15 }
0x1388   : > { %4901 = vmatprep.mubr.msk.bf16.mxu1 %vm865_vm3, %v3443_v18  ;;  %4906 = vmatpush3.bf16.msra.mxu1 %v3551_v26 }
0x138a   : > { %3753 = vmax.xlane.f32.xlu0 %v3752_v34 }
0x138f   : > { %4902 = vmatmul.mubr.msk.bf16.gmra.mrb[76].mxu1 %vm865_vm3, %v3444_v62 }
0x1397   : > { %3823 = vrot.lane.b32.xlu1 %v6075_v12, %s5393_s16 }
0x1407   : > { %v3733_v19 = vpop.xlane.xlu0 %3732 }
0x1408   : > { %v3755_v48 = vsub.f32 %v6445_v37, %v3733_v19 }
0x1409   : > { %v3736_v61 = vpop.xlane.xlu1 %3735 }
0x140a   : > { %v3763_v22 = vmul.f32 1.442695, %v3755_v48  ;;  %v3756_v28 = vsub.f32 %v6452_v3, %v3736_v61 }
0x140b   : > { %v3739_v40 = vpop.xlane.xlu0 %3738 }
0x140c   : > { %v3757_v25 = vsub.f32 %v6443_v43, %v3739_v40  ;;  %v3765_v38 = vmul.f32 1.442695, %v3756_v28 }
0x140e   : > { %v3767_v16 = vmul.f32 1.442695, %v3757_v25 }
0x140f   : > { %v3745_v27 = vpop.xlane.xlu1 %3744  ;;  %v3742_v24 = vpop.xlane.xlu0 %3741 }
0x1410   : > { %5343 = vpow2.f32 %v3767_v16  ;;  %v3758_v12 = vsub.f32 %v6447_v23, %v3742_v24  ;;  %v3759_v55 = vsub.f32 %v3716_v56, %v3745_v27 }
0x1411   : > { %5345 = vpow2.f32 %v3763_v22 }
0x1412   : > { %v3769_v49 = vmul.f32 1.442695, %v3758_v12  ;;  %v3771_v36 = vmul.f32 1.442695, %v3759_v55 }
0x1413   : > { %v3751_v53 = vpop.xlane.xlu1 %3750  ;;  %v3748_v44 = vpop.xlane.xlu0 %3747 }
0x1414   : > { %v3761_v37 = vsub.f32 %v4929_v9, %v3751_v53  ;;  %5347 = vpow2.f32 %v3769_v49  ;;  %v3760_v43 = vsub.f32 %v3719_v1, %v3748_v44 }
0x1415   : > { %5349 = vpow2.f32 %v3765_v38 }
0x1416   : > { %v3775_v0 = vmul.f32 1.442695, %v3761_v37  ;;  %v3773_v32 = vmul.f32 1.442695, %v3760_v43  ;;  %v4295_v43 = vld [vmem:[%s6585_s7 + $0x1c] sm:$0xf] }
0x1417   : > { %v3824_v54 = vpop.permute.xlu1 %3823  ;;  %v3754_v33 = vpop.xlane.xlu0 %3753 }
0x1418   : > { %5351 = vpow2.f32 %v3775_v0  ;;  %v3762_v3 = vsub.f32 %v4930_v42, %v3754_v33  ;;  %4931 = vmatprep.subr.bf16.mxu1 %v3824_v54 }
0x1419   : > { %5353 = vpow2.f32 %v3771_v36 }
0x141a   : > { %v6490_v60 = vpop.eup %5343  ;;  %v3777_v23 = vmul.f32 1.442695, %v3762_v3 }
0x141b   : > { %v3785_v58 = vsel %vm865_vm3, %v6490_v60, 0.0  ;;  %v5346_v45 = vpop.eup %5345 }
0x141c   : > { %5355 = vpow2.f32 %v3777_v23  ;;  %3786 = vadd.xlane.f32.xlu1 %v3785_v58  ;;  %v3779_v9 = vsel %vm865_vm3, %v5346_v45, 0.0  ;;  %v3929_v23 = vsel %vm394_vm0, %v4295_v43, 0 }
0x141d   : > { %5357 = vpow2.f32 %v3773_v32 }
0x141e   : > { %v6494_v52 = vpop.eup %5347 }
0x141f   : > { %v3788_v29 = vsel %vm865_vm3, %v6494_v52, 0.0  ;;  %v5350_v56 = vpop.eup %5349 }
0x1420   : > { %3780 = vadd.xlane.f32.xlu1 %v3779_v9  ;;  %3789 = vadd.xlane.f32.xlu0 %v3788_v29  ;;  %v3782_v10 = vsel %vm865_vm3, %v5350_v56, 0.0  ;;  %v5085_v29 = vld [vmem:[%s6587_s9 + $0x10] sm:$0xff]  }
0x1421   : > { %4957 = vmatprep.subr.bf16.mxu0 %v5085_v29 }
0x1422   : > { %v6499_v6 = vpop.eup %5351  ;;  %4958 = vmatpush3.bf16.msra.mxu0 %v5085_v29 }
0x1423   : > { %v3797_v2 = vsel %vm865_vm3, %v6499_v6, 0.0  ;;  %v6503_v42 = vpop.eup %5353 }
0x1424   : > { %3798 = vadd.xlane.f32.xlu1 %v3797_v2  ;;  %3783 = vadd.xlane.f32.xlu0 %v3782_v10  ;;  %v3791_v1 = vsel %vm865_vm3, %v6503_v42, 0.0 }
0x1426   : > { %v6506_v51 = vpop.eup %5355 }
0x1427   : > { %v3800_v59 = vsel %vm865_vm3, %v6506_v51, 0.0  ;;  %v5358_v8 = vpop.eup %5357 }
0x1428   : > { %3792 = vadd.xlane.f32.xlu1 %v3791_v1  ;;  %3801 = vadd.xlane.f32.xlu0 %v3800_v59  ;;  %v3794_v4 = vsel %vm865_vm3, %v5358_v8, 0.0 }
0x142c   : > { %3795 = vadd.xlane.f32.xlu0 %v3794_v4 }
0x1439   : > { %3827 = vrot.lane.b32.xlu1 %v6089_v20, %s5393_s16 }
0x143d   : > { %3829 = vrot.lane.b32.xlu1 %v6087_v14, %s5393_s16 }
0x1442   : > { %3825 = vrot.lane.b32.xlu0 %v6073_v11, %s5393_s16 }
0x145a   : > { %v4899_v15 = vpop.f32.mrb[72].mxu1 }
0x145b   : > { %v3503_v30 = vpop.f32.mrb[73].mxu1 }
0x145c   : > { %v4900_v5 = vpop.f32.mrb[74].mxu1 }
0x145d   : > { %v3535_v21 = vpack.c.bf16 %v4900_v5, %v4899_v15  ;;  %v3506_v18 = vpop.f32.mrb[75].mxu1  ;;  %v5086_v5 = vld [vmem:[%s6587_s9 + $0x18] sm:$0xff]  }
0x145e   : > { %v3534_v50 = vpack.c.bf16 %v3506_v18, %v3503_v30  ;;  %4959 = vmatprep.subr.bf16.mxu0 %v5086_v5 }
0x145f   : > { %4960 = vmatpush3.bf16.msra.mxu0 %v5086_v5 }
0x1460   : > { %4907 = vmatprep.mubr.msk.bf16.mxu1 %vm381_vm1, %v3534_v50 }
0x1461   : > { %4908 = vmatmul.mubr.msk.bf16.vlgmr.msra.gmra.mrb[64].mxu1 %vm381_vm1, %v3535_v21  ;;  %v4345_v21 = vld [vmem:[%s6586_s8 + $0x1] ss:$0 sm:$0xff] }
0x1462   : > { %4932 = vmatpush3.bf16.msra.mxu1 %v3824_v54  ;;  %v4903_v34 = vpop.f32.mrb[76].mxu1 }
0x1463   : > { %v3519_v7 = vpop.f32.mrb[77].mxu1 }
0x1464   : > { %v4904_v20 = vpop.f32.mrb[78].mxu1 }
0x1465   : > { %v3537_v31 = vpack.c.bf16 %v4904_v20, %v4903_v34  ;;  %v3522_v62 = vpop.f32.mrb[79].mxu1 }
0x1466   : > { %v3536_v14 = vpack.c.bf16 %v3522_v62, %v3519_v7 }
0x1468   : > { %4911 = vmatprep.mubr.msk.bf16.mxu1 %vm381_vm1, %v3536_v14 }
0x1469   : > { %4912 = vmatmul.mubr.msk.bf16.gmra.mrb[68].mxu1 %vm381_vm1, %v3537_v31 }
0x14a9   : > { %v3787_v11 = vpop.xlane.xlu1 %3786 }
0x14ad   : > { %v3781_v17 = vpop.xlane.xlu1 %3780  ;;  %v3790_v26 = vpop.xlane.xlu0 %3789 }
0x14ae   : > { %5359 = vrcp.f32 %v3781_v17 }
0x14b1   : > { %v3799_v19 = vpop.xlane.xlu1 %3798  ;;  %v3784_v48 = vpop.xlane.xlu0 %3783 }
0x14b2   : > { %5361 = vrcp.f32 %v3784_v48 }
0x14b3   : > { %5363 = vrcp.f32 %v3790_v26 }
0x14b4   : > { %5365 = vrcp.f32 %v3787_v11 }
0x14b5   : > { %v3802_v61 = vpop.xlane.xlu0 %3801  ;;  %v3793_v40 = vpop.xlane.xlu1 %3792 }
0x14b6   : > { %5367 = vrcp.f32 %v3793_v40 }
0x14b8   : > { %v5360_v22 = vpop.eup %5359 }
0x14b9   : > { %v3796_v25 = vpop.xlane.xlu0 %3795  ;;  %v3828_v28 = vpop.permute.xlu1 %3827  ;;  %v3811_v24 = vmul.f32 %v5360_v22, %v5346_v45 }
0x14ba   : > { %5369 = vrcp.f32 %v3796_v25 }
0x14bb   : > { %5371 = vrcp.f32 %v3802_v61 }
0x14bc   : > { %v5362_v16 = vpop.eup %5361  ;;  %5373 = vrcp.f32 %v3799_v19 }
0x14bd   : > { %v3826_v27 = vpop.permute.xlu0 %3825  ;;  %v3812_v12 = vmul.f32 %v5362_v16, %v5350_v56  ;;  %v5364_v49 = vpop.eup %5363 }
0x14be   : > { %4933 = vmatprep.subr.bf16.mxu1 %v3826_v27  ;;  %v5366_v38 = vpop.eup %5365  ;;  %v3830_v44 = vpop.permute.xlu1 %3829  ;;  %v3814_v36 = vmul.f32 %v5364_v49, %v6494_v52 }
0x14bf   : > { %4934 = vmatpush3.bf16.msra.mxu1 %v3826_v27  ;;  %v3819_v55 = vpack.c.bf16 %v3812_v12, %v3811_v24  ;;  %v3813_v54 = vmul.f32 %v5366_v38, %v6490_v60 }
0x14c0   : > { %4935 = vmatprep.subr.bf16.mxu1 %v3828_v28  ;;  %v5368_v53 = vpop.eup %5367 }
0x14c1   : > { %4939 = vmatprep.mubr.msk.bf16.mxu1 %vm865_vm3, %v3819_v55  ;;  %v3815_v33 = vmul.f32 %v5368_v53, %v6503_v42  ;;  %v3820_v3 = vpack.c.bf16 %v3814_v36, %v3813_v54 }
0x14c3   : > { %4936 = vmatpush3.bf16.msra.mxu1 %v3828_v28 }
0x14c4   : > { %v5370_v37 = vpop.eup %5369  ;;  %4937 = vmatprep.subr.bf16.mxu1 %v3830_v44 }
0x14c5   : > { %v3816_v0 = vmul.f32 %v5370_v37, %v5358_v8  ;;  %v5372_v32 = vpop.eup %5371 }
0x14c6   : > { %v5374_v45 = vpop.eup %5373  ;;  %v3818_v52 = vmul.f32 %v5372_v32, %v6506_v51 }
0x14c7   : > { %4938 = vmatpush3.bf16.msra.mxu1 %v3830_v44  ;;  %v3821_v58 = vpack.c.bf16 %v3816_v0, %v3815_v33  ;;  %v3817_v60 = vmul.f32 %v5374_v45, %v6499_v6 }
0x14c8   : > { %5057 = vmatprep.subr.msk.bf16.mxu1 %vm394_vm0, %v4295_v43 }
0x14c9   : > { %v3822_v9 = vpack.c.bf16 %v3818_v52, %v3817_v60 }
0x14ca   : > { %4940 = vmatmul.mubr.msk.bf16.vlgmr.msra.gmra.mrb[80].mxu1 %vm865_vm3, %v3820_v3 }
0x14cb   : > { %4943 = vmatprep.mubr.msk.bf16.mxu1 %vm865_vm3, %v3821_v58  ;;  %4948 = vmatpush3.bf16.msra.mxu1 %v3929_v23 }
0x14d2   : > { %4944 = vmatmul.mubr.msk.bf16.gmra.mrb[84].mxu1 %vm865_vm3, %v3822_v9 }
0x159d   : > { %v4941_v56 = vpop.f32.mrb[80].mxu1 }
0x159e   : > { %v3881_v2 = vpop.f32.mrb[81].mxu1 }
0x159f   : > { %v4942_v42 = vpop.f32.mrb[82].mxu1 }
0x15a0   : > { %v3913_v10 = vpack.c.bf16 %v4942_v42, %v4941_v56  ;;  %v3884_v1 = vpop.f32.mrb[83].mxu1 }
0x15a1   : > { %v3912_v59 = vpack.c.bf16 %v3884_v1, %v3881_v2 }
0x15a3   : > { %4949 = vmatprep.mubr.msk.bf16.mxu1 %vm381_vm1, %v3912_v59 }
0x15a4   : > { %4950 = vmatmul.mubr.msk.bf16.vlgmr.msra.gmra.mrb[64].mxu1 %vm381_vm1, %v3913_v10 }
0x15a5   : > { %v4945_v6 = vpop.f32.mrb[84].mxu1 }
0x15a6   : > { %v3897_v51 = vpop.f32.mrb[85].mxu1 }
0x15a7   : > { %v4946_v8 = vpop.f32.mrb[86].mxu1 }
0x15a8   : > { %v3915_v4 = vpack.c.bf16 %v4946_v8, %v4945_v6  ;;  %v3900_v15 = vpop.f32.mrb[87].mxu1 }
0x15a9   : > { %v3914_v30 = vpack.c.bf16 %v3900_v15, %v3897_v51 }
0x15ab   : > { %4953 = vmatprep.mubr.msk.bf16.mxu1 %vm381_vm1, %v3914_v30 }
0x15ac   : > { %4954 = vmatmul.mubr.msk.bf16.gmra.mrb[68].mxu1 %vm381_vm1, %v3915_v4 }
0x1677   : > { %v4951_v18 = vpop.f32.mrb[64].mxu1 }
0x1678   : > { %v3965_v50 = vpop.f32.mrb[65].mxu1  ;;  %v4014_v20 = vadd.f32 %v4951_v18, %v4345_v21 }
0x1679   : > { %v4012_v34 = vadd.f32 %v4345_v21, %v3965_v50  ;;  %v4952_v7 = vpop.f32.mrb[66].mxu1 }
0x167a   : > { %v4015_v31 = vadd.f32 %v4952_v7, %v4345_v21  ;;  %v3968_v62 = vpop.f32.mrb[67].mxu1  ;;  %v4022_v19 = vadd.f32 %v4014_v20, %v6048_v46 }
0x167b   : > { %v4013_v14 = vadd.f32 %v4345_v21, %v3968_v62  ;;  %v4020_v17 = vadd.f32 %v4012_v34, %v6044_v35 }
0x167c   : > { %v4023_v11 = vadd.f32 %v4015_v31, %v6042_v39 }
0x167d   : > { %v4021_v26 = vadd.f32 %v4013_v14, %v6046_v41 }
0x167e   : > { %v4029_v40 = vpack.c.bf16 %v4023_v11, %v4022_v19 }
0x167f   : > { %v4028_v48 = vpack.c.bf16 %v4021_v26, %v4020_v17  ;;  %v4955_v61 = vpop.f32.mrb[68].mxu1 }
0x1680   : > { %v3981_v25 = vpop.f32.mrb[69].mxu1  ;;  %v4018_v28 = vadd.f32 %v4955_v61, %v4345_v21 }
0x1681   : > { %v4016_v22 = vadd.f32 %v4345_v21, %v3981_v25  ;;  %v4956_v16 = vpop.f32.mrb[70].mxu1  ;;  %4961 = vmatprep.mubr.msk.bf16.mxu0 %vm539_vm2, %v4028_v48 }
0x1682   : > { %v4019_v27 = vadd.f32 %v4956_v16, %v4345_v21  ;;  %v3984_v24 = vpop.f32.mrb[71].mxu1  ;;  %4962 = vmatmul.mubr.msk.bf16.vlgmr.msra.gmra.mrb[96].mxu0 %vm539_vm2, %v4029_v40  ;;  %v4026_v12 = vadd.f32 %v4018_v28, %v6062_v47 }
0x1683   : > { %v4017_v39 = vadd.f32 %v4345_v21, %v3984_v24  ;;  %v4024_v41 = vadd.f32 %v4016_v22, %v6058_v13 }
0x1684   : > { %v4027_v35 = vadd.f32 %v4019_v27, %v6056_v57 }
0x1685   : > { %v4025_v46 = vadd.f32 %v4017_v39, %v6060_v63 }
0x1686   : > { %v4031_v49 = vpack.c.bf16 %v4027_v35, %v4026_v12 }
0x1687   : > { %v4030_v55 = vpack.c.bf16 %v4025_v46, %v4024_v41 }
0x1689   : > { %4965 = vmatprep.mubr.msk.bf16.mxu0 %vm539_vm2, %v4030_v55 }
0x168a   : > { %4966 = vmatmul.mubr.msk.bf16.gmra.mrb[100].mxu0 %vm539_vm2, %v4031_v49 }
0x1755   : > { %v4963_v38 = vpop.f32.mrb[96].mxu0 }
0x1756   : > { %v4104_v53 = vadd.f32 %v4963_v38, %v4022_v19  ;;  %v4095_v57 = vpop.f32.mrb[97].mxu0 }
0x1757   : > { %v4096_v44 = vadd.f32 %v4095_v57, %v4020_v17  ;;  %v4964_v13 = vpop.f32.mrb[98].mxu0 }
0x1758   : > { %4128 = vst.msk [vmem:[%s359_s29 + $0x10] sm:$0xff] %vm539_vm2, %v4104_v53  ;;  %v4107_v63 = vadd.f32 %v4964_v13, %v4023_v11  ;;  %v4098_v47 = vpop.f32.mrb[99].mxu0 }
0x1759   : > { %4126 = vst.msk [vmem:[%s359_s29] sm:$0xff] %vm539_vm2, %v4096_v44  ;;  %v4099_v37 = vadd.f32 %v4098_v47, %v4021_v26 }
0x175a   : > { %4129 = vst.msk [vmem:[%s359_s29 + $0x18] sm:$0xff] %vm539_vm2, %v4107_v63 }
0x175b   : > { %4127 = vst.msk [vmem:[%s359_s29 + $0x8] sm:$0xff] %vm539_vm2, %v4099_v37 }
0x175d   : > { %v4967_v36 = vpop.f32.mrb[100].mxu0 }
0x175e   : > { %v4120_v0 = vadd.f32 %v4967_v36, %v4026_v12  ;;  %v4111_v43 = vpop.f32.mrb[101].mxu0 }
0x175f   : > { %v4112_v54 = vadd.f32 %v4111_v43, %v4024_v41  ;;  %v4968_v33 = vpop.f32.mrb[102].mxu0 }
0x1760   : > { %4132 = vst.msk [vmem:[%s359_s29 + $0x30] sm:$0xff] %vm539_vm2, %v4120_v0  ;;  %v4123_v3 = vadd.f32 %v4968_v33, %v4027_v35  ;;  %v4114_v23 = vpop.f32.mrb[103].mxu0 }
0x1761   : > { %4130 = vst.msk [vmem:[%s359_s29 + $0x20] sm:$0xff] %vm539_vm2, %v4112_v54  ;;  %v4115_v32 = vadd.f32 %v4114_v23, %v4025_v46 }
0x1762   : > { %4133 = vst.msk [vmem:[%s359_s29 + $0x38] sm:$0xff] %vm539_vm2, %v4123_v3 }
0x1763   : > { %4131 = vst.msk [vmem:[%s359_s29 + $0x28] sm:$0xff] %vm539_vm2, %v4115_v32 }
0x1764 PF: > { %s20_s13 = sadd.s32 1, %s5381_s13  }
0x1765   : > { %p17_p4 = scmp.ge.s32.totalorder %s20_s13, 4  }
0x1767   :  { %19 = sbr.rel (!%p17_p4) target bundleno = 1 (0x1), region = 95 }

</bundles_post_ra>
